<compile_context>
chip_gen: v5e
topology: v5e:2x2
jax: 0.10.0
libtpu: 0.0.40
codegen_flags: <defaults>
</compile_context>

<pallas_src>
import functools

import jax
import jax.numpy as jnp
from jax.experimental import pallas as pl
from jax.experimental.pallas import tpu as pltpu

# Layer sizes of the PyTorch module.
DIMS = [2048, 512, 128, 32, 8, 2, 1]
LANE = 128


def _round_up(x, m):
    return (x + m - 1) // m * m


# All intermediate / output widths padded up to a lane multiple:
# [2048, 512, 128, 128, 128, 128, 128]
PADDED_DIMS = [DIMS[0]] + [_round_up(d, LANE) for d in DIMS[1:]]


def mlr_kernel(x_ref,
               w1_ref, b1_ref, w2_ref, b2_ref, w3_ref, b3_ref,
               w4_ref, b4_ref, w5_ref, b5_ref, w6_ref, b6_ref,
               o_ref):
    """Full 6-layer MLP forward for one batch tile.

    Matmuls run with bf16 operands on the MXU and f32 accumulation; the bias
    add + sigmoid epilogue stays in f32 (cheap on the VPU/EUP, and avoids the
    missing bf16 elementwise path on v5e).
    """
    def layer(h_bf16, w_ref, b_ref):
        z = jnp.dot(h_bf16, w_ref[...], preferred_element_type=jnp.float32)
        return jax.nn.sigmoid(z + b_ref[...])      # f32 epilogue

    h = x_ref[...]                                 # bf16 (tile_m, 2048)
    a = layer(h, w1_ref, b1_ref)
    a = layer(a.astype(jnp.bfloat16), w2_ref, b2_ref)
    a = layer(a.astype(jnp.bfloat16), w3_ref, b3_ref)
    a = layer(a.astype(jnp.bfloat16), w4_ref, b4_ref)
    a = layer(a.astype(jnp.bfloat16), w5_ref, b5_ref)
    a = layer(a.astype(jnp.bfloat16), w6_ref, b6_ref)
    o_ref[...] = a                                 # f32 (tile_m, 128), lane-dense


def _pad_params(params):
    """Cast weights to bf16 and pad every layer up to 128-lane widths.

    Padded output columns get zero weights and zero bias; their activations
    become sigmoid(0)=0.5, but the matching padded *input rows* of the next
    layer are zero, so they never contribute. Column 0 of the final padded
    layer is the real scalar output.
    """
    padded = []
    for li, (w, b) in enumerate(params):
        fan_in, fan_out = w.shape
        in_p, out_p = PADDED_DIMS[li], PADDED_DIMS[li + 1]
        wp = jnp.zeros((in_p, out_p), jnp.bfloat16).at[:fan_in, :fan_out].set(
            w.astype(jnp.bfloat16))
        bp = jnp.zeros((1, out_p), jnp.float32).at[:, :fan_out].set(
            b.astype(jnp.float32))
        padded.append((wp, bp))
    return padded


@functools.partial(jax.jit, static_argnames=("tile_m",))
def mlr_forward(x, params, *, tile_m=256):
    """x: (B, 2048) f32. params: list of (W (in,out), b (1,out)). Returns (B, 1)."""
    B, D = x.shape
    assert D == DIMS[0]

    # Batch tiling: cap the tile for tiny batches, pad B up to a tile multiple.
    tile_m = min(tile_m, _round_up(B, 8))
    Bp = _round_up(B, tile_m)
    x_pad = jnp.zeros((Bp, D), jnp.bfloat16).at[:B].set(x.astype(jnp.bfloat16))

    padded_params = _pad_params(params)
    flat_params, param_specs = [], []
    for (w, b) in padded_params:
        flat_params.extend([w, b])
        # Weights/biases: full-array blocks, constant index_map (resident
        # across all grid steps; ~2.3 MiB bf16 total).
        param_specs.append(pl.BlockSpec(w.shape, lambda i: (0, 0)))
        param_specs.append(pl.BlockSpec(b.shape, lambda i: (0, 0)))

    # Advisory cost estimate for the XLA scheduler.
    flops = 2 * Bp * sum(PADDED_DIMS[i] * PADDED_DIMS[i + 1]
                         for i in range(len(PADDED_DIMS) - 1))
    transcendentals = Bp * sum(PADDED_DIMS[1:])
    weight_bytes = sum(w.size * w.dtype.itemsize + b.size * b.dtype.itemsize
                       for (w, b) in padded_params)
    bytes_accessed = (x_pad.size * x_pad.dtype.itemsize
                      + Bp * PADDED_DIMS[-1] * 4 + weight_bytes)
    cost = pl.CostEstimate(flops=flops, transcendentals=transcendentals,
                           bytes_accessed=bytes_accessed)

    out_padded = pl.pallas_call(
        mlr_kernel,
        out_shape=jax.ShapeDtypeStruct((Bp, PADDED_DIMS[-1]), jnp.float32),
        grid_spec=pltpu.PrefetchScalarGridSpec(
            num_scalar_prefetch=0,
            grid=(Bp // tile_m,),
            in_specs=[pl.BlockSpec((tile_m, D), lambda i: (i, 0))] + param_specs,
            out_specs=pl.BlockSpec((tile_m, PADDED_DIMS[-1]), lambda i: (i, 0)),
        ),
        compiler_params=pltpu.CompilerParams(
            dimension_semantics=("parallel",),
            vmem_limit_bytes=48 * 1024 * 1024,
        ),
        cost_estimate=cost,
    )(x_pad, *flat_params)

    # Strip batch padding and the lane padding of the final layer.
    return out_padded[:B, :DIMS[-1]]


def init_params(key):
    """Deterministic synthetic weights, same shapes as the PyTorch module."""
    params = []
    for li in range(len(DIMS) - 1):
        fan_in, fan_out = DIMS[li], DIMS[li + 1]
        key, kw, kb = jax.random.split(key, 3)
        bound = 1.0 / jnp.sqrt(fan_in)
        # PyTorch stores W as (out, in); we store transposed (in, out).
        w = jax.random.uniform(kw, (fan_in, fan_out), jnp.float32, -bound, bound)
        b = jax.random.uniform(kb, (1, fan_out), jnp.float32, -bound, bound)
        params.append((w, b))
    return params


def mlr_reference(x, params):
    h = x
    for (w, b) in params:
        h = jax.nn.sigmoid(h @ w + b)
    return h


if __name__ == "__main__":
    key = jax.random.PRNGKey(0)
    key, kx = jax.random.split(key)

    B = 4  # small batch; wrapper pads to a sublane/tile multiple internally
    x = jax.random.normal(kx, (B, DIMS[0]), jnp.float32)
    params = init_params(key)

    y = mlr_forward(x, params, tile_m=256)
    y = jax.block_until_ready(y)

    y_ref = mlr_reference(x, params)
    assert y.shape == (B, 1)
    # bf16 matmul operands -> compare against the f32 reference with a
    # correspondingly looser tolerance.
    assert jnp.allclose(y, y_ref, atol=2e-2, rtol=2e-2), "mismatch vs reference"

    print("KERNEL_OK")
</pallas_src>

<mosaic_0001>
module attributes {stable_mosaic.version = 11 : i64} {
  func.func @mlr_kernel(%arg0: i32, %arg1: memref<8x2048xbf16, #tpu.memory_space<vmem>>, %arg2: memref<2048x512xbf16, #tpu.memory_space<vmem>>, %arg3: memref<1x512xf32, #tpu.memory_space<vmem>>, %arg4: memref<512x128xbf16, #tpu.memory_space<vmem>>, %arg5: memref<1x128xf32, #tpu.memory_space<vmem>>, %arg6: memref<128x128xbf16, #tpu.memory_space<vmem>>, %arg7: memref<1x128xf32, #tpu.memory_space<vmem>>, %arg8: memref<128x128xbf16, #tpu.memory_space<vmem>>, %arg9: memref<1x128xf32, #tpu.memory_space<vmem>>, %arg10: memref<128x128xbf16, #tpu.memory_space<vmem>>, %arg11: memref<1x128xf32, #tpu.memory_space<vmem>>, %arg12: memref<128x128xbf16, #tpu.memory_space<vmem>>, %arg13: memref<1x128xf32, #tpu.memory_space<vmem>>, %arg14: memref<8x128xf32, #tpu.memory_space<vmem>>) attributes {dimension_semantics = [#tpu.dimension_semantics<parallel>], iteration_bounds = array<i64: 1>, scalar_prefetch = 0 : i64, scratch_operands = 0 : i64, tpu.core_type = #tpu.core_type<tc>, window_params = [{transform_indices = @transform_0, window_bounds = array<i64: 8, 2048>}, {pipeline_mode = #tpu.pipeline_mode<synchronous>, transform_indices = @transform_1, window_bounds = array<i64: 2048, 512>}, {pipeline_mode = #tpu.pipeline_mode<synchronous>, transform_indices = @transform_2, window_bounds = array<i64: 1, 512>}, {pipeline_mode = #tpu.pipeline_mode<synchronous>, transform_indices = @transform_3, window_bounds = array<i64: 512, 128>}, {pipeline_mode = #tpu.pipeline_mode<synchronous>, transform_indices = @transform_4, window_bounds = array<i64: 1, 128>}, {pipeline_mode = #tpu.pipeline_mode<synchronous>, transform_indices = @transform_5, window_bounds = array<i64: 128, 128>}, {pipeline_mode = #tpu.pipeline_mode<synchronous>, transform_indices = @transform_6, window_bounds = array<i64: 1, 128>}, {pipeline_mode = #tpu.pipeline_mode<synchronous>, transform_indices = @transform_7, window_bounds = array<i64: 128, 128>}, {pipeline_mode = #tpu.pipeline_mode<synchronous>, transform_indices = @transform_8, window_bounds = array<i64: 1, 128>}, {pipeline_mode = #tpu.pipeline_mode<synchronous>, transform_indices = @transform_9, window_bounds = array<i64: 128, 128>}, {pipeline_mode = #tpu.pipeline_mode<synchronous>, transform_indices = @transform_10, window_bounds = array<i64: 1, 128>}, {pipeline_mode = #tpu.pipeline_mode<synchronous>, transform_indices = @transform_11, window_bounds = array<i64: 128, 128>}, {pipeline_mode = #tpu.pipeline_mode<synchronous>, transform_indices = @transform_12, window_bounds = array<i64: 1, 128>}, {transform_indices = @transform_13, window_bounds = array<i64: 8, 128>}]} {
    %c0 = arith.constant 0 : index
    %c0_0 = arith.constant 0 : index
    %0 = vector.load %arg1[%c0, %c0_0] : memref<8x2048xbf16, #tpu.memory_space<vmem>>, vector<8x2048xbf16>
    %c0_1 = arith.constant 0 : index
    %c0_2 = arith.constant 0 : index
    %1 = vector.load %arg2[%c0_1, %c0_2] : memref<2048x512xbf16, #tpu.memory_space<vmem>>, vector<2048x512xbf16>
    %cst = arith.constant dense<0.000000e+00> : vector<8x512xf32>
    %2 = tpu.matmul %0, %1, %cst {dimension_numbers = #tpu.dot_dimension_numbers<[1], [0], [0], [1], [0, 0, 1, 1], [], []>} : vector<8x2048xbf16>, vector<2048x512xbf16>, vector<8x512xf32> -> vector<8x512xf32>
    %c0_3 = arith.constant 0 : index
    %c0_4 = arith.constant 0 : index
    %3 = vector.load %arg3[%c0_3, %c0_4] : memref<1x512xf32, #tpu.memory_space<vmem>>, vector<1x512xf32>
    %4 = vector.broadcast %3 : vector<1x512xf32> to vector<8x512xf32>
    %5 = arith.addf %2, %4 : vector<8x512xf32>
    %6 = arith.negf %5 : vector<8x512xf32>
    %7 = math.exp %6 : vector<8x512xf32>
    %cst_5 = arith.constant 1.000000e+00 : f32
    %8 = vector.broadcast %cst_5 : f32 to vector<8x512xf32>
    %9 = arith.addf %8, %7 : vector<8x512xf32>
    %10 = arith.divf %8, %9 : vector<8x512xf32>
    %11 = arith.truncf %10 : vector<8x512xf32> to vector<8x512xbf16>
    %c0_6 = arith.constant 0 : index
    %c0_7 = arith.constant 0 : index
    %12 = vector.load %arg4[%c0_6, %c0_7] : memref<512x128xbf16, #tpu.memory_space<vmem>>, vector<512x128xbf16>
    %cst_8 = arith.constant dense<0.000000e+00> : vector<8x128xf32>
    %13 = tpu.matmul %11, %12, %cst_8 {dimension_numbers = #tpu.dot_dimension_numbers<[1], [0], [0], [1], [0, 0, 1, 1], [], []>} : vector<8x512xbf16>, vector<512x128xbf16>, vector<8x128xf32> -> vector<8x128xf32>
    %c0_9 = arith.constant 0 : index
    %c0_10 = arith.constant 0 : index
    %14 = vector.load %arg5[%c0_9, %c0_10] : memref<1x128xf32, #tpu.memory_space<vmem>>, vector<1x128xf32>
    %15 = vector.broadcast %14 : vector<1x128xf32> to vector<8x128xf32>
    %16 = arith.addf %13, %15 : vector<8x128xf32>
    %17 = arith.negf %16 : vector<8x128xf32>
    %18 = math.exp %17 : vector<8x128xf32>
    %cst_11 = arith.constant 1.000000e+00 : f32
    %19 = vector.broadcast %cst_11 : f32 to vector<8x128xf32>
    %20 = arith.addf %19, %18 : vector<8x128xf32>
    %21 = arith.divf %19, %20 : vector<8x128xf32>
    %22 = arith.truncf %21 : vector<8x128xf32> to vector<8x128xbf16>
    %c0_12 = arith.constant 0 : index
    %c0_13 = arith.constant 0 : index
    %23 = vector.load %arg6[%c0_12, %c0_13] : memref<128x128xbf16, #tpu.memory_space<vmem>>, vector<128x128xbf16>
    %cst_14 = arith.constant dense<0.000000e+00> : vector<8x128xf32>
    %24 = tpu.matmul %22, %23, %cst_14 {dimension_numbers = #tpu.dot_dimension_numbers<[1], [0], [0], [1], [0, 0, 1, 1], [], []>} : vector<8x128xbf16>, vector<128x128xbf16>, vector<8x128xf32> -> vector<8x128xf32>
    %c0_15 = arith.constant 0 : index
    %c0_16 = arith.constant 0 : index
    %25 = vector.load %arg7[%c0_15, %c0_16] : memref<1x128xf32, #tpu.memory_space<vmem>>, vector<1x128xf32>
    %26 = vector.broadcast %25 : vector<1x128xf32> to vector<8x128xf32>
    %27 = arith.addf %24, %26 : vector<8x128xf32>
    %28 = arith.negf %27 : vector<8x128xf32>
    %29 = math.exp %28 : vector<8x128xf32>
    %cst_17 = arith.constant 1.000000e+00 : f32
    %30 = vector.broadcast %cst_17 : f32 to vector<8x128xf32>
    %31 = arith.addf %30, %29 : vector<8x128xf32>
    %32 = arith.divf %30, %31 : vector<8x128xf32>
    %33 = arith.truncf %32 : vector<8x128xf32> to vector<8x128xbf16>
    %c0_18 = arith.constant 0 : index
    %c0_19 = arith.constant 0 : index
    %34 = vector.load %arg8[%c0_18, %c0_19] : memref<128x128xbf16, #tpu.memory_space<vmem>>, vector<128x128xbf16>
    %cst_20 = arith.constant dense<0.000000e+00> : vector<8x128xf32>
    %35 = tpu.matmul %33, %34, %cst_20 {dimension_numbers = #tpu.dot_dimension_numbers<[1], [0], [0], [1], [0, 0, 1, 1], [], []>} : vector<8x128xbf16>, vector<128x128xbf16>, vector<8x128xf32> -> vector<8x128xf32>
    %c0_21 = arith.constant 0 : index
    %c0_22 = arith.constant 0 : index
    %36 = vector.load %arg9[%c0_21, %c0_22] : memref<1x128xf32, #tpu.memory_space<vmem>>, vector<1x128xf32>
    %37 = vector.broadcast %36 : vector<1x128xf32> to vector<8x128xf32>
    %38 = arith.addf %35, %37 : vector<8x128xf32>
    %39 = arith.negf %38 : vector<8x128xf32>
    %40 = math.exp %39 : vector<8x128xf32>
    %cst_23 = arith.constant 1.000000e+00 : f32
    %41 = vector.broadcast %cst_23 : f32 to vector<8x128xf32>
    %42 = arith.addf %41, %40 : vector<8x128xf32>
    %43 = arith.divf %41, %42 : vector<8x128xf32>
    %44 = arith.truncf %43 : vector<8x128xf32> to vector<8x128xbf16>
    %c0_24 = arith.constant 0 : index
    %c0_25 = arith.constant 0 : index
    %45 = vector.load %arg10[%c0_24, %c0_25] : memref<128x128xbf16, #tpu.memory_space<vmem>>, vector<128x128xbf16>
    %cst_26 = arith.constant dense<0.000000e+00> : vector<8x128xf32>
    %46 = tpu.matmul %44, %45, %cst_26 {dimension_numbers = #tpu.dot_dimension_numbers<[1], [0], [0], [1], [0, 0, 1, 1], [], []>} : vector<8x128xbf16>, vector<128x128xbf16>, vector<8x128xf32> -> vector<8x128xf32>
    %c0_27 = arith.constant 0 : index
    %c0_28 = arith.constant 0 : index
    %47 = vector.load %arg11[%c0_27, %c0_28] : memref<1x128xf32, #tpu.memory_space<vmem>>, vector<1x128xf32>
    %48 = vector.broadcast %47 : vector<1x128xf32> to vector<8x128xf32>
    %49 = arith.addf %46, %48 : vector<8x128xf32>
    %50 = arith.negf %49 : vector<8x128xf32>
    %51 = math.exp %50 : vector<8x128xf32>
    %cst_29 = arith.constant 1.000000e+00 : f32
    %52 = vector.broadcast %cst_29 : f32 to vector<8x128xf32>
    %53 = arith.addf %52, %51 : vector<8x128xf32>
    %54 = arith.divf %52, %53 : vector<8x128xf32>
    %55 = arith.truncf %54 : vector<8x128xf32> to vector<8x128xbf16>
    %c0_30 = arith.constant 0 : index
    %c0_31 = arith.constant 0 : index
    %56 = vector.load %arg12[%c0_30, %c0_31] : memref<128x128xbf16, #tpu.memory_space<vmem>>, vector<128x128xbf16>
    %cst_32 = arith.constant dense<0.000000e+00> : vector<8x128xf32>
    %57 = tpu.matmul %55, %56, %cst_32 {dimension_numbers = #tpu.dot_dimension_numbers<[1], [0], [0], [1], [0, 0, 1, 1], [], []>} : vector<8x128xbf16>, vector<128x128xbf16>, vector<8x128xf32> -> vector<8x128xf32>
    %c0_33 = arith.constant 0 : index
    %c0_34 = arith.constant 0 : index
    %58 = vector.load %arg13[%c0_33, %c0_34] : memref<1x128xf32, #tpu.memory_space<vmem>>, vector<1x128xf32>
    %59 = vector.broadcast %58 : vector<1x128xf32> to vector<8x128xf32>
    %60 = arith.addf %57, %59 : vector<8x128xf32>
    %61 = arith.negf %60 : vector<8x128xf32>
    %62 = math.exp %61 : vector<8x128xf32>
    %cst_35 = arith.constant 1.000000e+00 : f32
    %63 = vector.broadcast %cst_35 : f32 to vector<8x128xf32>
    %64 = arith.addf %63, %62 : vector<8x128xf32>
    %65 = arith.divf %63, %64 : vector<8x128xf32>
    %c0_36 = arith.constant 0 : index
    %c0_37 = arith.constant 0 : index
    %66 = vector.load %arg14[%c0_36, %c0_37] : memref<8x128xf32, #tpu.memory_space<vmem>>, vector<8x128xf32>
    tpu.vector_store %arg14[%c0_36, %c0_37], %65 {strides = array<i32>} : memref<8x128xf32, #tpu.memory_space<vmem>>, vector<8x128xf32>,
    return
  }
  func.func @transform_0(%arg0: i32) -> (i32, i32) {
    %c0_i32 = arith.constant 0 : i32
    %c0_i32_0 = arith.constant 0 : i32
    return %arg0, %c0_i32 : i32, i32
  }
  func.func @transform_1(%arg0: i32) -> (i32, i32) {
    %c0_i32 = arith.constant 0 : i32
    %c0_i32_0 = arith.constant 0 : i32
    %c0_i32_1 = arith.constant 0 : i32
    return %c0_i32, %c0_i32_0 : i32, i32
  }
  func.func @transform_2(%arg0: i32) -> (i32, i32) {
    %c0_i32 = arith.constant 0 : i32
    %c0_i32_0 = arith.constant 0 : i32
    %c0_i32_1 = arith.constant 0 : i32
    return %c0_i32, %c0_i32_0 : i32, i32
  }
  func.func @transform_3(%arg0: i32) -> (i32, i32) {
    %c0_i32 = arith.constant 0 : i32
    %c0_i32_0 = arith.constant 0 : i32
    %c0_i32_1 = arith.constant 0 : i32
    return %c0_i32, %c0_i32_0 : i32, i32
  }
  func.func @transform_4(%arg0: i32) -> (i32, i32) {
    %c0_i32 = arith.constant 0 : i32
    %c0_i32_0 = arith.constant 0 : i32
    %c0_i32_1 = arith.constant 0 : i32
    return %c0_i32, %c0_i32_0 : i32, i32
  }
  func.func @transform_5(%arg0: i32) -> (i32, i32) {
    %c0_i32 = arith.constant 0 : i32
    %c0_i32_0 = arith.constant 0 : i32
    %c0_i32_1 = arith.constant 0 : i32
    return %c0_i32, %c0_i32_0 : i32, i32
  }
  func.func @transform_6(%arg0: i32) -> (i32, i32) {
    %c0_i32 = arith.constant 0 : i32
    %c0_i32_0 = arith.constant 0 : i32
    %c0_i32_1 = arith.constant 0 : i32
    return %c0_i32, %c0_i32_0 : i32, i32
  }
  func.func @transform_7(%arg0: i32) -> (i32, i32) {
    %c0_i32 = arith.constant 0 : i32
    %c0_i32_0 = arith.constant 0 : i32
    %c0_i32_1 = arith.constant 0 : i32
    return %c0_i32, %c0_i32_0 : i32, i32
  }
  func.func @transform_8(%arg0: i32) -> (i32, i32) {
    %c0_i32 = arith.constant 0 : i32
    %c0_i32_0 = arith.constant 0 : i32
    %c0_i32_1 = arith.constant 0 : i32
    return %c0_i32, %c0_i32_0 : i32, i32
  }
  func.func @transform_9(%arg0: i32) -> (i32, i32) {
    %c0_i32 = arith.constant 0 : i32
    %c0_i32_0 = arith.constant 0 : i32
    %c0_i32_1 = arith.constant 0 : i32
    return %c0_i32, %c0_i32_0 : i32, i32
  }
  func.func @transform_10(%arg0: i32) -> (i32, i32) {
    %c0_i32 = arith.constant 0 : i32
    %c0_i32_0 = arith.constant 0 : i32
    %c0_i32_1 = arith.constant 0 : i32
    return %c0_i32, %c0_i32_0 : i32, i32
  }
  func.func @transform_11(%arg0: i32) -> (i32, i32) {
    %c0_i32 = arith.constant 0 : i32
    %c0_i32_0 = arith.constant 0 : i32
    %c0_i32_1 = arith.constant 0 : i32
    return %c0_i32, %c0_i32_0 : i32, i32
  }
  func.func @transform_12(%arg0: i32) -> (i32, i32) {
    %c0_i32 = arith.constant 0 : i32
    %c0_i32_0 = arith.constant 0 : i32
    %c0_i32_1 = arith.constant 0 : i32
    return %c0_i32, %c0_i32_0 : i32, i32
  }
  func.func @transform_13(%arg0: i32) -> (i32, i32) {
    %c0_i32 = arith.constant 0 : i32
    %c0_i32_0 = arith.constant 0 : i32
    return %arg0, %c0_i32 : i32, i32
  }
}

</mosaic_0001>

<bundles_post_ra>
// kernel: mlr_forward.1
= control target key start
LH: loop header
LB: loop body
LE: loop exit
PB: predicated region body
PF: predicated region fallthrough
CT: control target
= control target key end

     0   :  { %s11352_s1 = inlined_call_operand.vmem [shape: bf16[2048,512], index: 1, kind: input, shape index: {}]   ;;  %s11353_s0 = inlined_call_operand.vmem [shape: bf16[8,2048], index: 0, kind: input, shape index: {}]   ;;  %s11354_s2 = inlined_call_operand.vmem [shape: f32[1,512], index: 2, kind: input, shape index: {}]   ;;  %s11355_s3 = inlined_call_operand.vmem [shape: bf16[512,128], index: 3, kind: input, shape index: {}]   ;;  %s11356_s4 = inlined_call_operand.vmem [shape: f32[1,128], index: 4, kind: input, shape index: {}]   ;;  %s11357_s6 = inlined_call_operand.vmem [shape: f32[1,128], index: 6, kind: input, shape index: {}]   ;;  %s11358_s5 = inlined_call_operand.vmem [shape: bf16[128,128], index: 5, kind: input, shape index: {}]   ;;  %s11359_s8 = inlined_call_operand.vmem [shape: f32[1,128], index: 8, kind: input, shape index: {}]   ;;  %s11360_s7 = inlined_call_operand.vmem [shape: bf16[128,128], index: 7, kind: input, shape index: {}]   ;;  %s11361_s10 = inlined_call_operand.vmem [shape: f32[1,128], index: 10, kind: input, shape index: {}]   ;;  %s11362_s9 = inlined_call_operand.vmem [shape: bf16[128,128], index: 9, kind: input, shape index: {}]   ;;  %s11363_s12 = inlined_call_operand.vmem [shape: f32[1,128], index: 12, kind: input, shape index: {}]   ;;  %s11364_s11 = inlined_call_operand.vmem [shape: bf16[128,128], index: 11, kind: input, shape index: {}]   ;;  %s11365_s13 = inlined_call_operand.vmem [shape: f32[8,128], index: 13, kind: output, shape index: {}]  }
   0x1   :  { %v4956_v0 = vld [vmem:[%s11352_s1 + $0xe0] sm:$0xf]  ;;  %v7185_v1 = vld [vmem:[%s11352_s1 + $0xec] sm:$0xf0] }
   0x2   :  { %v5084_v2 = vld [vmem:[%s11352_s1 + $0x1e0] sm:$0xf]  ;;  %v4957_v3 = vor.u32 %v7185_v1, %v4956_v0  ;;  %v7217_v4 = vld [vmem:[%s11352_s1 + $0x1ec] sm:$0xf0] }
   0x3   :  { %v5212_v5 = vld [vmem:[%s11352_s1 + $0x2e0] sm:$0xf]  ;;  %v7249_v6 = vld [vmem:[%s11352_s1 + $0x2ec] sm:$0xf0]  ;;  %v5085_v7 = vor.u32 %v7217_v4, %v5084_v2 }
   0x4   :  { %v5213_v8 = vor.u32 %v7249_v6, %v5212_v5  ;;  %v5340_v9 = vld [vmem:[%s11352_s1 + $0x3e0] sm:$0xf]  ;;  %v7281_v10 = vld [vmem:[%s11352_s1 + $0x3ec] sm:$0xf0]  ;;  %3190 = vmatpush.bf16.msra.mxu0 %v4957_v3 }
   0x5   :  { %v4940_v11 = vld [vmem:[%s11352_s1 + $0xc0] sm:$0xf]  ;;  %v5341_v12 = vor.u32 %v7281_v10, %v5340_v9  ;;  %v7181_v13 = vld [vmem:[%s11352_s1 + $0xcc] sm:$0xf0]  ;;  %3203 = vmatpush.bf16.msra.mxu1 %v5085_v7 }
   0x6   :  { %v5068_v14 = vld [vmem:[%s11352_s1 + $0x1c0] sm:$0xf]  ;;  %v7213_v15 = vld [vmem:[%s11352_s1 + $0x1cc] sm:$0xf0]  ;;  %3216 = vmatpush.bf16.msra.mxu2 %v5213_v8  ;;  %v4941_v16 = vor.u32 %v7181_v13, %v4940_v11 }
   0x7   :  { %v5069_v17 = vor.u32 %v7213_v15, %v5068_v14  ;;  %v5196_v18 = vld [vmem:[%s11352_s1 + $0x2c0] sm:$0xf]  ;;  %v7245_v19 = vld [vmem:[%s11352_s1 + $0x2cc] sm:$0xf0]  ;;  %3229 = vmatpush.bf16.msra.mxu3 %v5341_v12 }
   0x8   :  { %v5324_v20 = vld [vmem:[%s11352_s1 + $0x3c0] sm:$0xf]  ;;  %v5197_v21 = vor.u32 %v7245_v19, %v5196_v18  ;;  %v7277_v22 = vld [vmem:[%s11352_s1 + $0x3cc] sm:$0xf0]  ;;  %3191 = vmatpush.bf16.msra.mxu0 %v4941_v16 }
   0x9   :  { %v4924_v23 = vld [vmem:[%s11352_s1 + $0xa0] sm:$0xf]  ;;  %v7177_v24 = vld [vmem:[%s11352_s1 + $0xac] sm:$0xf0]  ;;  %v5325_v25 = vor.u32 %v7277_v22, %v5324_v20  ;;  %3204 = vmatpush.bf16.msra.mxu1 %v5069_v17 }
   0xa   :  { %v5052_v26 = vld [vmem:[%s11352_s1 + $0x1a0] sm:$0xf]  ;;  %v7209_v27 = vld [vmem:[%s11352_s1 + $0x1ac] sm:$0xf0]  ;;  %v4925_v29 = vor.u32 %v7177_v24, %v4924_v23  ;;  %3217 = vmatpush.bf16.msra.mxu2 %v5197_v21 }
   0xb   :  { %v5180_v28 = vld [vmem:[%s11352_s1 + $0x2a0] sm:$0xf]  ;;  %v7241_v30 = vld [vmem:[%s11352_s1 + $0x2ac] sm:$0xf0]  ;;  %v5053_v33 = vor.u32 %v7209_v27, %v5052_v26  ;;  %3230 = vmatpush.bf16.msra.mxu3 %v5325_v25 }
   0xc   :  { %v5308_v31 = vld [vmem:[%s11352_s1 + $0x3a0] sm:$0xf]  ;;  %v7273_v32 = vld [vmem:[%s11352_s1 + $0x3ac] sm:$0xf0]  ;;  %v5181_v34 = vor.u32 %v7241_v30, %v5180_v28  ;;  %3192 = vmatpush.bf16.msra.mxu0 %v4925_v29 }
   0xd   :  { %v4908_v35 = vld [vmem:[%s11352_s1 + $0x80] sm:$0xf]  ;;  %v7173_v36 = vld [vmem:[%s11352_s1 + $0x8c] sm:$0xf0]  ;;  %v5309_v38 = vor.u32 %v7273_v32, %v5308_v31  ;;  %3205 = vmatpush.bf16.msra.mxu1 %v5053_v33 }
   0xe   :  { %v5036_v37 = vld [vmem:[%s11352_s1 + $0x180] sm:$0xf]  ;;  %v7205_v39 = vld [vmem:[%s11352_s1 + $0x18c] sm:$0xf0]  ;;  %v4909_v44 = vor.u32 %v7173_v36, %v4908_v35  ;;  %3218 = vmatpush.bf16.msra.mxu2 %v5181_v34 }
   0xf   :  { %v5164_v40 = vld [vmem:[%s11352_s1 + $0x280] sm:$0xf]  ;;  %v7237_v41 = vld [vmem:[%s11352_s1 + $0x28c] sm:$0xf0]  ;;  %v5037_v45 = vor.u32 %v7205_v39, %v5036_v37  ;;  %3231 = vmatpush.bf16.msra.mxu3 %v5309_v38 }
  0x10   :  { %v5292_v42 = vld [vmem:[%s11352_s1 + $0x380] sm:$0xf]  ;;  %v7269_v43 = vld [vmem:[%s11352_s1 + $0x38c] sm:$0xf0]  ;;  %v5165_v46 = vor.u32 %v7237_v41, %v5164_v40  ;;  %3193 = vmatpush.bf16.msra.mxu0 %v4909_v44 }
  0x11   :  { %v4892_v47 = vld [vmem:[%s11352_s1 + $0x60] sm:$0xf]  ;;  %v7169_v48 = vld [vmem:[%s11352_s1 + $0x6c] sm:$0xf0]  ;;  %v5293_v50 = vor.u32 %v7269_v43, %v5292_v42  ;;  %3206 = vmatpush.bf16.msra.mxu1 %v5037_v45 }
  0x12   :  { %v5020_v49 = vld [vmem:[%s11352_s1 + $0x160] sm:$0xf]  ;;  %v7201_v51 = vld [vmem:[%s11352_s1 + $0x16c] sm:$0xf0]  ;;  %v4893_v56 = vor.u32 %v7169_v48, %v4892_v47  ;;  %3219 = vmatpush.bf16.msra.mxu2 %v5165_v46 }
  0x13   :  { %v5148_v52 = vld [vmem:[%s11352_s1 + $0x260] sm:$0xf]  ;;  %v7233_v53 = vld [vmem:[%s11352_s1 + $0x26c] sm:$0xf0]  ;;  %v5021_v57 = vor.u32 %v7201_v51, %v5020_v49  ;;  %3232 = vmatpush.bf16.msra.mxu3 %v5293_v50 }
  0x14   :  { %v5276_v54 = vld [vmem:[%s11352_s1 + $0x360] sm:$0xf]  ;;  %v7265_v55 = vld [vmem:[%s11352_s1 + $0x36c] sm:$0xf0]  ;;  %v5149_v58 = vor.u32 %v7233_v53, %v5148_v52  ;;  %3194 = vmatpush.bf16.msra.mxu0 %v4893_v56 }
  0x15   :  { %v4876_v59 = vld [vmem:[%s11352_s1 + $0x40] sm:$0xf]  ;;  %v7165_v60 = vld [vmem:[%s11352_s1 + $0x4c] sm:$0xf0]  ;;  %v5277_v62 = vor.u32 %v7265_v55, %v5276_v54  ;;  %3207 = vmatpush.bf16.msra.mxu1 %v5021_v57 }
  0x16   :  { %v5004_v61 = vld [vmem:[%s11352_s1 + $0x140] sm:$0xf]  ;;  %v7197_v63 = vld [vmem:[%s11352_s1 + $0x14c] sm:$0xf0]  ;;  %v4877_v4 = vor.u32 %v7165_v60, %v4876_v59  ;;  %3220 = vmatpush.bf16.msra.mxu2 %v5149_v58 }
  0x17   :  { %v5132_v0 = vld [vmem:[%s11352_s1 + $0x240] sm:$0xf]  ;;  %v7229_v1 = vld [vmem:[%s11352_s1 + $0x24c] sm:$0xf0]  ;;  %v5005_v5 = vor.u32 %v7197_v63, %v5004_v61  ;;  %3233 = vmatpush.bf16.msra.mxu3 %v5277_v62 }
  0x18   :  { %v5260_v2 = vld [vmem:[%s11352_s1 + $0x340] sm:$0xf]  ;;  %v7261_v3 = vld [vmem:[%s11352_s1 + $0x34c] sm:$0xf0]  ;;  %v5133_v6 = vor.u32 %v7229_v1, %v5132_v0  ;;  %3195 = vmatpush.bf16.msra.mxu0 %v4877_v4 }
  0x19   :  { %v4860_v7 = vld [vmem:[%s11352_s1 + $0x20] sm:$0xf]  ;;  %v7161_v8 = vld [vmem:[%s11352_s1 + $0x2c] sm:$0xf0]  ;;  %v5261_v10 = vor.u32 %v7261_v3, %v5260_v2  ;;  %3208 = vmatpush.bf16.msra.mxu1 %v5005_v5  ;;  %v45_v2 = vld [vmem:[%s11353_s0 + $0x8] sm:$0xff] }
  0x1a   :  { %v4988_v9 = vld [vmem:[%s11352_s1 + $0x120] sm:$0xf]  ;;  %v7193_v11 = vld [vmem:[%s11352_s1 + $0x12c] sm:$0xf0]  ;;  %v4861_v16 = vor.u32 %v7161_v8, %v4860_v7  ;;  %3221 = vmatpush.bf16.msra.mxu2 %v5133_v6  ;;  %v584_v8 = vunpack.c.l.b16 %v45_v2 }
  0x1b   :  { %v5116_v12 = vld [vmem:[%s11352_s1 + $0x220] sm:$0xf]  ;;  %v7225_v13 = vld [vmem:[%s11352_s1 + $0x22c] sm:$0xf0]  ;;  %v4989_v19 = vor.u32 %v7193_v11, %v4988_v9  ;;  %3234 = vmatpush.bf16.msra.mxu3 %v5261_v10  ;;  %v585_v10 = vunpack.c.h.b16 %v45_v2 }
  0x1c   :  { %v5244_v14 = vld [vmem:[%s11352_s1 + $0x320] sm:$0xf]  ;;  %v7257_v15 = vld [vmem:[%s11352_s1 + $0x32c] sm:$0xf0]  ;;  %v5117_v20 = vor.u32 %v7225_v13, %v5116_v12  ;;  %3196 = vmatpush.bf16.msra.mxu0 %v4861_v16 }
  0x1d   :  { %v4844_v17 = vld [vmem:[%s11352_s1] sm:$0xf]  ;;  %v7157_v18 = vld [vmem:[%s11352_s1 + $0xc] sm:$0xf0]  ;;  %v5245_v24 = vor.u32 %v7257_v15, %v5244_v14  ;;  %3209 = vmatpush.bf16.msra.mxu1 %v4989_v19 }
  0x1e   :  { %v4972_v21 = vld [vmem:[%s11352_s1 + $0x100] sm:$0xf]  ;;  %v7189_v22 = vld [vmem:[%s11352_s1 + $0x10c] sm:$0xf0]  ;;  %v4845_v31 = vor.u32 %v7157_v18, %v4844_v17  ;;  %3222 = vmatpush.bf16.msra.mxu2 %v5117_v20  ;;  %v8138_v18 = vpack.c.b16 %v584_v8, %v584_v8  ;;  %v8142_v20 = vpack.c.b16 %v585_v10, %v585_v10 }
  0x1f   :  { %v5100_v23 = vld [vmem:[%s11352_s1 + $0x200] sm:$0xf]  ;;  %v7221_v25 = vld [vmem:[%s11352_s1 + $0x20c] sm:$0xf0]  ;;  %v4973_v35 = vor.u32 %v7189_v22, %v4972_v21  ;;  %3235 = vmatpush.bf16.msra.mxu3 %v5245_v24 }
  0x20   :  { %v5228_v26 = vld [vmem:[%s11352_s1 + $0x300] sm:$0xf]  ;;  %v7253_v27 = vld [vmem:[%s11352_s1 + $0x30c] sm:$0xf0]  ;;  %v5101_v36 = vor.u32 %v7221_v25, %v5100_v23  ;;  %3197 = vmatpush.bf16.msra.mxu0 %v4845_v31 }
  0x21   :  { %v5468_v28 = vld [vmem:[%s11352_s1 + $0x4e0] sm:$0xf]  ;;  %v7313_v29 = vld [vmem:[%s11352_s1 + $0x4ec] sm:$0xf0]  ;;  %v5229_v39 = vor.u32 %v7253_v27, %v5228_v26  ;;  %3210 = vmatpush.bf16.msra.mxu1 %v4973_v35 }
  0x22   :  { %v5596_v30 = vld [vmem:[%s11352_s1 + $0x5e0] sm:$0xf]  ;;  %v7345_v32 = vld [vmem:[%s11352_s1 + $0x5ec] sm:$0xf0]  ;;  %v5469_v40 = vor.u32 %v7313_v29, %v5468_v28  ;;  %3223 = vmatpush.bf16.msra.mxu2 %v5101_v36 }
  0x23   :  { %v5724_v33 = vld [vmem:[%s11352_s1 + $0x6e0] sm:$0xf]  ;;  %v7377_v34 = vld [vmem:[%s11352_s1 + $0x6ec] sm:$0xf0]  ;;  %v5597_v41 = vor.u32 %v7345_v32, %v5596_v30  ;;  %3236 = vmatpush.bf16.msra.mxu3 %v5229_v39 }
  0x24   :  { %v5852_v37 = vld [vmem:[%s11352_s1 + $0x7e0] sm:$0xf]  ;;  %v7409_v38 = vld [vmem:[%s11352_s1 + $0x7ec] sm:$0xf0]  ;;  %v5725_v42 = vor.u32 %v7377_v34, %v5724_v33  ;;  %3242 = vmatpush.bf16.msrb.mxu0 %v5469_v40 }
  0x25   :  { %v5452_v43 = vld [vmem:[%s11352_s1 + $0x4c0] sm:$0xf]  ;;  %v7309_v44 = vld [vmem:[%s11352_s1 + $0x4cc] sm:$0xf0]  ;;  %v5853_v46 = vor.u32 %v7409_v38, %v5852_v37  ;;  %3255 = vmatpush.bf16.msrb.mxu1 %v5597_v41  ;;  %3224 = vmatmul.bf16.vlgmr.msra.gmra.mxu2 %v8138_v18 }
  0x26   :  { %v5580_v45 = vld [vmem:[%s11352_s1 + $0x5c0] sm:$0xf]  ;;  %v7341_v47 = vld [vmem:[%s11352_s1 + $0x5cc] sm:$0xf0]  ;;  %v5453_v52 = vor.u32 %v7309_v44, %v5452_v43  ;;  %3268 = vmatpush.bf16.msrb.mxu2 %v5725_v42  ;;  %3237 = vmatmul.bf16.vlgmr.msra.gmra.mxu3 %v8142_v20 }
  0x27   :  { %v5708_v48 = vld [vmem:[%s11352_s1 + $0x6c0] sm:$0xf]  ;;  %v7373_v49 = vld [vmem:[%s11352_s1 + $0x6cc] sm:$0xf0]  ;;  %v5581_v54 = vor.u32 %v7341_v47, %v5580_v45  ;;  %3281 = vmatpush.bf16.msrb.mxu3 %v5853_v46 }
  0x28   :  { %v5836_v50 = vld [vmem:[%s11352_s1 + $0x7c0] sm:$0xf]  ;;  %v7405_v51 = vld [vmem:[%s11352_s1 + $0x7cc] sm:$0xf0]  ;;  %v5709_v55 = vor.u32 %v7373_v49, %v5708_v48  ;;  %3243 = vmatpush.bf16.msrb.mxu0 %v5453_v52 }
  0x29   :  { %v5436_v53 = vld [vmem:[%s11352_s1 + $0x4a0] sm:$0xf]  ;;  %v7305_v56 = vld [vmem:[%s11352_s1 + $0x4ac] sm:$0xf0]  ;;  %v5837_v59 = vor.u32 %v7405_v51, %v5836_v50  ;;  %3256 = vmatpush.bf16.msrb.mxu1 %v5581_v54 }
  0x2a   :  { %v5564_v57 = vld [vmem:[%s11352_s1 + $0x5a0] sm:$0xf]  ;;  %v7337_v58 = vld [vmem:[%s11352_s1 + $0x5ac] sm:$0xf0]  ;;  %v5437_v0 = vor.u32 %v7305_v56, %v5436_v53  ;;  %3269 = vmatpush.bf16.msrb.mxu2 %v5709_v55 }
  0x2b   :  { %v5692_v60 = vld [vmem:[%s11352_s1 + $0x6a0] sm:$0xf]  ;;  %v7369_v61 = vld [vmem:[%s11352_s1 + $0x6ac] sm:$0xf0]  ;;  %v5565_v1 = vor.u32 %v7337_v58, %v5564_v57  ;;  %3282 = vmatpush.bf16.msrb.mxu3 %v5837_v59 }
  0x2c   :  { %v5820_v62 = vld [vmem:[%s11352_s1 + $0x7a0] sm:$0xf]  ;;  %v7401_v63 = vld [vmem:[%s11352_s1 + $0x7ac] sm:$0xf0]  ;;  %v5693_v4 = vor.u32 %v7369_v61, %v5692_v60  ;;  %3244 = vmatpush.bf16.msrb.mxu0 %v5437_v0 }
  0x2d   :  { %v44_v3 = vld [vmem:[%s11353_s0] sm:$0xff]  ;;  %v7301_v6 = vld [vmem:[%s11352_s1 + $0x48c] sm:$0xf0]  ;;  %v5821_v11 = vor.u32 %v7401_v63, %v5820_v62  ;;  %3257 = vmatpush.bf16.msrb.mxu1 %v5565_v1 }
  0x2e   :  { %v5420_v5 = vld [vmem:[%s11352_s1 + $0x480] sm:$0xf]  ;;  %v582_v9 = vunpack.c.l.b16 %v44_v3  ;;  %v7333_v12 = vld [vmem:[%s11352_s1 + $0x58c] sm:$0xf0]  ;;  %v583_v15 = vunpack.c.h.b16 %v44_v3  ;;  %3270 = vmatpush.bf16.msrb.mxu2 %v5693_v4  ;;  %v47_v3 = vld [vmem:[%s11353_s0 + $0x18] sm:$0xff] }
  0x2f   :  { %v5548_v7 = vld [vmem:[%s11352_s1 + $0x580] sm:$0xf]  ;;  %v7365_v14 = vld [vmem:[%s11352_s1 + $0x68c] sm:$0xf0]  ;;  %v5421_v21 = vor.u32 %v7301_v6, %v5420_v5  ;;  %3283 = vmatpush.bf16.msrb.mxu3 %v5821_v11 }
  0x30   :  { %v5676_v13 = vld [vmem:[%s11352_s1 + $0x680] sm:$0xf]  ;;  %v7397_v17 = vld [vmem:[%s11352_s1 + $0x78c] sm:$0xf0]  ;;  %v8140_v19 = vpack.c.b16 %v582_v9, %v582_v9  ;;  %v8144_v22 = vpack.c.b16 %v583_v15, %v583_v15  ;;  %v5549_v23 = vor.u32 %v7333_v12, %v5548_v7  ;;  %v588_v15 = vunpack.c.l.b16 %v47_v3 }
  0x31   :  { %v5804_v16 = vld [vmem:[%s11352_s1 + $0x780] sm:$0xf]  ;;  %v5677_v24 = vor.u32 %v7365_v14, %v5676_v13  ;;  %v7297_v26 = vld [vmem:[%s11352_s1 + $0x46c] sm:$0xf0]  ;;  %3245 = vmatpush.bf16.msrb.mxu0 %v5421_v21 }
  0x32   :  { %v5404_v25 = vld [vmem:[%s11352_s1 + $0x460] sm:$0xf]  ;;  %v5805_v28 = vor.u32 %v7397_v17, %v5804_v16  ;;  %v7329_v29 = vld [vmem:[%s11352_s1 + $0x56c] sm:$0xf0]  ;;  %3198 = vmatmul.bf16.vlgmr.msra.gmra.mxu0 %v8140_v19  ;;  %3211 = vmatmul.bf16.vlgmr.msra.gmra.mxu1 %v8144_v22 }
  0x33   :  { %v5532_v27 = vld [vmem:[%s11352_s1 + $0x560] sm:$0xf]  ;;  %v7361_v31 = vld [vmem:[%s11352_s1 + $0x66c] sm:$0xf0]  ;;  %v5405_v34 = vor.u32 %v7297_v26, %v5404_v25  ;;  %3258 = vmatpush.bf16.msrb.mxu1 %v5549_v23  ;;  %3271 = vmatpush.bf16.msrb.mxu2 %v5677_v24  ;;  %v589_v25 = vunpack.c.h.b16 %v47_v3 }
  0x34   :  { %v5660_v30 = vld [vmem:[%s11352_s1 + $0x660] sm:$0xf]  ;;  %v7393_v33 = vld [vmem:[%s11352_s1 + $0x76c] sm:$0xf0]  ;;  %v5533_v35 = vor.u32 %v7329_v29, %v5532_v27  ;;  %3284 = vmatpush.bf16.msrb.mxu3 %v5805_v28 }
  0x35   :  { %v5788_v32 = vld [vmem:[%s11352_s1 + $0x760] sm:$0xf]  ;;  %v5661_v36 = vor.u32 %v7361_v31, %v5660_v30  ;;  %v7293_v38 = vld [vmem:[%s11352_s1 + $0x44c] sm:$0xf0]  ;;  %3246 = vmatpush.bf16.msrb.mxu0 %v5405_v34 }
  0x36   :  { %v5388_v37 = vld [vmem:[%s11352_s1 + $0x440] sm:$0xf]  ;;  %v5789_v40 = vor.u32 %v7393_v33, %v5788_v32  ;;  %v7325_v41 = vld [vmem:[%s11352_s1 + $0x54c] sm:$0xf0] }
  0x37   :  { %v5516_v39 = vld [vmem:[%s11352_s1 + $0x540] sm:$0xf]  ;;  %v7357_v43 = vld [vmem:[%s11352_s1 + $0x64c] sm:$0xf0]  ;;  %v5389_v46 = vor.u32 %v7293_v38, %v5388_v37  ;;  %3259 = vmatpush.bf16.msrb.mxu1 %v5533_v35  ;;  %3272 = vmatpush.bf16.msrb.mxu2 %v5661_v36  ;;  %v8294_v38 = vpack.c.b16 %v588_v15, %v588_v15 }
  0x38   :  { %v5644_v42 = vld [vmem:[%s11352_s1 + $0x640] sm:$0xf]  ;;  %v7389_v45 = vld [vmem:[%s11352_s1 + $0x74c] sm:$0xf0]  ;;  %v5517_v47 = vor.u32 %v7325_v41, %v5516_v39  ;;  %3285 = vmatpush.bf16.msrb.mxu3 %v5789_v40 }
  0x39   :  { %v5772_v44 = vld [vmem:[%s11352_s1 + $0x740] sm:$0xf]  ;;  %v5645_v48 = vor.u32 %v7357_v43, %v5644_v42  ;;  %v7289_v50 = vld [vmem:[%s11352_s1 + $0x42c] sm:$0xf0]  ;;  %3247 = vmatpush.bf16.msrb.mxu0 %v5389_v46  ;;  %v8304_v42 = vpack.c.b16 %v589_v25, %v589_v25 }
  0x3a   :  { %v5372_v49 = vld [vmem:[%s11352_s1 + $0x420] sm:$0xf]  ;;  %v5773_v52 = vor.u32 %v7389_v45, %v5772_v44  ;;  %v7321_v53 = vld [vmem:[%s11352_s1 + $0x52c] sm:$0xf0] }
  0x3b   :  { %v5500_v51 = vld [vmem:[%s11352_s1 + $0x520] sm:$0xf]  ;;  %v7353_v55 = vld [vmem:[%s11352_s1 + $0x62c] sm:$0xf0]  ;;  %v5373_v59 = vor.u32 %v7289_v50, %v5372_v49  ;;  %3260 = vmatpush.bf16.msrb.mxu1 %v5517_v47  ;;  %3273 = vmatpush.bf16.msrb.mxu2 %v5645_v48 }
  0x3c   :  { %v5628_v54 = vld [vmem:[%s11352_s1 + $0x620] sm:$0xf]  ;;  %v7385_v57 = vld [vmem:[%s11352_s1 + $0x72c] sm:$0xf0]  ;;  %v5501_v63 = vor.u32 %v7321_v53, %v5500_v51  ;;  %3286 = vmatpush.bf16.msrb.mxu3 %v5773_v52 }
  0x3d   :  { %v5756_v56 = vld [vmem:[%s11352_s1 + $0x720] sm:$0xf]  ;;  %v7285_v60 = vld [vmem:[%s11352_s1 + $0x40c] sm:$0xf0]  ;;  %v5629_v0 = vor.u32 %v7353_v55, %v5628_v54  ;;  %3248 = vmatpush.bf16.msrb.mxu0 %v5373_v59 }
  0x3e   :  { %v5356_v58 = vld [vmem:[%s11352_s1 + $0x400] sm:$0xf]  ;;  %v7317_v62 = vld [vmem:[%s11352_s1 + $0x50c] sm:$0xf0]  ;;  %v5757_v4 = vor.u32 %v7385_v57, %v5756_v56 }
  0x3f   :  { %v5484_v61 = vld [vmem:[%s11352_s1 + $0x500] sm:$0xf]  ;;  %v7349_v2 = vld [vmem:[%s11352_s1 + $0x60c] sm:$0xf0]  ;;  %v5357_v11 = vor.u32 %v7285_v60, %v5356_v58  ;;  %3261 = vmatpush.bf16.msrb.mxu1 %v5501_v63  ;;  %3274 = vmatpush.bf16.msrb.mxu2 %v5629_v0 }
  0x40   :  { %v5612_v1 = vld [vmem:[%s11352_s1 + $0x600] sm:$0xf]  ;;  %v7381_v6 = vld [vmem:[%s11352_s1 + $0x70c] sm:$0xf0]  ;;  %v5485_v16 = vor.u32 %v7317_v62, %v5484_v61  ;;  %3287 = vmatpush.bf16.msrb.mxu3 %v5757_v4 }
  0x41   :  { %v5740_v5 = vld [vmem:[%s11352_s1 + $0x700] sm:$0xf]  ;;  %v46_v7 = vld [vmem:[%s11353_s0 + $0x10] sm:$0xff]  ;;  %v5613_v17 = vor.u32 %v7349_v2, %v5612_v1  ;;  %3249 = vmatpush.bf16.msrb.mxu0 %v5357_v11 }
  0x42   :  { %v5980_v8 = vld [vmem:[%s11352_s1 + $0x8e0] sm:$0xf]  ;;  %v7441_v9 = vld [vmem:[%s11352_s1 + $0x8ec] sm:$0xf0]  ;;  %v586_v24 = vunpack.c.l.b16 %v46_v7  ;;  %v5741_v26 = vor.u32 %v7381_v6, %v5740_v5  ;;  %v587_v28 = vunpack.c.h.b16 %v46_v7 }
  0x43   :  { %v6108_v10 = vld [vmem:[%s11352_s1 + $0x9e0] sm:$0xf]  ;;  %v7473_v12 = vld [vmem:[%s11352_s1 + $0x9ec] sm:$0xf0]  ;;  %v5981_v27 = vor.u32 %v7441_v9, %v5980_v8  ;;  %3262 = vmatpush.bf16.msrb.mxu1 %v5485_v16  ;;  %3275 = vmatpush.bf16.msrb.mxu2 %v5613_v17 }
  0x44   :  { %v6236_v13 = vld [vmem:[%s11352_s1 + $0xae0] sm:$0xf]  ;;  %v7505_v14 = vld [vmem:[%s11352_s1 + $0xaec] sm:$0xf0]  ;;  %v6109_v29 = vor.u32 %v7473_v12, %v6108_v10  ;;  %v8302_v41 = vpack.c.b16 %v586_v24, %v586_v24  ;;  %3288 = vmatpush.bf16.msrb.mxu3 %v5741_v26  ;;  %v8306_v44 = vpack.c.b16 %v587_v28, %v587_v28 }
  0x45   :  { %v6364_v21 = vld [vmem:[%s11352_s1 + $0xbe0] sm:$0xf]  ;;  %v7537_v23 = vld [vmem:[%s11352_s1 + $0xbec] sm:$0xf0]  ;;  %v6237_v30 = vor.u32 %v7505_v14, %v6236_v13  ;;  %3294 = vmatpush.bf16.msra.mxu0 %v5981_v27 }
  0x46   :  { %v5964_v31 = vld [vmem:[%s11352_s1 + $0x8c0] sm:$0xf]  ;;  %v7437_v32 = vld [vmem:[%s11352_s1 + $0x8cc] sm:$0xf0]  ;;  %v6365_v34 = vor.u32 %v7537_v23, %v6364_v21  ;;  %3276 = vmatmul.bf16.vlgmr.msrb.gmra.mxu2 %v8294_v38  ;;  %3250 = vmatmul.bf16.vlgmr.msrb.gmra.mxu0 %v8302_v41 }
  0x47   :  { %v6092_v33 = vld [vmem:[%s11352_s1 + $0x9c0] sm:$0xf]  ;;  %v7469_v35 = vld [vmem:[%s11352_s1 + $0x9cc] sm:$0xf0]  ;;  %v5965_v43 = vor.u32 %v7437_v32, %v5964_v31  ;;  %3307 = vmatpush.bf16.msra.mxu1 %v6109_v29  ;;  %3320 = vmatpush.bf16.msra.mxu2 %v6237_v30 }
  0x48   :  { %v6220_v36 = vld [vmem:[%s11352_s1 + $0xac0] sm:$0xf]  ;;  %v7501_v37 = vld [vmem:[%s11352_s1 + $0xacc] sm:$0xf0]  ;;  %v6093_v45 = vor.u32 %v7469_v35, %v6092_v33  ;;  %3333 = vmatpush.bf16.msra.mxu3 %v6365_v34  ;;  %3263 = vmatmul.bf16.vlgmr.msrb.gmra.mxu1 %v8306_v44 }
  0x49   :  { %v6348_v39 = vld [vmem:[%s11352_s1 + $0xbc0] sm:$0xf]  ;;  %v7533_v40 = vld [vmem:[%s11352_s1 + $0xbcc] sm:$0xf0]  ;;  %v6221_v46 = vor.u32 %v7501_v37, %v6220_v36  ;;  %3289 = vmatmul.bf16.vlgmr.msrb.gmra.mxu3 %v8304_v42  ;;  %3295 = vmatpush.bf16.msra.mxu0 %v5965_v43 }
  0x4a   :  { %v5948_v47 = vld [vmem:[%s11352_s1 + $0x8a0] sm:$0xf]  ;;  %v7433_v48 = vld [vmem:[%s11352_s1 + $0x8ac] sm:$0xf0]  ;;  %v6349_v50 = vor.u32 %v7533_v40, %v6348_v39 }
  0x4b   :  { %v6076_v49 = vld [vmem:[%s11352_s1 + $0x9a0] sm:$0xf]  ;;  %v7465_v51 = vld [vmem:[%s11352_s1 + $0x9ac] sm:$0xf0]  ;;  %v5949_v56 = vor.u32 %v7433_v48, %v5948_v47  ;;  %3308 = vmatpush.bf16.msra.mxu1 %v6093_v45  ;;  %3321 = vmatpush.bf16.msra.mxu2 %v6221_v46 }
  0x4c   :  { %v6204_v52 = vld [vmem:[%s11352_s1 + $0xaa0] sm:$0xf]  ;;  %v7497_v53 = vld [vmem:[%s11352_s1 + $0xaac] sm:$0xf0]  ;;  %v6077_v57 = vor.u32 %v7465_v51, %v6076_v49  ;;  %3334 = vmatpush.bf16.msra.mxu3 %v6349_v50 }
  0x4d   :  { %v6332_v54 = vld [vmem:[%s11352_s1 + $0xba0] sm:$0xf]  ;;  %v7529_v55 = vld [vmem:[%s11352_s1 + $0xbac] sm:$0xf0]  ;;  %v6205_v58 = vor.u32 %v7497_v53, %v6204_v52  ;;  %3296 = vmatpush.bf16.msra.mxu0 %v5949_v56 }
  0x4e   :  { %v5932_v59 = vld [vmem:[%s11352_s1 + $0x880] sm:$0xf]  ;;  %v7429_v60 = vld [vmem:[%s11352_s1 + $0x88c] sm:$0xf0]  ;;  %v6333_v62 = vor.u32 %v7529_v55, %v6332_v54 }
  0x4f   :  { %v6060_v61 = vld [vmem:[%s11352_s1 + $0x980] sm:$0xf]  ;;  %v7461_v63 = vld [vmem:[%s11352_s1 + $0x98c] sm:$0xf0]  ;;  %v5933_v4 = vor.u32 %v7429_v60, %v5932_v59  ;;  %3309 = vmatpush.bf16.msra.mxu1 %v6077_v57  ;;  %3322 = vmatpush.bf16.msra.mxu2 %v6205_v58 }
  0x50   :  { %v6188_v0 = vld [vmem:[%s11352_s1 + $0xa80] sm:$0xf]  ;;  %v7493_v1 = vld [vmem:[%s11352_s1 + $0xa8c] sm:$0xf0]  ;;  %v6061_v5 = vor.u32 %v7461_v63, %v6060_v61  ;;  %3335 = vmatpush.bf16.msra.mxu3 %v6333_v62  ;;  %v49_v61 = vld [vmem:[%s11353_s0 + $0x28] sm:$0xff] }
  0x51   :  { %v6316_v2 = vld [vmem:[%s11352_s1 + $0xb80] sm:$0xf]  ;;  %v7525_v3 = vld [vmem:[%s11352_s1 + $0xb8c] sm:$0xf0]  ;;  %v6189_v6 = vor.u32 %v7493_v1, %v6188_v0  ;;  %3297 = vmatpush.bf16.msra.mxu0 %v5933_v4 }
  0x52   :  { %v5916_v7 = vld [vmem:[%s11352_s1 + $0x860] sm:$0xf]  ;;  %v7425_v8 = vld [vmem:[%s11352_s1 + $0x86c] sm:$0xf0]  ;;  %v6317_v10 = vor.u32 %v7525_v3, %v6316_v2 }
  0x53   :  { %v6044_v9 = vld [vmem:[%s11352_s1 + $0x960] sm:$0xf]  ;;  %v7457_v11 = vld [vmem:[%s11352_s1 + $0x96c] sm:$0xf0]  ;;  %v5917_v16 = vor.u32 %v7425_v8, %v5916_v7  ;;  %3310 = vmatpush.bf16.msra.mxu1 %v6061_v5  ;;  %3323 = vmatpush.bf16.msra.mxu2 %v6189_v6 }
  0x54   :  { %v6172_v12 = vld [vmem:[%s11352_s1 + $0xa60] sm:$0xf]  ;;  %v7489_v13 = vld [vmem:[%s11352_s1 + $0xa6c] sm:$0xf0]  ;;  %v6045_v17 = vor.u32 %v7457_v11, %v6044_v9  ;;  %3336 = vmatpush.bf16.msra.mxu3 %v6317_v10  ;;  %v592_v10 = vunpack.c.l.b16 %v49_v61 }
  0x55   :  { %v6300_v14 = vld [vmem:[%s11352_s1 + $0xb60] sm:$0xf]  ;;  %v7521_v15 = vld [vmem:[%s11352_s1 + $0xb6c] sm:$0xf0]  ;;  %v6173_v21 = vor.u32 %v7489_v13, %v6172_v12  ;;  %3298 = vmatpush.bf16.msra.mxu0 %v5917_v16 }
  0x56   :  { %v5900_v23 = vld [vmem:[%s11352_s1 + $0x840] sm:$0xf]  ;;  %v7421_v24 = vld [vmem:[%s11352_s1 + $0x84c] sm:$0xf0]  ;;  %v6301_v26 = vor.u32 %v7521_v15, %v6300_v14  ;;  %v593_v14 = vunpack.c.h.b16 %v49_v61 }
  0x57   :  { %v6028_v25 = vld [vmem:[%s11352_s1 + $0x940] sm:$0xf]  ;;  %v7453_v27 = vld [vmem:[%s11352_s1 + $0x94c] sm:$0xf0]  ;;  %v5901_v32 = vor.u32 %v7421_v24, %v5900_v23  ;;  %3311 = vmatpush.bf16.msra.mxu1 %v6045_v17  ;;  %3324 = vmatpush.bf16.msra.mxu2 %v6173_v21 }
  0x58   :  { %v6156_v28 = vld [vmem:[%s11352_s1 + $0xa40] sm:$0xf]  ;;  %v7485_v29 = vld [vmem:[%s11352_s1 + $0xa4c] sm:$0xf0]  ;;  %v6029_v33 = vor.u32 %v7453_v27, %v6028_v25  ;;  %3337 = vmatpush.bf16.msra.mxu3 %v6301_v26 }
  0x59   :  { %v6284_v30 = vld [vmem:[%s11352_s1 + $0xb40] sm:$0xf]  ;;  %v7517_v31 = vld [vmem:[%s11352_s1 + $0xb4c] sm:$0xf0]  ;;  %v6157_v34 = vor.u32 %v7485_v29, %v6156_v28  ;;  %3299 = vmatpush.bf16.msra.mxu0 %v5901_v32  ;;  %v8506_v29 = vpack.c.b16 %v592_v10, %v592_v10 }
  0x5a   :  { %v5884_v35 = vld [vmem:[%s11352_s1 + $0x820] sm:$0xf]  ;;  %v7417_v36 = vld [vmem:[%s11352_s1 + $0x82c] sm:$0xf0]  ;;  %v6285_v39 = vor.u32 %v7517_v31, %v6284_v30 }
  0x5b   :  { %v6012_v37 = vld [vmem:[%s11352_s1 + $0x920] sm:$0xf]  ;;  %v7449_v40 = vld [vmem:[%s11352_s1 + $0x92c] sm:$0xf0]  ;;  %v5885_v49 = vor.u32 %v7417_v36, %v5884_v35  ;;  %3312 = vmatpush.bf16.msra.mxu1 %v6029_v33  ;;  %3325 = vmatpush.bf16.msra.mxu2 %v6157_v34  ;;  %v8516_v33 = vpack.c.b16 %v593_v14, %v593_v14 }
  0x5c   :  { %v6140_v43 = vld [vmem:[%s11352_s1 + $0xa20] sm:$0xf]  ;;  %v7481_v45 = vld [vmem:[%s11352_s1 + $0xa2c] sm:$0xf0]  ;;  %v6013_v53 = vor.u32 %v7449_v40, %v6012_v37  ;;  %3338 = vmatpush.bf16.msra.mxu3 %v6285_v39 }
  0x5d   :  { %v6268_v46 = vld [vmem:[%s11352_s1 + $0xb20] sm:$0xf]  ;;  %v7513_v47 = vld [vmem:[%s11352_s1 + $0xb2c] sm:$0xf0]  ;;  %v6141_v54 = vor.u32 %v7481_v45, %v6140_v43  ;;  %3300 = vmatpush.bf16.msra.mxu0 %v5885_v49 }
  0x5e   :  { %v5868_v48 = vld [vmem:[%s11352_s1 + $0x800] sm:$0xf]  ;;  %v7413_v50 = vld [vmem:[%s11352_s1 + $0x80c] sm:$0xf0]  ;;  %v6269_v58 = vor.u32 %v7513_v47, %v6268_v46 }
  0x5f   :  { %v5996_v51 = vld [vmem:[%s11352_s1 + $0x900] sm:$0xf]  ;;  %v7445_v52 = vld [vmem:[%s11352_s1 + $0x90c] sm:$0xf0]  ;;  %v5869_v1 = vor.u32 %v7413_v50, %v5868_v48  ;;  %3313 = vmatpush.bf16.msra.mxu1 %v6013_v53  ;;  %3326 = vmatpush.bf16.msra.mxu2 %v6141_v54 }
  0x60   :  { %v6124_v55 = vld [vmem:[%s11352_s1 + $0xa00] sm:$0xf]  ;;  %v7477_v56 = vld [vmem:[%s11352_s1 + $0xa0c] sm:$0xf0]  ;;  %v5997_v6 = vor.u32 %v7445_v52, %v5996_v51  ;;  %3339 = vmatpush.bf16.msra.mxu3 %v6269_v58 }
  0x61   :  { %v48_v57 = vld [vmem:[%s11353_s0 + $0x20] sm:$0xff]  ;;  %v7509_v60 = vld [vmem:[%s11352_s1 + $0xb0c] sm:$0xf0]  ;;  %v6125_v7 = vor.u32 %v7477_v56, %v6124_v55  ;;  %3301 = vmatpush.bf16.msra.mxu0 %v5869_v1 }
  0x62   :  { %v6252_v59 = vld [vmem:[%s11352_s1 + $0xb00] sm:$0xf]  ;;  %v7569_v63 = vld [vmem:[%s11352_s1 + $0xcec] sm:$0xf0]  ;;  %v590_v5 = vunpack.c.l.b16 %v48_v57  ;;  %v591_v11 = vunpack.c.h.b16 %v48_v57 }
  0x63   :  { %v6492_v62 = vld [vmem:[%s11352_s1 + $0xce0] sm:$0xf]  ;;  %v7601_v2 = vld [vmem:[%s11352_s1 + $0xdec] sm:$0xf0]  ;;  %v6253_v12 = vor.u32 %v7509_v60, %v6252_v59  ;;  %3314 = vmatpush.bf16.msra.mxu1 %v5997_v6  ;;  %3327 = vmatpush.bf16.msra.mxu2 %v6125_v7 }
  0x64   :  { %v6620_v0 = vld [vmem:[%s11352_s1 + $0xde0] sm:$0xf]  ;;  %v7633_v4 = vld [vmem:[%s11352_s1 + $0xeec] sm:$0xf0]  ;;  %v6493_v13 = vor.u32 %v7569_v63, %v6492_v62  ;;  %v8495_v25 = vpack.c.b16 %v590_v5, %v590_v5  ;;  %v8508_v30 = vpack.c.b16 %v591_v11, %v591_v11 }
  0x65   :  { %v6748_v3 = vld [vmem:[%s11352_s1 + $0xee0] sm:$0xf]  ;;  %v7665_v9 = vld [vmem:[%s11352_s1 + $0xfec] sm:$0xf0]  ;;  %v6621_v15 = vor.u32 %v7601_v2, %v6620_v0  ;;  %3340 = vmatpush.bf16.msra.mxu3 %v6253_v12 }
  0x66   :  { %v6876_v8 = vld [vmem:[%s11352_s1 + $0xfe0] sm:$0xf]  ;;  %v6749_v16 = vor.u32 %v7633_v4, %v6748_v3  ;;  %v7565_v21 = vld [vmem:[%s11352_s1 + $0xccc] sm:$0xf0]  ;;  %3346 = vmatpush.bf16.msrb.mxu0 %v6493_v13  ;;  %3328 = vmatmul.bf16.vlgmr.msra.gmra.mxu2 %v8506_v29 }
  0x67   :  { %v6476_v17 = vld [vmem:[%s11352_s1 + $0xcc0] sm:$0xf]  ;;  %v6877_v24 = vor.u32 %v7665_v9, %v6876_v8  ;;  %v7597_v26 = vld [vmem:[%s11352_s1 + $0xdcc] sm:$0xf0]  ;;  %3359 = vmatpush.bf16.msrb.mxu1 %v6621_v15  ;;  %3302 = vmatmul.bf16.vlgmr.msra.gmra.mxu0 %v8495_v25 }
  0x68   :  { %v6604_v23 = vld [vmem:[%s11352_s1 + $0xdc0] sm:$0xf]  ;;  %v7629_v28 = vld [vmem:[%s11352_s1 + $0xecc] sm:$0xf0]  ;;  %v6477_v34 = vor.u32 %v7565_v21, %v6476_v17  ;;  %3372 = vmatpush.bf16.msrb.mxu2 %v6749_v16  ;;  %3315 = vmatmul.bf16.vlgmr.msra.gmra.mxu1 %v8508_v30 }
  0x69   :  { %v6732_v27 = vld [vmem:[%s11352_s1 + $0xec0] sm:$0xf]  ;;  %v7661_v32 = vld [vmem:[%s11352_s1 + $0xfcc] sm:$0xf0]  ;;  %v6605_v35 = vor.u32 %v7597_v26, %v6604_v23  ;;  %3385 = vmatpush.bf16.msrb.mxu3 %v6877_v24 }
  0x6a   :  { %v6860_v31 = vld [vmem:[%s11352_s1 + $0xfc0] sm:$0xf]  ;;  %v6733_v36 = vor.u32 %v7629_v28, %v6732_v27  ;;  %v7561_v39 = vld [vmem:[%s11352_s1 + $0xcac] sm:$0xf0]  ;;  %3341 = vmatmul.bf16.vlgmr.msra.gmra.mxu3 %v8516_v33  ;;  %3347 = vmatpush.bf16.msrb.mxu0 %v6477_v34 }
  0x6b   :  { %v6460_v37 = vld [vmem:[%s11352_s1 + $0xca0] sm:$0xf]  ;;  %v6861_v43 = vor.u32 %v7661_v32, %v6860_v31  ;;  %v7593_v45 = vld [vmem:[%s11352_s1 + $0xdac] sm:$0xf0]  ;;  %3360 = vmatpush.bf16.msrb.mxu1 %v6605_v35 }
  0x6c   :  { %v6588_v40 = vld [vmem:[%s11352_s1 + $0xda0] sm:$0xf]  ;;  %v7625_v47 = vld [vmem:[%s11352_s1 + $0xeac] sm:$0xf0]  ;;  %v6461_v50 = vor.u32 %v7561_v39, %v6460_v37  ;;  %3373 = vmatpush.bf16.msrb.mxu2 %v6733_v36 }
  0x6d   :  { %v6716_v46 = vld [vmem:[%s11352_s1 + $0xea0] sm:$0xf]  ;;  %v7657_v49 = vld [vmem:[%s11352_s1 + $0xfac] sm:$0xf0]  ;;  %v6589_v51 = vor.u32 %v7593_v45, %v6588_v40  ;;  %3386 = vmatpush.bf16.msrb.mxu3 %v6861_v43 }
  0x6e   :  { %v6844_v48 = vld [vmem:[%s11352_s1 + $0xfa0] sm:$0xf]  ;;  %v6717_v52 = vor.u32 %v7625_v47, %v6716_v46  ;;  %v7557_v54 = vld [vmem:[%s11352_s1 + $0xc8c] sm:$0xf0]  ;;  %3348 = vmatpush.bf16.msrb.mxu0 %v6461_v50 }
  0x6f   :  { %v6444_v53 = vld [vmem:[%s11352_s1 + $0xc80] sm:$0xf]  ;;  %v6845_v56 = vor.u32 %v7657_v49, %v6844_v48  ;;  %v7589_v57 = vld [vmem:[%s11352_s1 + $0xd8c] sm:$0xf0]  ;;  %3361 = vmatpush.bf16.msrb.mxu1 %v6589_v51 }
  0x70   :  { %v6572_v55 = vld [vmem:[%s11352_s1 + $0xd80] sm:$0xf]  ;;  %v7621_v59 = vld [vmem:[%s11352_s1 + $0xe8c] sm:$0xf0]  ;;  %v6445_v62 = vor.u32 %v7557_v54, %v6444_v53  ;;  %3374 = vmatpush.bf16.msrb.mxu2 %v6717_v52 }
  0x71   :  { %v6700_v58 = vld [vmem:[%s11352_s1 + $0xe80] sm:$0xf]  ;;  %v7653_v61 = vld [vmem:[%s11352_s1 + $0xf8c] sm:$0xf0]  ;;  %v6573_v63 = vor.u32 %v7589_v57, %v6572_v55  ;;  %3387 = vmatpush.bf16.msrb.mxu3 %v6845_v56 }
  0x72   :  { %v6828_v60 = vld [vmem:[%s11352_s1 + $0xf80] sm:$0xf]  ;;  %v6701_v0 = vor.u32 %v7621_v59, %v6700_v58  ;;  %v7553_v2 = vld [vmem:[%s11352_s1 + $0xc6c] sm:$0xf0]  ;;  %3349 = vmatpush.bf16.msrb.mxu0 %v6445_v62  ;;  %v51_v59 = vld [vmem:[%s11353_s0 + $0x38] sm:$0xff] }
  0x73   :  { %v6428_v1 = vld [vmem:[%s11352_s1 + $0xc60] sm:$0xf]  ;;  %v6829_v4 = vor.u32 %v7653_v61, %v6828_v60  ;;  %v7585_v5 = vld [vmem:[%s11352_s1 + $0xd6c] sm:$0xf0]  ;;  %3362 = vmatpush.bf16.msrb.mxu1 %v6573_v63  ;;  %v7183_v60 = vld [vmem:[%s11352_s1 + $0xe4] sm:$0xf] }
  0x74   :  { %v6556_v3 = vld [vmem:[%s11352_s1 + $0xd60] sm:$0xf]  ;;  %v7617_v7 = vld [vmem:[%s11352_s1 + $0xe6c] sm:$0xf0]  ;;  %v6429_v10 = vor.u32 %v7553_v2, %v6428_v1  ;;  %3375 = vmatpush.bf16.msrb.mxu2 %v6701_v0  ;;  %v4958_v61 = vld [vmem:[%s11352_s1 + $0xf0] sm:$0xf0] }
  0x75   :  { %v6684_v6 = vld [vmem:[%s11352_s1 + $0xe60] sm:$0xf]  ;;  %v7649_v9 = vld [vmem:[%s11352_s1 + $0xf6c] sm:$0xf0]  ;;  %v6557_v11 = vor.u32 %v7585_v5, %v6556_v3  ;;  %3388 = vmatpush.bf16.msrb.mxu3 %v6829_v4  ;;  %v7215_v62 = vld [vmem:[%s11352_s1 + $0x1e4] sm:$0xf] }
  0x76   :  { %v6812_v8 = vld [vmem:[%s11352_s1 + $0xf60] sm:$0xf]  ;;  %v6685_v12 = vor.u32 %v7617_v7, %v6684_v6  ;;  %v7549_v14 = vld [vmem:[%s11352_s1 + $0xc4c] sm:$0xf0]  ;;  %3350 = vmatpush.bf16.msrb.mxu0 %v6429_v10  ;;  %v5086_v0 = vld [vmem:[%s11352_s1 + $0x1f0] sm:$0xf0] }
  0x77   :  { %v6412_v13 = vld [vmem:[%s11352_s1 + $0xc40] sm:$0xf]  ;;  %v6813_v16 = vor.u32 %v7649_v9, %v6812_v8  ;;  %v7581_v17 = vld [vmem:[%s11352_s1 + $0xd4c] sm:$0xf0]  ;;  %3363 = vmatpush.bf16.msrb.mxu1 %v6557_v11  ;;  %v7247_v1 = vld [vmem:[%s11352_s1 + $0x2e4] sm:$0xf]  ;;  %v596_v8 = vunpack.c.l.b16 %v51_v59  ;;  %v4961_v11 = vor.u32 %v7183_v60, %v4958_v61 }
  0x78   :  { %v6540_v15 = vld [vmem:[%s11352_s1 + $0xd40] sm:$0xf]  ;;  %v7613_v23 = vld [vmem:[%s11352_s1 + $0xe4c] sm:$0xf0]  ;;  %v6413_v27 = vor.u32 %v7549_v14, %v6412_v13  ;;  %3376 = vmatpush.bf16.msrb.mxu2 %v6685_v12  ;;  %v5214_v2 = vld [vmem:[%s11352_s1 + $0x2f0] sm:$0xf0]  ;;  %v597_v12 = vunpack.c.h.b16 %v51_v59  ;;  %v5089_v13 = vor.u32 %v7215_v62, %v5086_v0 }
  0x79   :  { %v6668_v21 = vld [vmem:[%s11352_s1 + $0xe40] sm:$0xf]  ;;  %v7645_v26 = vld [vmem:[%s11352_s1 + $0xf4c] sm:$0xf0]  ;;  %v6541_v28 = vor.u32 %v7581_v17, %v6540_v15  ;;  %3389 = vmatpush.bf16.msrb.mxu3 %v6813_v16  ;;  %v7279_v6 = vld [vmem:[%s11352_s1 + $0x3e4] sm:$0xf]  ;;  %v5217_v14 = vor.u32 %v7247_v1, %v5214_v2 }
  0x7a   :  { %v6796_v24 = vld [vmem:[%s11352_s1 + $0xf40] sm:$0xf]  ;;  %v6669_v31 = vor.u32 %v7613_v23, %v6668_v21  ;;  %v7545_v34 = vld [vmem:[%s11352_s1 + $0xc2c] sm:$0xf0]  ;;  %3351 = vmatpush.bf16.msrb.mxu0 %v6413_v27  ;;  %v5342_v7 = vld [vmem:[%s11352_s1 + $0x3f0] sm:$0xf0] }
  0x7b   :  { %v6396_v32 = vld [vmem:[%s11352_s1 + $0xc20] sm:$0xf]  ;;  %v6797_v36 = vor.u32 %v7645_v26, %v6796_v24  ;;  %v7577_v37 = vld [vmem:[%s11352_s1 + $0xd2c] sm:$0xf0]  ;;  %3364 = vmatpush.bf16.msrb.mxu1 %v6541_v28  ;;  %v7179_v15 = vld [vmem:[%s11352_s1 + $0xc4] sm:$0xf]  ;;  %v5345_v21 = vor.u32 %v7279_v6, %v5342_v7  ;;  %v8716_v28 = vpack.c.b16 %v596_v8, %v596_v8 }
  0x7c   :  { %v6524_v35 = vld [vmem:[%s11352_s1 + $0xd20] sm:$0xf]  ;;  %v7609_v40 = vld [vmem:[%s11352_s1 + $0xe2c] sm:$0xf0]  ;;  %v6397_v47 = vor.u32 %v7545_v34, %v6396_v32  ;;  %3377 = vmatpush.bf16.msrb.mxu2 %v6669_v31  ;;  %v4942_v16 = vld [vmem:[%s11352_s1 + $0xd0] sm:$0xf0] }
  0x7d   :  { %v6652_v39 = vld [vmem:[%s11352_s1 + $0xe20] sm:$0xf]  ;;  %v7641_v45 = vld [vmem:[%s11352_s1 + $0xf2c] sm:$0xf0]  ;;  %v6525_v51 = vor.u32 %v7577_v37, %v6524_v35  ;;  %3390 = vmatpush.bf16.msrb.mxu3 %v6797_v36  ;;  %v7211_v17 = vld [vmem:[%s11352_s1 + $0x1c4] sm:$0xf]  ;;  %v8726_v35 = vpack.c.b16 %v597_v12, %v597_v12  ;;  %v4945_v36 = vor.u32 %v7179_v15, %v4942_v16 }
  0x7e   :  { %v6780_v43 = vld [vmem:[%s11352_s1 + $0xf20] sm:$0xf]  ;;  %v7541_v48 = vld [vmem:[%s11352_s1 + $0xc0c] sm:$0xf0]  ;;  %v6653_v52 = vor.u32 %v7609_v40, %v6652_v39  ;;  %3352 = vmatpush.bf16.msrb.mxu0 %v6397_v47  ;;  %v5070_v24 = vld [vmem:[%s11352_s1 + $0x1d0] sm:$0xf0] }
  0x7f   :  { %v6380_v46 = vld [vmem:[%s11352_s1 + $0xc00] sm:$0xf]  ;;  %v7573_v50 = vld [vmem:[%s11352_s1 + $0xd0c] sm:$0xf0]  ;;  %v6781_v56 = vor.u32 %v7641_v45, %v6780_v43  ;;  %3365 = vmatpush.bf16.msrb.mxu1 %v6525_v51  ;;  %v7243_v26 = vld [vmem:[%s11352_s1 + $0x2c4] sm:$0xf]  ;;  %v5073_v37 = vor.u32 %v7211_v17, %v5070_v24 }
  0x80   :  { %v6508_v49 = vld [vmem:[%s11352_s1 + $0xd00] sm:$0xf]  ;;  %v7605_v54 = vld [vmem:[%s11352_s1 + $0xe0c] sm:$0xf0]  ;;  %v6381_v63 = vor.u32 %v7541_v48, %v6380_v46  ;;  %3378 = vmatpush.bf16.msrb.mxu2 %v6653_v52  ;;  %v5198_v27 = vld [vmem:[%s11352_s1 + $0x2d0] sm:$0xf0] }
  0x81   :  { %v6636_v53 = vld [vmem:[%s11352_s1 + $0xe00] sm:$0xf]  ;;  %v50_v55 = vld [vmem:[%s11353_s0 + $0x30] sm:$0xff]  ;;  %v6509_v4 = vor.u32 %v7573_v50, %v6508_v49  ;;  %3391 = vmatpush.bf16.msrb.mxu3 %v6781_v56  ;;  %v7275_v32 = vld [vmem:[%s11352_s1 + $0x3c4] sm:$0xf]  ;;  %v5201_v39 = vor.u32 %v7243_v26, %v5198_v27 }
  0x82   :  { %v6764_v57 = vld [vmem:[%s11352_s1 + $0xf00] sm:$0xf]  ;;  %v7637_v58 = vld [vmem:[%s11352_s1 + $0xf0c] sm:$0xf0]  ;;  %v594_v3 = vunpack.c.l.b16 %v50_v55  ;;  %v6637_v5 = vor.u32 %v7605_v54, %v6636_v53  ;;  %v595_v9 = vunpack.c.h.b16 %v50_v55  ;;  %3353 = vmatpush.bf16.msrb.mxu0 %v6381_v63  ;;  %v5326_v34 = vld [vmem:[%s11352_s1 + $0x3d0] sm:$0xf0] }
  0x83   :  { %v6765_v10 = vor.u32 %v7637_v58, %v6764_v57  ;;  %3366 = vmatpush.bf16.msrb.mxu1 %v6509_v4  ;;  %v7175_v40 = vld [vmem:[%s11352_s1 + $0xa4] sm:$0xf]  ;;  %v4926_v43 = vld [vmem:[%s11352_s1 + $0xb0] sm:$0xf0]  ;;  %v5329_v46 = vor.u32 %v7275_v32, %v5326_v34 }
  0x84   :  { %v8705_v23 = vpack.c.b16 %v594_v3, %v594_v3  ;;  %3379 = vmatpush.bf16.msrb.mxu2 %v6637_v5  ;;  %v8718_v31 = vpack.c.b16 %v595_v9, %v595_v9  ;;  %v7207_v45 = vld [vmem:[%s11352_s1 + $0x1a4] sm:$0xf]  ;;  %v5054_v47 = vld [vmem:[%s11352_s1 + $0x1b0] sm:$0xf0]  ;;  %v4929_v52 = vor.u32 %v7175_v40, %v4926_v43 }
  0x85   :  { %3392 = vmatpush.bf16.msrb.mxu3 %v6765_v10  ;;  %v7239_v48 = vld [vmem:[%s11352_s1 + $0x2a4] sm:$0xf]  ;;  %v5182_v49 = vld [vmem:[%s11352_s1 + $0x2b0] sm:$0xf0]  ;;  %v5057_v53 = vor.u32 %v7207_v45, %v5054_v47 }
  0x86   :  { %3398 = vmatpush.bf16.msra.mxu0 %v4961_v11  ;;  %3367 = vmatmul.bf16.vlgmr.msrb.gmra.mxu1 %v8718_v31  ;;  %v7271_v50 = vld [vmem:[%s11352_s1 + $0x3a4] sm:$0xf]  ;;  %v5310_v51 = vld [vmem:[%s11352_s1 + $0x3b0] sm:$0xf0]  ;;  %v5185_v54 = vor.u32 %v7239_v48, %v5182_v49 }
  0x87   :  { %3411 = vmatpush.bf16.msra.mxu1 %v5089_v13  ;;  %3354 = vmatmul.bf16.vlgmr.msrb.gmra.mxu0 %v8705_v23  ;;  %v7171_v55 = vld [vmem:[%s11352_s1 + $0x84] sm:$0xf]  ;;  %v4910_v56 = vld [vmem:[%s11352_s1 + $0x90] sm:$0xf0]  ;;  %v5313_v58 = vor.u32 %v7271_v50, %v5310_v51 }
  0x88   :  { %3424 = vmatpush.bf16.msra.mxu2 %v5217_v14  ;;  %3393 = vmatmul.bf16.vlgmr.msrb.gmra.mxu3 %v8726_v35  ;;  %v7203_v57 = vld [vmem:[%s11352_s1 + $0x184] sm:$0xf]  ;;  %v5038_v59 = vld [vmem:[%s11352_s1 + $0x190] sm:$0xf0]  ;;  %v4913_v0 = vor.u32 %v7171_v55, %v4910_v56 }
  0x89   :  { %3437 = vmatpush.bf16.msra.mxu3 %v5345_v21  ;;  %3380 = vmatmul.bf16.vlgmr.msrb.gmra.mxu2 %v8716_v28  ;;  %v7235_v60 = vld [vmem:[%s11352_s1 + $0x284] sm:$0xf]  ;;  %v5166_v61 = vld [vmem:[%s11352_s1 + $0x290] sm:$0xf0]  ;;  %v5041_v1 = vor.u32 %v7203_v57, %v5038_v59 }
  0x8a   :  { %3399 = vmatpush.bf16.msra.mxu0 %v4945_v36  ;;  %v7267_v62 = vld [vmem:[%s11352_s1 + $0x384] sm:$0xf]  ;;  %v5294_v63 = vld [vmem:[%s11352_s1 + $0x390] sm:$0xf0]  ;;  %v5169_v2 = vor.u32 %v7235_v60, %v5166_v61 }
  0x8b   :  { %3412 = vmatpush.bf16.msra.mxu1 %v5073_v37  ;;  %v7167_v3 = vld [vmem:[%s11352_s1 + $0x64] sm:$0xf]  ;;  %v4894_v4 = vld [vmem:[%s11352_s1 + $0x70] sm:$0xf0]  ;;  %v5297_v6 = vor.u32 %v7267_v62, %v5294_v63 }
  0x8c   :  { %3425 = vmatpush.bf16.msra.mxu2 %v5201_v39  ;;  %v7199_v5 = vld [vmem:[%s11352_s1 + $0x164] sm:$0xf]  ;;  %v5022_v7 = vld [vmem:[%s11352_s1 + $0x170] sm:$0xf0]  ;;  %v4897_v12 = vor.u32 %v7167_v3, %v4894_v4 }
  0x8d   :  { %3438 = vmatpush.bf16.msra.mxu3 %v5329_v46  ;;  %v7231_v8 = vld [vmem:[%s11352_s1 + $0x264] sm:$0xf]  ;;  %v5150_v9 = vld [vmem:[%s11352_s1 + $0x270] sm:$0xf0]  ;;  %v5025_v13 = vor.u32 %v7199_v5, %v5022_v7 }
  0x8e   :  { %3400 = vmatpush.bf16.msra.mxu0 %v4929_v52  ;;  %v7263_v10 = vld [vmem:[%s11352_s1 + $0x364] sm:$0xf]  ;;  %v5278_v11 = vld [vmem:[%s11352_s1 + $0x370] sm:$0xf0]  ;;  %v5153_v14 = vor.u32 %v7231_v8, %v5150_v9 }
  0x8f   :  { %3413 = vmatpush.bf16.msra.mxu1 %v5057_v53  ;;  %v7163_v15 = vld [vmem:[%s11352_s1 + $0x44] sm:$0xf]  ;;  %v4878_v16 = vld [vmem:[%s11352_s1 + $0x50] sm:$0xf0]  ;;  %v5281_v21 = vor.u32 %v7263_v10, %v5278_v11 }
  0x90   :  { %3426 = vmatpush.bf16.msra.mxu2 %v5185_v54  ;;  %v7195_v17 = vld [vmem:[%s11352_s1 + $0x144] sm:$0xf]  ;;  %v5006_v24 = vld [vmem:[%s11352_s1 + $0x150] sm:$0xf0]  ;;  %v4881_v36 = vor.u32 %v7163_v15, %v4878_v16 }
  0x91   :  { %3439 = vmatpush.bf16.msra.mxu3 %v5313_v58  ;;  %v7227_v26 = vld [vmem:[%s11352_s1 + $0x244] sm:$0xf]  ;;  %v5134_v27 = vld [vmem:[%s11352_s1 + $0x250] sm:$0xf0]  ;;  %v5009_v37 = vor.u32 %v7195_v17, %v5006_v24 }
  0x92   :  { %3401 = vmatpush.bf16.msra.mxu0 %v4913_v0  ;;  %v7259_v32 = vld [vmem:[%s11352_s1 + $0x344] sm:$0xf]  ;;  %v5262_v34 = vld [vmem:[%s11352_s1 + $0x350] sm:$0xf0]  ;;  %v5137_v39 = vor.u32 %v7227_v26, %v5134_v27 }
  0x93   :  { %3414 = vmatpush.bf16.msra.mxu1 %v5041_v1  ;;  %v7159_v40 = vld [vmem:[%s11352_s1 + $0x24] sm:$0xf]  ;;  %v4862_v43 = vld [vmem:[%s11352_s1 + $0x30] sm:$0xf0]  ;;  %v5265_v46 = vor.u32 %v7259_v32, %v5262_v34 }
  0x94   :  { %3427 = vmatpush.bf16.msra.mxu2 %v5169_v2  ;;  %v7191_v45 = vld [vmem:[%s11352_s1 + $0x124] sm:$0xf]  ;;  %v4990_v47 = vld [vmem:[%s11352_s1 + $0x130] sm:$0xf0]  ;;  %v4865_v52 = vor.u32 %v7159_v40, %v4862_v43 }
  0x95   :  { %3440 = vmatpush.bf16.msra.mxu3 %v5297_v6  ;;  %v7223_v48 = vld [vmem:[%s11352_s1 + $0x224] sm:$0xf]  ;;  %v5118_v49 = vld [vmem:[%s11352_s1 + $0x230] sm:$0xf0]  ;;  %v4993_v55 = vor.u32 %v7191_v45, %v4990_v47 }
  0x96   :  { %3402 = vmatpush.bf16.msra.mxu0 %v4897_v12  ;;  %v7255_v50 = vld [vmem:[%s11352_s1 + $0x324] sm:$0xf]  ;;  %v5246_v51 = vld [vmem:[%s11352_s1 + $0x330] sm:$0xf0]  ;;  %v5121_v56 = vor.u32 %v7223_v48, %v5118_v49 }
  0x97   :  { %3415 = vmatpush.bf16.msra.mxu1 %v5025_v13  ;;  %v7155_v53 = vld [vmem:[%s11352_s1 + $0x4] sm:$0xf]  ;;  %v4846_v54 = vld [vmem:[%s11352_s1 + $0x10] sm:$0xf0]  ;;  %v5249_v60 = vor.u32 %v7255_v50, %v5246_v51 }
  0x98   :  { %3428 = vmatpush.bf16.msra.mxu2 %v5153_v14  ;;  %v7187_v57 = vld [vmem:[%s11352_s1 + $0x104] sm:$0xf]  ;;  %v4974_v58 = vld [vmem:[%s11352_s1 + $0x110] sm:$0xf0]  ;;  %v4849_v3 = vor.u32 %v7155_v53, %v4846_v54 }
  0x99   :  { %3441 = vmatpush.bf16.msra.mxu3 %v5281_v21  ;;  %v7219_v59 = vld [vmem:[%s11352_s1 + $0x204] sm:$0xf]  ;;  %v5102_v61 = vld [vmem:[%s11352_s1 + $0x210] sm:$0xf0]  ;;  %v4977_v7 = vor.u32 %v7187_v57, %v4974_v58 }
  0x9a   :  { %3403 = vmatpush.bf16.msra.mxu0 %v4881_v36  ;;  %v7251_v62 = vld [vmem:[%s11352_s1 + $0x304] sm:$0xf]  ;;  %v5230_v63 = vld [vmem:[%s11352_s1 + $0x310] sm:$0xf0]  ;;  %v5105_v8 = vor.u32 %v7219_v59, %v5102_v61 }
  0x9b   :  { %3416 = vmatpush.bf16.msra.mxu1 %v5009_v37  ;;  %v7311_v0 = vld [vmem:[%s11352_s1 + $0x4e4] sm:$0xf]  ;;  %v5470_v1 = vld [vmem:[%s11352_s1 + $0x4f0] sm:$0xf0]  ;;  %v5233_v11 = vor.u32 %v7251_v62, %v5230_v63 }
  0x9c   :  { %3429 = vmatpush.bf16.msra.mxu2 %v5137_v39  ;;  %v7343_v2 = vld [vmem:[%s11352_s1 + $0x5e4] sm:$0xf]  ;;  %v5598_v4 = vld [vmem:[%s11352_s1 + $0x5f0] sm:$0xf0]  ;;  %v5473_v12 = vor.u32 %v7311_v0, %v5470_v1 }
  0x9d   :  { %3442 = vmatpush.bf16.msra.mxu3 %v5265_v46  ;;  %v7375_v5 = vld [vmem:[%s11352_s1 + $0x6e4] sm:$0xf]  ;;  %v5726_v6 = vld [vmem:[%s11352_s1 + $0x6f0] sm:$0xf0]  ;;  %v5601_v13 = vor.u32 %v7343_v2, %v5598_v4 }
  0x9e   :  { %3404 = vmatpush.bf16.msra.mxu0 %v4865_v52  ;;  %v7407_v9 = vld [vmem:[%s11352_s1 + $0x7e4] sm:$0xf]  ;;  %v5854_v10 = vld [vmem:[%s11352_s1 + $0x7f0] sm:$0xf0]  ;;  %v5729_v14 = vor.u32 %v7375_v5, %v5726_v6 }
  0x9f   :  { %3417 = vmatpush.bf16.msra.mxu1 %v4993_v55  ;;  %v7307_v15 = vld [vmem:[%s11352_s1 + $0x4c4] sm:$0xf]  ;;  %v5454_v16 = vld [vmem:[%s11352_s1 + $0x4d0] sm:$0xf0]  ;;  %v5857_v21 = vor.u32 %v7407_v9, %v5854_v10  ;;  %v564_v10 = vld [vmem:[%s11354_s2] sm:$0xf] }
  0xa0   :  { %3430 = vmatpush.bf16.msra.mxu2 %v5121_v56  ;;  %v7339_v17 = vld [vmem:[%s11352_s1 + $0x5c4] sm:$0xf]  ;;  %v5582_v24 = vld [vmem:[%s11352_s1 + $0x5d0] sm:$0xf0]  ;;  %v5457_v36 = vor.u32 %v7307_v15, %v5454_v16 }
  0xa1   :  { %3443 = vmatpush.bf16.msra.mxu3 %v5249_v60  ;;  %v7371_v26 = vld [vmem:[%s11352_s1 + $0x6c4] sm:$0xf]  ;;  %v5710_v27 = vld [vmem:[%s11352_s1 + $0x6d0] sm:$0xf0]  ;;  %v5585_v37 = vor.u32 %v7339_v17, %v5582_v24  ;;  %v566_v24 = vperm.slane %v564_v10, 0 }
  0xa2   :  { %3405 = vmatpush.bf16.msra.mxu0 %v4849_v3  ;;  %v7403_v32 = vld [vmem:[%s11352_s1 + $0x7c4] sm:$0xf]  ;;  %v5838_v34 = vld [vmem:[%s11352_s1 + $0x7d0] sm:$0xf0]  ;;  %v5713_v39 = vor.u32 %v7371_v26, %v5710_v27 }
  0xa3   :  { %3418 = vmatpush.bf16.msra.mxu1 %v4977_v7  ;;  %v7303_v40 = vld [vmem:[%s11352_s1 + $0x4a4] sm:$0xf]  ;;  %v5438_v43 = vld [vmem:[%s11352_s1 + $0x4b0] sm:$0xf0]  ;;  %v5841_v46 = vor.u32 %v7403_v32, %v5838_v34 }
  0xa4   :  { %3431 = vmatpush.bf16.msra.mxu2 %v5105_v8  ;;  %v7335_v45 = vld [vmem:[%s11352_s1 + $0x5a4] sm:$0xf]  ;;  %v5566_v47 = vld [vmem:[%s11352_s1 + $0x5b0] sm:$0xf0]  ;;  %v5441_v52 = vor.u32 %v7303_v40, %v5438_v43 }
  0xa5   :  { %3444 = vmatpush.bf16.msra.mxu3 %v5233_v11  ;;  %v7367_v48 = vld [vmem:[%s11352_s1 + $0x6a4] sm:$0xf]  ;;  %v5694_v49 = vld [vmem:[%s11352_s1 + $0x6b0] sm:$0xf0]  ;;  %3406 = vmatmul.bf16.vlgmr.msra.gmra.mxu0 %v8140_v19  ;;  %v5569_v53 = vor.u32 %v7335_v45, %v5566_v47 }
  0xa6   :  { %3450 = vmatpush.bf16.msrb.mxu0 %v5473_v12  ;;  %v7399_v50 = vld [vmem:[%s11352_s1 + $0x7a4] sm:$0xf]  ;;  %v5822_v51 = vld [vmem:[%s11352_s1 + $0x7b0] sm:$0xf0]  ;;  %3419 = vmatmul.bf16.vlgmr.msra.gmra.mxu1 %v8144_v22  ;;  %v5697_v54 = vor.u32 %v7367_v48, %v5694_v49 }
  0xa7   :  { %3463 = vmatpush.bf16.msrb.mxu1 %v5601_v13  ;;  %3432 = vmatmul.bf16.vlgmr.msra.gmra.mxu2 %v8138_v18  ;;  %v7299_v55 = vld [vmem:[%s11352_s1 + $0x484] sm:$0xf]  ;;  %v5422_v56 = vld [vmem:[%s11352_s1 + $0x490] sm:$0xf0]  ;;  %v5825_v58 = vor.u32 %v7399_v50, %v5822_v51 }
  0xa8   :  { %3476 = vmatpush.bf16.msrb.mxu2 %v5729_v14  ;;  %3445 = vmatmul.bf16.vlgmr.msra.gmra.mxu3 %v8142_v20  ;;  %v7331_v57 = vld [vmem:[%s11352_s1 + $0x584] sm:$0xf]  ;;  %v5550_v59 = vld [vmem:[%s11352_s1 + $0x590] sm:$0xf0]  ;;  %v5425_v0 = vor.u32 %v7299_v55, %v5422_v56 }
  0xa9   :  { %3489 = vmatpush.bf16.msrb.mxu3 %v5857_v21  ;;  %v7363_v60 = vld [vmem:[%s11352_s1 + $0x684] sm:$0xf]  ;;  %v5678_v61 = vld [vmem:[%s11352_s1 + $0x690] sm:$0xf0]  ;;  %v5553_v2 = vor.u32 %v7331_v57, %v5550_v59 }
  0xaa   :  { %3451 = vmatpush.bf16.msrb.mxu0 %v5457_v36  ;;  %v7395_v62 = vld [vmem:[%s11352_s1 + $0x784] sm:$0xf]  ;;  %v5806_v63 = vld [vmem:[%s11352_s1 + $0x790] sm:$0xf0]  ;;  %v5681_v3 = vor.u32 %v7363_v60, %v5678_v61 }
  0xab   :  { %3464 = vmatpush.bf16.msrb.mxu1 %v5585_v37  ;;  %v7295_v1 = vld [vmem:[%s11352_s1 + $0x464] sm:$0xf]  ;;  %v5406_v4 = vld [vmem:[%s11352_s1 + $0x470] sm:$0xf0]  ;;  %v5809_v7 = vor.u32 %v7395_v62, %v5806_v63 }
  0xac   :  { %3477 = vmatpush.bf16.msrb.mxu2 %v5713_v39  ;;  %v7327_v5 = vld [vmem:[%s11352_s1 + $0x564] sm:$0xf]  ;;  %v5534_v6 = vld [vmem:[%s11352_s1 + $0x570] sm:$0xf0]  ;;  %v5409_v13 = vor.u32 %v7295_v1, %v5406_v4 }
  0xad   :  { %3490 = vmatpush.bf16.msrb.mxu3 %v5841_v46  ;;  %v7359_v8 = vld [vmem:[%s11352_s1 + $0x664] sm:$0xf]  ;;  %v5662_v9 = vld [vmem:[%s11352_s1 + $0x670] sm:$0xf0]  ;;  %v5537_v15 = vor.u32 %v7327_v5, %v5534_v6 }
  0xae   :  { %3452 = vmatpush.bf16.msrb.mxu0 %v5441_v52  ;;  %v7391_v11 = vld [vmem:[%s11352_s1 + $0x764] sm:$0xf]  ;;  %v5790_v12 = vld [vmem:[%s11352_s1 + $0x770] sm:$0xf0]  ;;  %v5665_v16 = vor.u32 %v7359_v8, %v5662_v9  ;;  %v3238_v8 = vpop.f32.mrf.mxu3 }
  0xaf   :  { %3465 = vmatpush.bf16.msrb.mxu1 %v5569_v53  ;;  %v7291_v14 = vld [vmem:[%s11352_s1 + $0x444] sm:$0xf]  ;;  %v5390_v17 = vld [vmem:[%s11352_s1 + $0x450] sm:$0xf0]  ;;  %v5793_v26 = vor.u32 %v7391_v11, %v5790_v12  ;;  %v3199_v40 = vpop.f32.mrf.mxu0  ;;  %v3212_v50 = vpop.f32.mrf.mxu1 }
  0xb0   :  { %3478 = vmatpush.bf16.msrb.mxu2 %v5697_v54  ;;  %v7323_v21 = vld [vmem:[%s11352_s1 + $0x544] sm:$0xf]  ;;  %v5518_v27 = vld [vmem:[%s11352_s1 + $0x550] sm:$0xf0]  ;;  %v5393_v39 = vor.u32 %v7291_v14, %v5390_v17  ;;  %v3200_v49 = vadd.f32 %v3199_v40, %v566_v24 }
  0xb1   :  { %3491 = vmatpush.bf16.msrb.mxu3 %v5825_v58  ;;  %v7355_v32 = vld [vmem:[%s11352_s1 + $0x644] sm:$0xf]  ;;  %v5646_v34 = vld [vmem:[%s11352_s1 + $0x650] sm:$0xf0]  ;;  %v5521_v43 = vor.u32 %v7323_v21, %v5518_v27 }
  0xb2   :  { %3453 = vmatpush.bf16.msrb.mxu0 %v5425_v0  ;;  %v7387_v36 = vld [vmem:[%s11352_s1 + $0x744] sm:$0xf]  ;;  %v5774_v37 = vld [vmem:[%s11352_s1 + $0x750] sm:$0xf0]  ;;  %v5649_v45 = vor.u32 %v7355_v32, %v5646_v34  ;;  %v3213_v57 = vadd.f32 %v3212_v50, %v3200_v49 }
  0xb3   :  { %3466 = vmatpush.bf16.msrb.mxu1 %v5553_v2  ;;  %v7287_v46 = vld [vmem:[%s11352_s1 + $0x424] sm:$0xf]  ;;  %v5374_v47 = vld [vmem:[%s11352_s1 + $0x430] sm:$0xf0]  ;;  %v5777_v51 = vor.u32 %v7387_v36, %v5774_v37  ;;  %v3225_v2 = vpop.f32.mrf.mxu2 }
  0xb4   :  { %3479 = vmatpush.bf16.msrb.mxu2 %v5681_v3  ;;  %v7319_v48 = vld [vmem:[%s11352_s1 + $0x524] sm:$0xf]  ;;  %v5502_v52 = vld [vmem:[%s11352_s1 + $0x530] sm:$0xf0]  ;;  %v5377_v58 = vor.u32 %v7287_v46, %v5374_v47 }
  0xb5   :  { %3492 = vmatpush.bf16.msrb.mxu3 %v5809_v7  ;;  %v7351_v53 = vld [vmem:[%s11352_s1 + $0x624] sm:$0xf]  ;;  %v5630_v54 = vld [vmem:[%s11352_s1 + $0x630] sm:$0xf0]  ;;  %v5505_v61 = vor.u32 %v7319_v48, %v5502_v52  ;;  %v3226_v7 = vadd.f32 %v3225_v2, %v3213_v57 }
  0xb6   :  { %3454 = vmatpush.bf16.msrb.mxu0 %v5409_v13  ;;  %v7383_v55 = vld [vmem:[%s11352_s1 + $0x724] sm:$0xf]  ;;  %v5758_v56 = vld [vmem:[%s11352_s1 + $0x730] sm:$0xf0]  ;;  %v5633_v62 = vor.u32 %v7351_v53, %v5630_v54  ;;  %v3240_v54 = vpop.f32.mrf.mxu3 }
  0xb7   :  { %3467 = vmatpush.bf16.msrb.mxu1 %v5537_v15  ;;  %v7283_v59 = vld [vmem:[%s11352_s1 + $0x404] sm:$0xf]  ;;  %v5358_v60 = vld [vmem:[%s11352_s1 + $0x410] sm:$0xf0]  ;;  %v5761_v3 = vor.u32 %v7383_v55, %v5758_v56  ;;  %v3201_v17 = vpop.f32.mrf.mxu0  ;;  %v3214_v32 = vpop.f32.mrf.mxu1 }
  0xb8   :  { %3480 = vmatpush.bf16.msrb.mxu2 %v5665_v16  ;;  %v7315_v63 = vld [vmem:[%s11352_s1 + $0x504] sm:$0xf]  ;;  %v5486_v0 = vld [vmem:[%s11352_s1 + $0x510] sm:$0xf0]  ;;  %v5361_v12 = vor.u32 %v7283_v59, %v5358_v60  ;;  %v9093_v16 = vadd.f32 %v3238_v8, %v3226_v7 }
  0xb9   :  { %3493 = vmatpush.bf16.msrb.mxu3 %v5793_v26  ;;  %v7347_v1 = vld [vmem:[%s11352_s1 + $0x604] sm:$0xf]  ;;  %v5614_v4 = vld [vmem:[%s11352_s1 + $0x610] sm:$0xf0]  ;;  %v5489_v21 = vor.u32 %v7315_v63, %v5486_v0 }
  0xba   :  { %3455 = vmatpush.bf16.msrb.mxu0 %v5393_v39  ;;  %v7379_v5 = vld [vmem:[%s11352_s1 + $0x704] sm:$0xf]  ;;  %v5742_v6 = vld [vmem:[%s11352_s1 + $0x710] sm:$0xf0]  ;;  %v5617_v24 = vor.u32 %v7347_v1, %v5614_v4 }
  0xbb   :  { %3468 = vmatpush.bf16.msrb.mxu1 %v5521_v43  ;;  %v7439_v9 = vld [vmem:[%s11352_s1 + $0x8e4] sm:$0xf]  ;;  %v5982_v10 = vld [vmem:[%s11352_s1 + $0x8f0] sm:$0xf0]  ;;  %v5745_v34 = vor.u32 %v7379_v5, %v5742_v6  ;;  %v3227_v52 = vpop.f32.mrf.mxu2 }
  0xbc   :  { %3481 = vmatpush.bf16.msrb.mxu2 %v5649_v45  ;;  %v7471_v11 = vld [vmem:[%s11352_s1 + $0x9e4] sm:$0xf]  ;;  %v6110_v13 = vld [vmem:[%s11352_s1 + $0x9f0] sm:$0xf0]  ;;  %v5985_v36 = vor.u32 %v7439_v9, %v5982_v10 }
  0xbd   :  { %3494 = vmatpush.bf16.msrb.mxu3 %v5777_v51  ;;  %v7503_v14 = vld [vmem:[%s11352_s1 + $0xae4] sm:$0xf]  ;;  %v6238_v15 = vld [vmem:[%s11352_s1 + $0xaf0] sm:$0xf0]  ;;  %v6113_v37 = vor.u32 %v7471_v11, %v6110_v13 }
  0xbe   :  { %3456 = vmatpush.bf16.msrb.mxu0 %v5377_v58  ;;  %v7535_v26 = vld [vmem:[%s11352_s1 + $0xbe4] sm:$0xf]  ;;  %v6366_v27 = vld [vmem:[%s11352_s1 + $0xbf0] sm:$0xf0]  ;;  %v6241_v39 = vor.u32 %v7503_v14, %v6238_v15 }
  0xbf   :  { %3469 = vmatpush.bf16.msrb.mxu1 %v5505_v61  ;;  %v7435_v40 = vld [vmem:[%s11352_s1 + $0x8c4] sm:$0xf]  ;;  %v5966_v43 = vld [vmem:[%s11352_s1 + $0x8d0] sm:$0xf0]  ;;  %v6369_v46 = vor.u32 %v7535_v26, %v6366_v27 }
  0xc0   :  { %3482 = vmatpush.bf16.msrb.mxu2 %v5633_v62  ;;  %v7467_v45 = vld [vmem:[%s11352_s1 + $0x9c4] sm:$0xf]  ;;  %v6094_v47 = vld [vmem:[%s11352_s1 + $0x9d0] sm:$0xf0]  ;;  %v5969_v53 = vor.u32 %v7435_v40, %v5966_v43 }
  0xc1   :  { %3495 = vmatpush.bf16.msrb.mxu3 %v5761_v3  ;;  %v7499_v48 = vld [vmem:[%s11352_s1 + $0xac4] sm:$0xf]  ;;  %v6222_v49 = vld [vmem:[%s11352_s1 + $0xad0] sm:$0xf0]  ;;  %v6097_v55 = vor.u32 %v7467_v45, %v6094_v47 }
  0xc2   :  { %3457 = vmatpush.bf16.msrb.mxu0 %v5361_v12  ;;  %v7531_v50 = vld [vmem:[%s11352_s1 + $0xbc4] sm:$0xf]  ;;  %v6350_v51 = vld [vmem:[%s11352_s1 + $0xbd0] sm:$0xf0]  ;;  %v6225_v56 = vor.u32 %v7499_v48, %v6222_v49 }
  0xc3   :  { %3470 = vmatpush.bf16.msrb.mxu1 %v5489_v21  ;;  %v7431_v57 = vld [vmem:[%s11352_s1 + $0x8a4] sm:$0xf]  ;;  %v5950_v58 = vld [vmem:[%s11352_s1 + $0x8b0] sm:$0xf0]  ;;  %v6353_v60 = vor.u32 %v7531_v50, %v6350_v51  ;;  %v3251_v15 = vpop.f32.mrf.mxu0 }
  0xc4   :  { %3483 = vmatpush.bf16.msrb.mxu2 %v5617_v24  ;;  %v7463_v59 = vld [vmem:[%s11352_s1 + $0x9a4] sm:$0xf]  ;;  %v6078_v61 = vld [vmem:[%s11352_s1 + $0x9b0] sm:$0xf0]  ;;  %v5953_v2 = vor.u32 %v7431_v57, %v5950_v58  ;;  %v3252_v32 = vadd.f32 %v3251_v15, %v9093_v16 }
  0xc5   :  { %3496 = vmatpush.bf16.msrb.mxu3 %v5745_v34  ;;  %v7495_v62 = vld [vmem:[%s11352_s1 + $0xaa4] sm:$0xf]  ;;  %v6206_v63 = vld [vmem:[%s11352_s1 + $0xab0] sm:$0xf0]  ;;  %3458 = vmatmul.bf16.vlgmr.msrb.gmra.mxu0 %v8302_v41  ;;  %v6081_v3 = vor.u32 %v7463_v59, %v6078_v61  ;;  %v3264_v34 = vpop.f32.mrf.mxu1 }
  0xc6   :  { %3502 = vmatpush.bf16.msra.mxu0 %v5985_v36  ;;  %v7527_v0 = vld [vmem:[%s11352_s1 + $0xba4] sm:$0xf]  ;;  %v6334_v1 = vld [vmem:[%s11352_s1 + $0xbb0] sm:$0xf0]  ;;  %3471 = vmatmul.bf16.vlgmr.msrb.gmra.mxu1 %v8306_v44  ;;  %v6209_v4 = vor.u32 %v7495_v62, %v6206_v63  ;;  %v3265_v45 = vadd.f32 %v3264_v34, %v3252_v32 }
  0xc7   :  { %3515 = vmatpush.bf16.msra.mxu1 %v6113_v37  ;;  %3484 = vmatmul.bf16.vlgmr.msrb.gmra.mxu2 %v8294_v38  ;;  %v7427_v5 = vld [vmem:[%s11352_s1 + $0x884] sm:$0xf]  ;;  %v5934_v6 = vld [vmem:[%s11352_s1 + $0x890] sm:$0xf0]  ;;  %v6337_v8 = vor.u32 %v7527_v0, %v6334_v1 }
  0xc8   :  { %3528 = vmatpush.bf16.msra.mxu2 %v6241_v39  ;;  %3497 = vmatmul.bf16.vlgmr.msrb.gmra.mxu3 %v8304_v42  ;;  %v7459_v7 = vld [vmem:[%s11352_s1 + $0x984] sm:$0xf]  ;;  %v6062_v9 = vld [vmem:[%s11352_s1 + $0x990] sm:$0xf0]  ;;  %v5937_v14 = vor.u32 %v7427_v5, %v5934_v6 }
  0xc9   :  { %3541 = vmatpush.bf16.msra.mxu3 %v6369_v46  ;;  %v7491_v10 = vld [vmem:[%s11352_s1 + $0xa84] sm:$0xf]  ;;  %v6190_v11 = vld [vmem:[%s11352_s1 + $0xa90] sm:$0xf0]  ;;  %v6065_v17 = vor.u32 %v7459_v7, %v6062_v9  ;;  %v3277_v52 = vpop.f32.mrf.mxu2 }
  0xca   :  { %3503 = vmatpush.bf16.msra.mxu0 %v5969_v53  ;;  %v7523_v12 = vld [vmem:[%s11352_s1 + $0xb84] sm:$0xf]  ;;  %v6318_v13 = vld [vmem:[%s11352_s1 + $0xb90] sm:$0xf0]  ;;  %v6193_v21 = vor.u32 %v7491_v10, %v6190_v11  ;;  %v3278_v57 = vadd.f32 %v3277_v52, %v3265_v45 }
  0xcb   :  { %3516 = vmatpush.bf16.msra.mxu1 %v6097_v55  ;;  %v7423_v24 = vld [vmem:[%s11352_s1 + $0x864] sm:$0xf]  ;;  %v5918_v26 = vld [vmem:[%s11352_s1 + $0x870] sm:$0xf0]  ;;  %v6321_v36 = vor.u32 %v7523_v12, %v6318_v13  ;;  %v3253_v63 = vpop.f32.mrf.mxu0 }
  0xcc   :  { %3529 = vmatpush.bf16.msra.mxu2 %v6225_v56  ;;  %v7455_v27 = vld [vmem:[%s11352_s1 + $0x964] sm:$0xf]  ;;  %v6046_v37 = vld [vmem:[%s11352_s1 + $0x970] sm:$0xf0]  ;;  %v5921_v46 = vor.u32 %v7423_v24, %v5918_v26  ;;  %v3290_v58 = vpop.f32.mrf.mxu3 }
  0xcd   :  { %3542 = vmatpush.bf16.msra.mxu3 %v6353_v60  ;;  %v7487_v39 = vld [vmem:[%s11352_s1 + $0xa64] sm:$0xf]  ;;  %v6174_v40 = vld [vmem:[%s11352_s1 + $0xa70] sm:$0xf0]  ;;  %v6049_v47 = vor.u32 %v7455_v27, %v6046_v37  ;;  %v9226_v62 = vadd.f32 %v3290_v58, %v3278_v57  ;;  %v3266_v5 = vpop.f32.mrf.mxu1 }
  0xce   :  { %3504 = vmatpush.bf16.msra.mxu0 %v5953_v2  ;;  %v7519_v43 = vld [vmem:[%s11352_s1 + $0xb64] sm:$0xf]  ;;  %v6302_v16 = vld [vmem:[%s11352_s1 + $0xb70] sm:$0xf0]  ;;  %v6177_v48 = vor.u32 %v7487_v39, %v6174_v40 }
  0xcf   :  { %3517 = vmatpush.bf16.msra.mxu1 %v6081_v3  ;;  %v7419_v49 = vld [vmem:[%s11352_s1 + $0x844] sm:$0xf]  ;;  %v5902_v50 = vld [vmem:[%s11352_s1 + $0x850] sm:$0xf0]  ;;  %v6305_v53 = vor.u32 %v7519_v43, %v6302_v16 }
  0xd0   :  { %3530 = vmatpush.bf16.msra.mxu2 %v6209_v4  ;;  %v7451_v51 = vld [vmem:[%s11352_s1 + $0x944] sm:$0xf]  ;;  %v6030_v54 = vld [vmem:[%s11352_s1 + $0x950] sm:$0xf0]  ;;  %v5905_v61 = vor.u32 %v7419_v49, %v5902_v50 }
  0xd1   :  { %3543 = vmatpush.bf16.msra.mxu3 %v6337_v8  ;;  %v7483_v55 = vld [vmem:[%s11352_s1 + $0xa44] sm:$0xf]  ;;  %v6158_v56 = vld [vmem:[%s11352_s1 + $0xa50] sm:$0xf0]  ;;  %v6033_v0 = vor.u32 %v7451_v51, %v6030_v54  ;;  %v3279_v27 = vpop.f32.mrf.mxu2 }
  0xd2   :  { %3505 = vmatpush.bf16.msra.mxu0 %v5937_v14  ;;  %v7515_v59 = vld [vmem:[%s11352_s1 + $0xb44] sm:$0xf]  ;;  %v6286_v60 = vld [vmem:[%s11352_s1 + $0xb50] sm:$0xf0]  ;;  %v6161_v1 = vor.u32 %v7483_v55, %v6158_v56 }
  0xd3   :  { %3518 = vmatpush.bf16.msra.mxu1 %v6065_v17  ;;  %v7415_v2 = vld [vmem:[%s11352_s1 + $0x824] sm:$0xf]  ;;  %v5886_v3 = vld [vmem:[%s11352_s1 + $0x830] sm:$0xf0]  ;;  %v6289_v6 = vor.u32 %v7515_v59, %v6286_v60 }
  0xd4   :  { %3531 = vmatpush.bf16.msra.mxu2 %v6193_v21  ;;  %v7447_v4 = vld [vmem:[%s11352_s1 + $0x924] sm:$0xf]  ;;  %v6014_v7 = vld [vmem:[%s11352_s1 + $0x930] sm:$0xf0]  ;;  %v5889_v12 = vor.u32 %v7415_v2, %v5886_v3  ;;  %v3292_v39 = vpop.f32.mrf.mxu3 }
  0xd5   :  { %3544 = vmatpush.bf16.msra.mxu3 %v6321_v36  ;;  %v7479_v8 = vld [vmem:[%s11352_s1 + $0xa24] sm:$0xf]  ;;  %v6142_v9 = vld [vmem:[%s11352_s1 + $0xa30] sm:$0xf0]  ;;  %v6017_v15 = vor.u32 %v7447_v4, %v6014_v7 }
  0xd6   :  { %3506 = vmatpush.bf16.msra.mxu0 %v5921_v46  ;;  %v7511_v10 = vld [vmem:[%s11352_s1 + $0xb24] sm:$0xf]  ;;  %v6270_v11 = vld [vmem:[%s11352_s1 + $0xb30] sm:$0xf0]  ;;  %v6145_v17 = vor.u32 %v7479_v8, %v6142_v9 }
  0xd7   :  { %3519 = vmatpush.bf16.msra.mxu1 %v6049_v47  ;;  %v7411_v13 = vld [vmem:[%s11352_s1 + $0x804] sm:$0xf]  ;;  %v5870_v14 = vld [vmem:[%s11352_s1 + $0x810] sm:$0xf0]  ;;  %v6273_v32 = vor.u32 %v7511_v10, %v6270_v11 }
  0xd8   :  { %3532 = vmatpush.bf16.msra.mxu2 %v6177_v48  ;;  %v7443_v21 = vld [vmem:[%s11352_s1 + $0x904] sm:$0xf]  ;;  %v5998_v24 = vld [vmem:[%s11352_s1 + $0x910] sm:$0xf0]  ;;  %v5873_v45 = vor.u32 %v7411_v13, %v5870_v14 }
  0xd9   :  { %3545 = vmatpush.bf16.msra.mxu3 %v6305_v53  ;;  %v7475_v26 = vld [vmem:[%s11352_s1 + $0xa04] sm:$0xf]  ;;  %v6126_v34 = vld [vmem:[%s11352_s1 + $0xa10] sm:$0xf0]  ;;  %v6001_v49 = vor.u32 %v7443_v21, %v5998_v24 }
  0xda   :  { %3507 = vmatpush.bf16.msra.mxu0 %v5905_v61  ;;  %v7507_v36 = vld [vmem:[%s11352_s1 + $0xb04] sm:$0xf]  ;;  %v6254_v37 = vld [vmem:[%s11352_s1 + $0xb10] sm:$0xf0]  ;;  %v6129_v50 = vor.u32 %v7475_v26, %v6126_v34 }
  0xdb   :  { %3520 = vmatpush.bf16.msra.mxu1 %v6033_v0  ;;  %v7567_v40 = vld [vmem:[%s11352_s1 + $0xce4] sm:$0xf]  ;;  %v6494_v43 = vld [vmem:[%s11352_s1 + $0xcf0] sm:$0xf0]  ;;  %v6257_v53 = vor.u32 %v7507_v36, %v6254_v37 }
  0xdc   :  { %3533 = vmatpush.bf16.msra.mxu2 %v6161_v1  ;;  %v7599_v16 = vld [vmem:[%s11352_s1 + $0xde4] sm:$0xf]  ;;  %v6622_v46 = vld [vmem:[%s11352_s1 + $0xdf0] sm:$0xf0]  ;;  %v6497_v54 = vor.u32 %v7567_v40, %v6494_v43 }
  0xdd   :  { %3546 = vmatpush.bf16.msra.mxu3 %v6289_v6  ;;  %v7631_v47 = vld [vmem:[%s11352_s1 + $0xee4] sm:$0xf]  ;;  %v6750_v48 = vld [vmem:[%s11352_s1 + $0xef0] sm:$0xf0]  ;;  %v6625_v55 = vor.u32 %v7599_v16, %v6622_v46 }
  0xde   :  { %3508 = vmatpush.bf16.msra.mxu0 %v5889_v12  ;;  %v7663_v51 = vld [vmem:[%s11352_s1 + $0xfe4] sm:$0xf]  ;;  %v6878_v52 = vld [vmem:[%s11352_s1 + $0xff0] sm:$0xf0]  ;;  %v6753_v56 = vor.u32 %v7631_v47, %v6750_v48 }
  0xdf   :  { %3521 = vmatpush.bf16.msra.mxu1 %v6017_v15  ;;  %v7563_v57 = vld [vmem:[%s11352_s1 + $0xcc4] sm:$0xf]  ;;  %v6478_v58 = vld [vmem:[%s11352_s1 + $0xcd0] sm:$0xf0]  ;;  %v6881_v60 = vor.u32 %v7663_v51, %v6878_v52 }
  0xe0   :  { %3534 = vmatpush.bf16.msra.mxu2 %v6145_v17  ;;  %v7595_v59 = vld [vmem:[%s11352_s1 + $0xdc4] sm:$0xf]  ;;  %v6606_v61 = vld [vmem:[%s11352_s1 + $0xdd0] sm:$0xf0]  ;;  %v6481_v3 = vor.u32 %v7563_v57, %v6478_v58 }
  0xe1   :  { %3547 = vmatpush.bf16.msra.mxu3 %v6273_v32  ;;  %v7627_v63 = vld [vmem:[%s11352_s1 + $0xec4] sm:$0xf]  ;;  %v6734_v0 = vld [vmem:[%s11352_s1 + $0xed0] sm:$0xf0]  ;;  %v6609_v4 = vor.u32 %v7595_v59, %v6606_v61 }
  0xe2   :  { %3509 = vmatpush.bf16.msra.mxu0 %v5873_v45  ;;  %v7659_v1 = vld [vmem:[%s11352_s1 + $0xfc4] sm:$0xf]  ;;  %v6862_v2 = vld [vmem:[%s11352_s1 + $0xfd0] sm:$0xf0]  ;;  %v6737_v5 = vor.u32 %v7627_v63, %v6734_v0 }
  0xe3   :  { %3522 = vmatpush.bf16.msra.mxu1 %v6001_v49  ;;  %v7559_v6 = vld [vmem:[%s11352_s1 + $0xca4] sm:$0xf]  ;;  %v6462_v7 = vld [vmem:[%s11352_s1 + $0xcb0] sm:$0xf0]  ;;  %v6865_v9 = vor.u32 %v7659_v1, %v6862_v2 }
  0xe4   :  { %3535 = vmatpush.bf16.msra.mxu2 %v6129_v50  ;;  %v7591_v8 = vld [vmem:[%s11352_s1 + $0xda4] sm:$0xf]  ;;  %v6590_v10 = vld [vmem:[%s11352_s1 + $0xdb0] sm:$0xf0]  ;;  %v6465_v15 = vor.u32 %v7559_v6, %v6462_v7  ;;  %v3303_v39 = vpop.f32.mrf.mxu0 }
  0xe5   :  { %3548 = vmatpush.bf16.msra.mxu3 %v6257_v53  ;;  %3510 = vmatmul.bf16.vlgmr.msra.gmra.mxu0 %v8495_v25  ;;  %v7623_v11 = vld [vmem:[%s11352_s1 + $0xea4] sm:$0xf]  ;;  %v6718_v12 = vld [vmem:[%s11352_s1 + $0xeb0] sm:$0xf0]  ;;  %v6593_v17 = vor.u32 %v7591_v8, %v6590_v10  ;;  %v3304_v16 = vadd.f32 %v3303_v39, %v9226_v62  ;;  %v3316_v46 = vpop.f32.mrf.mxu1 }
  0xe6   :  { %3554 = vmatpush.bf16.msrb.mxu0 %v6497_v54  ;;  %3523 = vmatmul.bf16.vlgmr.msra.gmra.mxu1 %v8508_v30  ;;  %v7655_v13 = vld [vmem:[%s11352_s1 + $0xfa4] sm:$0xf]  ;;  %v6846_v14 = vld [vmem:[%s11352_s1 + $0xfb0] sm:$0xf0]  ;;  %v6721_v21 = vor.u32 %v7623_v11, %v6718_v12 }
  0xe7   :  { %3567 = vmatpush.bf16.msrb.mxu1 %v6625_v55  ;;  %3536 = vmatmul.bf16.vlgmr.msra.gmra.mxu2 %v8506_v29  ;;  %v7555_v24 = vld [vmem:[%s11352_s1 + $0xc84] sm:$0xf]  ;;  %v6446_v26 = vld [vmem:[%s11352_s1 + $0xc90] sm:$0xf0]  ;;  %v6849_v32 = vor.u32 %v7655_v13, %v6846_v14  ;;  %v3317_v52 = vadd.f32 %v3316_v46, %v3304_v16 }
  0xe8   :  { %3580 = vmatpush.bf16.msrb.mxu2 %v6753_v56  ;;  %3549 = vmatmul.bf16.vlgmr.msra.gmra.mxu3 %v8516_v33  ;;  %v7587_v27 = vld [vmem:[%s11352_s1 + $0xd84] sm:$0xf]  ;;  %v6574_v34 = vld [vmem:[%s11352_s1 + $0xd90] sm:$0xf0]  ;;  %v6449_v45 = vor.u32 %v7555_v24, %v6446_v26 }
  0xe9   :  { %3593 = vmatpush.bf16.msrb.mxu3 %v6881_v60  ;;  %v7619_v36 = vld [vmem:[%s11352_s1 + $0xe84] sm:$0xf]  ;;  %v6702_v37 = vld [vmem:[%s11352_s1 + $0xe90] sm:$0xf0]  ;;  %v6577_v47 = vor.u32 %v7587_v27, %v6574_v34  ;;  %v3329_v2 = vpop.f32.mrf.mxu2 }
  0xea   :  { %3555 = vmatpush.bf16.msrb.mxu0 %v6481_v3  ;;  %v7651_v40 = vld [vmem:[%s11352_s1 + $0xf84] sm:$0xf]  ;;  %v6830_v43 = vld [vmem:[%s11352_s1 + $0xf90] sm:$0xf0]  ;;  %v6705_v48 = vor.u32 %v7619_v36, %v6702_v37  ;;  %v3330_v6 = vadd.f32 %v3329_v2, %v3317_v52 }
  0xeb   :  { %3568 = vmatpush.bf16.msrb.mxu1 %v6609_v4  ;;  %v7551_v49 = vld [vmem:[%s11352_s1 + $0xc64] sm:$0xf]  ;;  %v6430_v50 = vld [vmem:[%s11352_s1 + $0xc70] sm:$0xf0]  ;;  %v6833_v62 = vor.u32 %v7651_v40, %v6830_v43 }
  0xec   :  { %3581 = vmatpush.bf16.msrb.mxu2 %v6737_v5  ;;  %v7583_v51 = vld [vmem:[%s11352_s1 + $0xd64] sm:$0xf]  ;;  %v6558_v53 = vld [vmem:[%s11352_s1 + $0xd70] sm:$0xf0]  ;;  %v6433_v58 = vor.u32 %v7551_v49, %v6430_v50  ;;  %v3305_v10 = vpop.f32.mrf.mxu0 }
  0xed   :  { %3594 = vmatpush.bf16.msrb.mxu3 %v6865_v9  ;;  %v7615_v54 = vld [vmem:[%s11352_s1 + $0xe64] sm:$0xf]  ;;  %v6686_v55 = vld [vmem:[%s11352_s1 + $0xe70] sm:$0xf0]  ;;  %v6561_v59 = vor.u32 %v7583_v51, %v6558_v53  ;;  %v3342_v7 = vpop.f32.mrf.mxu3  ;;  %v3318_v12 = vpop.f32.mrf.mxu1  ;;  %v4964_v53 = vld [vmem:[%s11352_s1 + $0xe8] sm:$0xf] }
  0xee   :  { %3556 = vmatpush.bf16.msrb.mxu0 %v6465_v15  ;;  %v7647_v56 = vld [vmem:[%s11352_s1 + $0xf64] sm:$0xf]  ;;  %v6814_v57 = vld [vmem:[%s11352_s1 + $0xf70] sm:$0xf0]  ;;  %v6689_v60 = vor.u32 %v7615_v54, %v6686_v55  ;;  %v9425_v13 = vadd.f32 %v3342_v7, %v3330_v6  ;;  %v7186_v54 = vld [vmem:[%s11352_s1 + $0xf4] sm:$0xf0] }
  0xef   :  { %3569 = vmatpush.bf16.msrb.mxu1 %v6593_v17  ;;  %v7547_v61 = vld [vmem:[%s11352_s1 + $0xc44] sm:$0xf]  ;;  %v6414_v63 = vld [vmem:[%s11352_s1 + $0xc50] sm:$0xf0]  ;;  %v6817_v1 = vor.u32 %v7647_v56, %v6814_v57  ;;  %v5092_v55 = vld [vmem:[%s11352_s1 + $0x1e8] sm:$0xf] }
  0xf0   :  { %3582 = vmatpush.bf16.msrb.mxu2 %v6721_v21  ;;  %v7579_v0 = vld [vmem:[%s11352_s1 + $0xd44] sm:$0xf]  ;;  %v6542_v3 = vld [vmem:[%s11352_s1 + $0xd50] sm:$0xf0]  ;;  %v6417_v11 = vor.u32 %v7547_v61, %v6414_v63  ;;  %v4948_v6 = vld [vmem:[%s11352_s1 + $0xc8] sm:$0xf] }
  0xf1   :  { %3595 = vmatpush.bf16.msrb.mxu3 %v6849_v32  ;;  %v7611_v4 = vld [vmem:[%s11352_s1 + $0xe44] sm:$0xf]  ;;  %v6670_v5 = vld [vmem:[%s11352_s1 + $0xe50] sm:$0xf0]  ;;  %v6545_v14 = vor.u32 %v7579_v0, %v6542_v3  ;;  %v3331_v52 = vpop.f32.mrf.mxu2  ;;  %v5348_v0 = vld [vmem:[%s11352_s1 + $0x3e8] sm:$0xf]  ;;  %v4965_v3 = vor.u32 %v7186_v54, %v4964_v53 }
  0xf2   :  { %3557 = vmatpush.bf16.msrb.mxu0 %v6449_v45  ;;  %v7643_v8 = vld [vmem:[%s11352_s1 + $0xf44] sm:$0xf]  ;;  %v6798_v9 = vld [vmem:[%s11352_s1 + $0xf50] sm:$0xf0]  ;;  %v6673_v15 = vor.u32 %v7611_v4, %v6670_v5  ;;  %v7182_v7 = vld [vmem:[%s11352_s1 + $0xd4] sm:$0xf0] }
  0xf3   :  { %3570 = vmatpush.bf16.msrb.mxu1 %v6577_v47  ;;  %v7543_v17 = vld [vmem:[%s11352_s1 + $0xc24] sm:$0xf]  ;;  %v6398_v21 = vld [vmem:[%s11352_s1 + $0xc30] sm:$0xf0]  ;;  %v6801_v26 = vor.u32 %v7643_v8, %v6798_v9  ;;  %v5076_v8 = vld [vmem:[%s11352_s1 + $0x1c8] sm:$0xf] }
  0xf4   :  { %3583 = vmatpush.bf16.msrb.mxu2 %v6705_v48  ;;  %v7575_v24 = vld [vmem:[%s11352_s1 + $0xd24] sm:$0xf]  ;;  %v6526_v27 = vld [vmem:[%s11352_s1 + $0xd30] sm:$0xf0]  ;;  %v6401_v39 = vor.u32 %v7543_v17, %v6398_v21  ;;  %v7214_v10 = vld [vmem:[%s11352_s1 + $0x1d4] sm:$0xf0]  ;;  %v4949_v17 = vor.u32 %v7182_v7, %v4948_v6 }
  0xf5   :  { %3596 = vmatpush.bf16.msrb.mxu3 %v6833_v62  ;;  %v7607_v32 = vld [vmem:[%s11352_s1 + $0xe24] sm:$0xf]  ;;  %v6654_v34 = vld [vmem:[%s11352_s1 + $0xe30] sm:$0xf0]  ;;  %v6529_v16 = vor.u32 %v7575_v24, %v6526_v27  ;;  %v3344_v56 = vpop.f32.mrf.mxu3  ;;  %v7246_v12 = vld [vmem:[%s11352_s1 + $0x2d4] sm:$0xf0]  ;;  %v5077_v21 = vor.u32 %v7214_v10, %v5076_v8 }
  0xf6   :  { %3558 = vmatpush.bf16.msrb.mxu0 %v6433_v58  ;;  %v7639_v36 = vld [vmem:[%s11352_s1 + $0xf24] sm:$0xf]  ;;  %v6782_v37 = vld [vmem:[%s11352_s1 + $0xf30] sm:$0xf0]  ;;  %v6657_v45 = vor.u32 %v7607_v32, %v6654_v34  ;;  %v7218_v58 = vld [vmem:[%s11352_s1 + $0x1f4] sm:$0xf0] }
  0xf7   :  { %3571 = vmatpush.bf16.msrb.mxu1 %v6561_v59  ;;  %v7539_v40 = vld [vmem:[%s11352_s1 + $0xc04] sm:$0xf]  ;;  %v6382_v43 = vld [vmem:[%s11352_s1 + $0xc10] sm:$0xf0]  ;;  %v6785_v49 = vor.u32 %v7639_v36, %v6782_v37  ;;  %v5220_v59 = vld [vmem:[%s11352_s1 + $0x2e8] sm:$0xf]  ;;  %v5093_v4 = vor.u32 %v7218_v58, %v5092_v55 }
  0xf8   :  { %3584 = vmatpush.bf16.msrb.mxu2 %v6689_v60  ;;  %v7571_v46 = vld [vmem:[%s11352_s1 + $0xd04] sm:$0xf]  ;;  %v6510_v47 = vld [vmem:[%s11352_s1 + $0xd10] sm:$0xf0]  ;;  %v6385_v57 = vor.u32 %v7539_v40, %v6382_v43  ;;  %v7250_v60 = vld [vmem:[%s11352_s1 + $0x2f4] sm:$0xf0] }
  0xf9   :  { %3597 = vmatpush.bf16.msrb.mxu3 %v6817_v1  ;;  %v7603_v48 = vld [vmem:[%s11352_s1 + $0xe04] sm:$0xf]  ;;  %v6638_v50 = vld [vmem:[%s11352_s1 + $0xe10] sm:$0xf0]  ;;  %v6513_v61 = vor.u32 %v7571_v46, %v6510_v47  ;;  %v7282_v1 = vld [vmem:[%s11352_s1 + $0x3f4] sm:$0xf0]  ;;  %v5221_v5 = vor.u32 %v7250_v60, %v5220_v59 }
  0xfa   :  { %3559 = vmatpush.bf16.msrb.mxu0 %v6417_v11  ;;  %v7635_v51 = vld [vmem:[%s11352_s1 + $0xf04] sm:$0xf]  ;;  %v6766_v62 = vld [vmem:[%s11352_s1 + $0xf10] sm:$0xf0]  ;;  %v6641_v63 = vor.u32 %v7603_v48, %v6638_v50  ;;  %v5349_v9 = vor.u32 %v7282_v1, %v5348_v0  ;;  %v5204_v11 = vld [vmem:[%s11352_s1 + $0x2c8] sm:$0xf] }
  0xfb   :  { %3572 = vmatpush.bf16.msrb.mxu1 %v6545_v14  ;;  %v6769_v2 = vor.u32 %v7635_v51, %v6766_v62  ;;  %v5332_v14 = vld [vmem:[%s11352_s1 + $0x3c8] sm:$0xf]  ;;  %v5205_v24 = vor.u32 %v7246_v12, %v5204_v11  ;;  %v7178_v27 = vld [vmem:[%s11352_s1 + $0xb4] sm:$0xf0] }
  0xfc   :  { %3585 = vmatpush.bf16.msrb.mxu2 %v6673_v15  ;;  %v7278_v15 = vld [vmem:[%s11352_s1 + $0x3d4] sm:$0xf0]  ;;  %v5060_v32 = vld [vmem:[%s11352_s1 + $0x1a8] sm:$0xf] }
  0xfd   :  { %3598 = vmatpush.bf16.msrb.mxu3 %v6801_v26  ;;  %v4932_v26 = vld [vmem:[%s11352_s1 + $0xa8] sm:$0xf]  ;;  %v5333_v34 = vor.u32 %v7278_v15, %v5332_v14  ;;  %v7210_v36 = vld [vmem:[%s11352_s1 + $0x1b4] sm:$0xf0] }
  0xfe   :  { %3560 = vmatpush.bf16.msrb.mxu0 %v6401_v39  ;;  %v5188_v37 = vld [vmem:[%s11352_s1 + $0x2a8] sm:$0xf]  ;;  %v7242_v39 = vld [vmem:[%s11352_s1 + $0x2b4] sm:$0xf0] }
  0xff   :  { %3573 = vmatpush.bf16.msrb.mxu1 %v6529_v16  ;;  %v5316_v40 = vld [vmem:[%s11352_s1 + $0x3a8] sm:$0xf]  ;;  %v7274_v43 = vld [vmem:[%s11352_s1 + $0x3b4] sm:$0xf0]  ;;  %v4933_v16 = vor.u32 %v7178_v27, %v4932_v26  ;;  %v5189_v46 = vor.u32 %v7242_v39, %v5188_v37 }
 0x100   :  { %3586 = vmatpush.bf16.msrb.mxu2 %v6657_v45  ;;  %v5061_v45 = vor.u32 %v7210_v36, %v5060_v32  ;;  %v4916_v47 = vld [vmem:[%s11352_s1 + $0x88] sm:$0xf]  ;;  %v7174_v48 = vld [vmem:[%s11352_s1 + $0x94] sm:$0xf0]  ;;  %v5317_v50 = vor.u32 %v7274_v43, %v5316_v40 }
 0x101   :  { %3599 = vmatpush.bf16.msrb.mxu3 %v6785_v49  ;;  %v5044_v49 = vld [vmem:[%s11352_s1 + $0x188] sm:$0xf]  ;;  %v7206_v51 = vld [vmem:[%s11352_s1 + $0x194] sm:$0xf0] }
 0x102   :  { %3561 = vmatpush.bf16.msrb.mxu0 %v6385_v57  ;;  %v5172_v62 = vld [vmem:[%s11352_s1 + $0x288] sm:$0xf]  ;;  %v7238_v52 = vld [vmem:[%s11352_s1 + $0x294] sm:$0xf0]  ;;  %v4917_v57 = vor.u32 %v7174_v48, %v4916_v47  ;;  %v5045_v59 = vor.u32 %v7206_v51, %v5044_v49 }
 0x103   :  { %3574 = vmatpush.bf16.msrb.mxu1 %v6513_v61  ;;  %v5300_v54 = vld [vmem:[%s11352_s1 + $0x388] sm:$0xf]  ;;  %v7270_v55 = vld [vmem:[%s11352_s1 + $0x394] sm:$0xf0]  ;;  %v3368_v58 = vpop.f32.mrf.mxu1  ;;  %v5173_v60 = vor.u32 %v7238_v52, %v5172_v62 }
 0x104   :  { %3587 = vmatpush.bf16.msrb.mxu2 %v6641_v63  ;;  %v3355_v53 = vpop.f32.mrf.mxu0  ;;  %v4900_v61 = vld [vmem:[%s11352_s1 + $0x68] sm:$0xf]  ;;  %v7170_v63 = vld [vmem:[%s11352_s1 + $0x74] sm:$0xf0] }
 0x105   :  { %3600 = vmatpush.bf16.msrb.mxu3 %v6769_v2  ;;  %3562 = vmatmul.bf16.vlgmr.msrb.gmra.mxu0 %v8705_v23  ;;  %v3356_v56 = vadd.f32 %v3355_v53, %v9425_v13  ;;  %v5028_v0 = vld [vmem:[%s11352_s1 + $0x168] sm:$0xf]  ;;  %v5301_v13 = vor.u32 %v7270_v55, %v5300_v54  ;;  %v7202_v2 = vld [vmem:[%s11352_s1 + $0x174] sm:$0xf0]  ;;  %v4901_v7 = vor.u32 %v7170_v63, %v4900_v61 }
 0x106   :  { %3606 = vmatpush.bf16.msra.mxu0 %v4965_v3  ;;  %3575 = vmatmul.bf16.vlgmr.msrb.gmra.mxu1 %v8718_v31  ;;  %v5156_v3 = vld [vmem:[%s11352_s1 + $0x268] sm:$0xf]  ;;  %v7266_v6 = vld [vmem:[%s11352_s1 + $0x374] sm:$0xf0]  ;;  %v5029_v8 = vor.u32 %v7202_v2, %v5028_v0 }
 0x107   :  { %3619 = vmatpush.bf16.msra.mxu1 %v5093_v4  ;;  %3588 = vmatmul.bf16.vlgmr.msrb.gmra.mxu2 %v8716_v28  ;;  %v3369_v1 = vadd.f32 %v3368_v58, %v3356_v56  ;;  %v7234_v4 = vld [vmem:[%s11352_s1 + $0x274] sm:$0xf0]  ;;  %v4884_v10 = vld [vmem:[%s11352_s1 + $0x48] sm:$0xf] }
 0x108   :  { %3632 = vmatpush.bf16.msra.mxu2 %v5221_v5  ;;  %3601 = vmatmul.bf16.vlgmr.msrb.gmra.mxu3 %v8726_v35  ;;  %v5284_v5 = vld [vmem:[%s11352_s1 + $0x368] sm:$0xf]  ;;  %v7166_v11 = vld [vmem:[%s11352_s1 + $0x54] sm:$0xf0] }
 0x109   :  { %3645 = vmatpush.bf16.msra.mxu3 %v5349_v9  ;;  %v5157_v9 = vor.u32 %v7234_v4, %v5156_v3  ;;  %v5012_v12 = vld [vmem:[%s11352_s1 + $0x148] sm:$0xf]  ;;  %v5285_v14 = vor.u32 %v7266_v6, %v5284_v5  ;;  %v4885_v37 = vor.u32 %v7166_v11, %v4884_v10  ;;  %v7194_v49 = vld [vmem:[%s11352_s1 + $0x134] sm:$0xf0] }
 0x10a   :  { %3607 = vmatpush.bf16.msra.mxu0 %v4949_v17  ;;  %v7198_v17 = vld [vmem:[%s11352_s1 + $0x154] sm:$0xf0]  ;;  %v5268_v32 = vld [vmem:[%s11352_s1 + $0x348] sm:$0xf] }
 0x10b   :  { %3620 = vmatpush.bf16.msra.mxu1 %v5077_v21  ;;  %v5140_v21 = vld [vmem:[%s11352_s1 + $0x248] sm:$0xf]  ;;  %v3394_v27 = vpop.f32.mrf.mxu3  ;;  %v3370_v39 = vpop.f32.mrf.mxu1  ;;  %v5013_v43 = vor.u32 %v7198_v17, %v5012_v12  ;;  %v7226_v51 = vld [vmem:[%s11352_s1 + $0x234] sm:$0xf0] }
 0x10c   :  { %3633 = vmatpush.bf16.msra.mxu2 %v5205_v24  ;;  %v3381_v15 = vpop.f32.mrf.mxu2  ;;  %v7230_v24 = vld [vmem:[%s11352_s1 + $0x254] sm:$0xf0]  ;;  %v3357_v36 = vpop.f32.mrf.mxu0  ;;  %v4996_v47 = vld [vmem:[%s11352_s1 + $0x128] sm:$0xf] }
 0x10d   :  { %3646 = vmatpush.bf16.msra.mxu3 %v5333_v34  ;;  %v3382_v26 = vadd.f32 %v3381_v15, %v3369_v1  ;;  %v7262_v34 = vld [vmem:[%s11352_s1 + $0x354] sm:$0xf0]  ;;  %v5252_v62 = vld [vmem:[%s11352_s1 + $0x328] sm:$0xf]  ;;  %v4997_v56 = vor.u32 %v7194_v49, %v4996_v47 }
 0x10e   :  { %3608 = vmatpush.bf16.msra.mxu0 %v4933_v16  ;;  %v5141_v16 = vor.u32 %v7230_v24, %v5140_v21  ;;  %v5269_v48 = vor.u32 %v7262_v34, %v5268_v32  ;;  %v7258_v52 = vld [vmem:[%s11352_s1 + $0x334] sm:$0xf0]  ;;  %v4852_v54 = vld [vmem:[%s11352_s1 + $0x8] sm:$0xf] }
 0x10f   :  { %3621 = vmatpush.bf16.msra.mxu1 %v5061_v45  ;;  %v9624_v40 = vadd.f32 %v3394_v27, %v3382_v26  ;;  %v4868_v45 = vld [vmem:[%s11352_s1 + $0x28] sm:$0xf]  ;;  %v7158_v55 = vld [vmem:[%s11352_s1 + $0x14] sm:$0xf0]  ;;  %v5253_v61 = vor.u32 %v7258_v52, %v5252_v62 }
 0x110   :  { %3634 = vmatpush.bf16.msra.mxu2 %v5189_v46  ;;  %v7162_v46 = vld [vmem:[%s11352_s1 + $0x34] sm:$0xf0]  ;;  %v4980_v58 = vld [vmem:[%s11352_s1 + $0x108] sm:$0xf]  ;;  %v4853_v6 = vor.u32 %v7158_v55, %v4852_v54 }
 0x111   :  { %3647 = vmatpush.bf16.msra.mxu3 %v5317_v50  ;;  %v5124_v50 = vld [vmem:[%s11352_s1 + $0x228] sm:$0xf]  ;;  %v4869_v53 = vor.u32 %v7162_v46, %v4868_v45  ;;  %v7222_v63 = vld [vmem:[%s11352_s1 + $0x214] sm:$0xf0] }
 0x112   :  { %3609 = vmatpush.bf16.msra.mxu0 %v4917_v57  ;;  %v5125_v57 = vor.u32 %v7226_v51, %v5124_v50  ;;  %v5236_v0 = vld [vmem:[%s11352_s1 + $0x308] sm:$0xf]  ;;  %v7314_v3 = vld [vmem:[%s11352_s1 + $0x4f4] sm:$0xf0] }
 0x113   :  { %3622 = vmatpush.bf16.msra.mxu1 %v5045_v59  ;;  %v7190_v59 = vld [vmem:[%s11352_s1 + $0x114] sm:$0xf0]  ;;  %v5476_v2 = vld [vmem:[%s11352_s1 + $0x4e8] sm:$0xf]  ;;  %v3396_v5 = vpop.f32.mrf.mxu3 }
 0x114   :  { %3635 = vmatpush.bf16.msra.mxu2 %v5173_v60  ;;  %v5108_v60 = vld [vmem:[%s11352_s1 + $0x208] sm:$0xf]  ;;  %v3383_v1 = vpop.f32.mrf.mxu2  ;;  %v4981_v10 = vor.u32 %v7190_v59, %v4980_v58  ;;  %v5477_v17 = vor.u32 %v7314_v3, %v5476_v2  ;;  %v7310_v27 = vld [vmem:[%s11352_s1 + $0x4d4] sm:$0xf0] }
 0x115   :  { %3648 = vmatpush.bf16.msra.mxu3 %v5301_v13  ;;  %v7254_v13 = vld [vmem:[%s11352_s1 + $0x314] sm:$0xf0]  ;;  %v5604_v4 = vld [vmem:[%s11352_s1 + $0x5e8] sm:$0xf]  ;;  %v5109_v11 = vor.u32 %v7222_v63, %v5108_v60  ;;  %v7772_v63 = vld [vmem:[%s11354_s2] sm:$0xf] }
 0x116   :  { %3610 = vmatpush.bf16.msra.mxu0 %v4901_v7  ;;  %v7346_v7 = vld [vmem:[%s11352_s1 + $0x5f4] sm:$0xf0]  ;;  %v5860_v12 = vld [vmem:[%s11352_s1 + $0x7e8] sm:$0xf]  ;;  %v5237_v15 = vor.u32 %v7254_v13, %v5236_v0  ;;  %v567_v0 = vperm.slane %v7772_v63, 1 }
 0x117   :  { %3623 = vmatpush.bf16.msra.mxu1 %v5029_v8  ;;  %v5732_v8 = vld [vmem:[%s11352_s1 + $0x6e8] sm:$0xf]  ;;  %v5605_v21 = vor.u32 %v7346_v7, %v5604_v4  ;;  %v7342_v36 = vld [vmem:[%s11352_s1 + $0x5d4] sm:$0xf0] }
 0x118   :  { %3636 = vmatpush.bf16.msra.mxu2 %v5157_v9  ;;  %v7378_v9 = vld [vmem:[%s11352_s1 + $0x6f4] sm:$0xf0]  ;;  %v5460_v26 = vld [vmem:[%s11352_s1 + $0x4c8] sm:$0xf] }
 0x119   :  { %3649 = vmatpush.bf16.msra.mxu3 %v5285_v14  ;;  %v7410_v14 = vld [vmem:[%s11352_s1 + $0x7f4] sm:$0xf0]  ;;  %v5733_v24 = vor.u32 %v7378_v9, %v5732_v8  ;;  %v5588_v32 = vld [vmem:[%s11352_s1 + $0x5c8] sm:$0xf]  ;;  %v5461_v45 = vor.u32 %v7310_v27, %v5460_v26 }
 0x11a   :  { %3611 = vmatpush.bf16.msra.mxu0 %v4885_v37  ;;  %v5861_v34 = vor.u32 %v7410_v14, %v5860_v12  ;;  %v5716_v37 = vld [vmem:[%s11352_s1 + $0x6c8] sm:$0xf]  ;;  %v7374_v39 = vld [vmem:[%s11352_s1 + $0x6d4] sm:$0xf0]  ;;  %v5589_v46 = vor.u32 %v7342_v36, %v5588_v32 }
 0x11b   :  { %3624 = vmatpush.bf16.msra.mxu1 %v5013_v43  ;;  %v5844_v43 = vld [vmem:[%s11352_s1 + $0x7c8] sm:$0xf]  ;;  %v5717_v47 = vor.u32 %v7374_v39, %v5716_v37  ;;  %v7306_v49 = vld [vmem:[%s11352_s1 + $0x4b4] sm:$0xf0] }
 0x11c   :  { %3637 = vmatpush.bf16.msra.mxu2 %v5141_v16  ;;  %v7406_v16 = vld [vmem:[%s11352_s1 + $0x7d4] sm:$0xf0]  ;;  %v5572_v50 = vld [vmem:[%s11352_s1 + $0x5a8] sm:$0xf] }
 0x11d   :  { %3650 = vmatpush.bf16.msra.mxu3 %v5269_v48  ;;  %v5444_v48 = vld [vmem:[%s11352_s1 + $0x4a8] sm:$0xf]  ;;  %v5845_v51 = vor.u32 %v7406_v16, %v5844_v43  ;;  %v7338_v62 = vld [vmem:[%s11352_s1 + $0x5b4] sm:$0xf0] }
 0x11e   :  { %3612 = vmatpush.bf16.msra.mxu0 %v4869_v53  ;;  %v5700_v52 = vld [vmem:[%s11352_s1 + $0x6a8] sm:$0xf]  ;;  %v7370_v53 = vld [vmem:[%s11352_s1 + $0x6b4] sm:$0xf0]  ;;  %v5573_v58 = vor.u32 %v7338_v62, %v5572_v50 }
 0x11f   :  { %3625 = vmatpush.bf16.msra.mxu1 %v4997_v56  ;;  %v5828_v54 = vld [vmem:[%s11352_s1 + $0x7a8] sm:$0xf]  ;;  %v7402_v55 = vld [vmem:[%s11352_s1 + $0x7b4] sm:$0xf0]  ;;  %v5445_v56 = vor.u32 %v7306_v49, %v5444_v48  ;;  %v5701_v59 = vor.u32 %v7370_v53, %v5700_v52 }
 0x120   :  { %3638 = vmatpush.bf16.msra.mxu2 %v5125_v57  ;;  %v5428_v57 = vld [vmem:[%s11352_s1 + $0x488] sm:$0xf]  ;;  %v7302_v60 = vld [vmem:[%s11352_s1 + $0x494] sm:$0xf0]  ;;  %v5829_v13 = vor.u32 %v7402_v55, %v5828_v54 }
 0x121   :  { %3651 = vmatpush.bf16.msra.mxu3 %v5253_v61  ;;  %v5556_v61 = vld [vmem:[%s11352_s1 + $0x588] sm:$0xf]  ;;  %v7334_v1 = vld [vmem:[%s11352_s1 + $0x594] sm:$0xf0] }
 0x122   :  { %3613 = vmatpush.bf16.msra.mxu0 %v4853_v6  ;;  %v5684_v2 = vld [vmem:[%s11352_s1 + $0x688] sm:$0xf]  ;;  %v7366_v3 = vld [vmem:[%s11352_s1 + $0x694] sm:$0xf0]  ;;  %v5429_v6 = vor.u32 %v7302_v60, %v5428_v57  ;;  %v3407_v7 = vpop.f32.mrf.mxu0  ;;  %v5557_v8 = vor.u32 %v7334_v1, %v5556_v61 }
 0x123   :  { %3626 = vmatpush.bf16.msra.mxu1 %v4981_v10  ;;  %v5812_v4 = vld [vmem:[%s11352_s1 + $0x788] sm:$0xf]  ;;  %v7398_v5 = vld [vmem:[%s11352_s1 + $0x794] sm:$0xf0]  ;;  %v5685_v9 = vor.u32 %v7366_v3, %v5684_v2  ;;  %v3408_v14 = vadd.f32 %v3407_v7, %v567_v0 }
 0x124   :  { %3639 = vmatpush.bf16.msra.mxu2 %v5109_v11  ;;  %v5412_v10 = vld [vmem:[%s11352_s1 + $0x468] sm:$0xf]  ;;  %v7298_v11 = vld [vmem:[%s11352_s1 + $0x474] sm:$0xf0] }
 0x125   :  { %3652 = vmatpush.bf16.msra.mxu3 %v5237_v15  ;;  %3614 = vmatmul.bf16.vlgmr.msra.gmra.mxu0 %v8140_v19  ;;  %v5540_v12 = vld [vmem:[%s11352_s1 + $0x568] sm:$0xf]  ;;  %v3420_v15 = vpop.f32.mrf.mxu1  ;;  %v7362_v26 = vld [vmem:[%s11352_s1 + $0x674] sm:$0xf0]  ;;  %v5413_v36 = vor.u32 %v7298_v11, %v5412_v10 }
 0x126   :  { %3658 = vmatpush.bf16.msrb.mxu0 %v5477_v17  ;;  %3627 = vmatmul.bf16.vlgmr.msra.gmra.mxu1 %v8144_v22  ;;  %v5813_v17 = vor.u32 %v7398_v5, %v5812_v4  ;;  %v5796_v27 = vld [vmem:[%s11352_s1 + $0x768] sm:$0xf]  ;;  %v7394_v32 = vld [vmem:[%s11352_s1 + $0x774] sm:$0xf0] }
 0x127   :  { %3671 = vmatpush.bf16.msrb.mxu1 %v5605_v21  ;;  %3640 = vmatmul.bf16.vlgmr.msra.gmra.mxu2 %v8138_v18  ;;  %v7330_v21 = vld [vmem:[%s11352_s1 + $0x574] sm:$0xf0]  ;;  %v5396_v43 = vld [vmem:[%s11352_s1 + $0x448] sm:$0xf] }
 0x128   :  { %3684 = vmatpush.bf16.msrb.mxu2 %v5733_v24  ;;  %3653 = vmatmul.bf16.vlgmr.msra.gmra.mxu3 %v8142_v20  ;;  %v5668_v24 = vld [vmem:[%s11352_s1 + $0x668] sm:$0xf]  ;;  %v5541_v37 = vor.u32 %v7330_v21, %v5540_v12  ;;  %v7294_v16 = vld [vmem:[%s11352_s1 + $0x454] sm:$0xf0] }
 0x129   :  { %3697 = vmatpush.bf16.msrb.mxu3 %v5861_v34  ;;  %v3421_v34 = vadd.f32 %v3420_v15, %v3408_v14  ;;  %v5669_v39 = vor.u32 %v7362_v26, %v5668_v24  ;;  %v7326_v48 = vld [vmem:[%s11352_s1 + $0x554] sm:$0xf0]  ;;  %v5652_v49 = vld [vmem:[%s11352_s1 + $0x648] sm:$0xf]  ;;  %v5397_v54 = vor.u32 %v7294_v16, %v5396_v43 }
 0x12a   :  { %3659 = vmatpush.bf16.msrb.mxu0 %v5461_v45  ;;  %v5524_v45 = vld [vmem:[%s11352_s1 + $0x548] sm:$0xf]  ;;  %v7358_v50 = vld [vmem:[%s11352_s1 + $0x654] sm:$0xf0] }
 0x12b   :  { %3672 = vmatpush.bf16.msrb.mxu1 %v5589_v46  ;;  %v3433_v46 = vpop.f32.mrf.mxu2  ;;  %v3446_v62 = vpop.f32.mrf.mxu3  ;;  %v5780_v52 = vld [vmem:[%s11352_s1 + $0x748] sm:$0xf]  ;;  %v7390_v53 = vld [vmem:[%s11352_s1 + $0x754] sm:$0xf0]  ;;  %v5525_v57 = vor.u32 %v7326_v48, %v5524_v45 }
 0x12c   :  { %3685 = vmatpush.bf16.msrb.mxu2 %v5717_v47  ;;  %v5797_v47 = vor.u32 %v7394_v32, %v5796_v27  ;;  %v7290_v60 = vld [vmem:[%s11352_s1 + $0x434] sm:$0xf0]  ;;  %v5508_v61 = vld [vmem:[%s11352_s1 + $0x528] sm:$0xf]  ;;  %v5781_v0 = vor.u32 %v7390_v53, %v5780_v52 }
 0x12d   :  { %3698 = vmatpush.bf16.msrb.mxu3 %v5845_v51  ;;  %v3434_v51 = vadd.f32 %v3433_v46, %v3421_v34  ;;  %v3422_v63 = vpop.f32.mrf.mxu1  ;;  %v5636_v1 = vld [vmem:[%s11352_s1 + $0x628] sm:$0xf]  ;;  %v7354_v2 = vld [vmem:[%s11352_s1 + $0x634] sm:$0xf0] }
 0x12e   :  { %3660 = vmatpush.bf16.msrb.mxu0 %v5445_v56  ;;  %v3409_v56 = vpop.f32.mrf.mxu0  ;;  %v5764_v3 = vld [vmem:[%s11352_s1 + $0x728] sm:$0xf]  ;;  %v7386_v4 = vld [vmem:[%s11352_s1 + $0x734] sm:$0xf0] }
 0x12f   :  { %3673 = vmatpush.bf16.msrb.mxu1 %v5573_v58  ;;  %v9825_v55 = vadd.f32 %v3446_v62, %v3434_v51  ;;  %v5653_v58 = vor.u32 %v7358_v50, %v5652_v49  ;;  %v7286_v7 = vld [vmem:[%s11352_s1 + $0x414] sm:$0xf0]  ;;  %v5492_v10 = vld [vmem:[%s11352_s1 + $0x508] sm:$0xf]  ;;  %v5765_v15 = vor.u32 %v7386_v4, %v5764_v3 }
 0x130   :  { %3686 = vmatpush.bf16.msrb.mxu2 %v5701_v59  ;;  %v5380_v59 = vld [vmem:[%s11352_s1 + $0x428] sm:$0xf]  ;;  %v7318_v11 = vld [vmem:[%s11352_s1 + $0x514] sm:$0xf0] }
 0x131   :  { %3699 = vmatpush.bf16.msrb.mxu3 %v5829_v13  ;;  %v7322_v13 = vld [vmem:[%s11352_s1 + $0x534] sm:$0xf0]  ;;  %v5381_v5 = vor.u32 %v7290_v60, %v5380_v59  ;;  %v5620_v12 = vld [vmem:[%s11352_s1 + $0x608] sm:$0xf]  ;;  %v5493_v16 = vor.u32 %v7318_v11, %v5492_v10 }
 0x132   :  { %3661 = vmatpush.bf16.msrb.mxu0 %v5429_v6  ;;  %v5364_v6 = vld [vmem:[%s11352_s1 + $0x408] sm:$0xf]  ;;  %v7382_v24 = vld [vmem:[%s11352_s1 + $0x714] sm:$0xf0] }
 0x133   :  { %3674 = vmatpush.bf16.msrb.mxu1 %v5557_v8  ;;  %v5509_v8 = vor.u32 %v7322_v13, %v5508_v61  ;;  %v3435_v14 = vpop.f32.mrf.mxu2  ;;  %v5748_v21 = vld [vmem:[%s11352_s1 + $0x708] sm:$0xf]  ;;  %v3448_v26 = vpop.f32.mrf.mxu3  ;;  %v7442_v32 = vld [vmem:[%s11352_s1 + $0x8f4] sm:$0xf0] }
 0x134   :  { %3687 = vmatpush.bf16.msrb.mxu2 %v5685_v9  ;;  %v5637_v9 = vor.u32 %v7354_v2, %v5636_v1  ;;  %v5988_v27 = vld [vmem:[%s11352_s1 + $0x8e8] sm:$0xf]  ;;  %v7506_v43 = vld [vmem:[%s11352_s1 + $0xaf4] sm:$0xf0]  ;;  %v5749_v48 = vor.u32 %v7382_v24, %v5748_v21 }
 0x135   :  { %3700 = vmatpush.bf16.msrb.mxu3 %v5813_v17  ;;  %v7350_v17 = vld [vmem:[%s11352_s1 + $0x614] sm:$0xf0]  ;;  %v6116_v34 = vld [vmem:[%s11352_s1 + $0x9e8] sm:$0xf]  ;;  %v5989_v49 = vor.u32 %v7442_v32, %v5988_v27 }
 0x136   :  { %3662 = vmatpush.bf16.msrb.mxu0 %v5413_v36  ;;  %v5365_v36 = vor.u32 %v7286_v7, %v5364_v6  ;;  %v5621_v45 = vor.u32 %v7350_v17, %v5620_v12  ;;  %v6372_v46 = vld [vmem:[%s11352_s1 + $0xbe8] sm:$0xf]  ;;  %v7438_v52 = vld [vmem:[%s11352_s1 + $0x8d4] sm:$0xf0] }
 0x137   :  { %3675 = vmatpush.bf16.msrb.mxu1 %v5541_v37  ;;  %v7474_v37 = vld [vmem:[%s11352_s1 + $0x9f4] sm:$0xf0]  ;;  %v5972_v62 = vld [vmem:[%s11352_s1 + $0x8c8] sm:$0xf] }
 0x138   :  { %3688 = vmatpush.bf16.msrb.mxu2 %v5669_v39  ;;  %v6244_v39 = vld [vmem:[%s11352_s1 + $0xae8] sm:$0xf]  ;;  %v6117_v50 = vor.u32 %v7474_v37, %v6116_v34  ;;  %v7470_v56 = vld [vmem:[%s11352_s1 + $0x9d4] sm:$0xf0]  ;;  %v5973_v61 = vor.u32 %v7438_v52, %v5972_v62 }
 0x139   :  { %3701 = vmatpush.bf16.msrb.mxu3 %v5797_v47  ;;  %v7538_v47 = vld [vmem:[%s11352_s1 + $0xbf4] sm:$0xf0]  ;;  %v6245_v51 = vor.u32 %v7506_v43, %v6244_v39  ;;  %v6100_v53 = vld [vmem:[%s11352_s1 + $0x9c8] sm:$0xf] }
 0x13a   :  { %3663 = vmatpush.bf16.msrb.mxu0 %v5397_v54  ;;  %v6373_v54 = vor.u32 %v7538_v47, %v6372_v46  ;;  %v6356_v59 = vld [vmem:[%s11352_s1 + $0xbc8] sm:$0xf]  ;;  %v7534_v60 = vld [vmem:[%s11352_s1 + $0xbd4] sm:$0xf0]  ;;  %v6101_v63 = vor.u32 %v7470_v56, %v6100_v53 }
 0x13b   :  { %3676 = vmatpush.bf16.msrb.mxu1 %v5525_v57  ;;  %v6228_v57 = vld [vmem:[%s11352_s1 + $0xac8] sm:$0xf]  ;;  %v7434_v1 = vld [vmem:[%s11352_s1 + $0x8b4] sm:$0xf0]  ;;  %v6357_v3 = vor.u32 %v7534_v60, %v6356_v59 }
 0x13c   :  { %3689 = vmatpush.bf16.msrb.mxu2 %v5653_v58  ;;  %v7502_v58 = vld [vmem:[%s11352_s1 + $0xad4] sm:$0xf0]  ;;  %v5956_v13 = vld [vmem:[%s11352_s1 + $0x8a8] sm:$0xf] }
 0x13d   :  { %3702 = vmatpush.bf16.msrb.mxu3 %v5781_v0  ;;  %v6229_v0 = vor.u32 %v7502_v58, %v6228_v57  ;;  %v6084_v2 = vld [vmem:[%s11352_s1 + $0x9a8] sm:$0xf]  ;;  %v7466_v4 = vld [vmem:[%s11352_s1 + $0x9b4] sm:$0xf0] }
 0x13e   :  { %3664 = vmatpush.bf16.msrb.mxu0 %v5381_v5  ;;  %v6212_v5 = vld [vmem:[%s11352_s1 + $0xaa8] sm:$0xf]  ;;  %v7498_v6 = vld [vmem:[%s11352_s1 + $0xab4] sm:$0xf0]  ;;  %v6085_v10 = vor.u32 %v7466_v4, %v6084_v2 }
 0x13f   :  { %3677 = vmatpush.bf16.msrb.mxu1 %v5509_v8  ;;  %v6340_v7 = vld [vmem:[%s11352_s1 + $0xba8] sm:$0xf]  ;;  %v7530_v8 = vld [vmem:[%s11352_s1 + $0xbb4] sm:$0xf0]  ;;  %v6213_v11 = vor.u32 %v7498_v6, %v6212_v5 }
 0x140   :  { %3690 = vmatpush.bf16.msrb.mxu2 %v5637_v9  ;;  %v5957_v9 = vor.u32 %v7434_v1, %v5956_v13  ;;  %v5940_v12 = vld [vmem:[%s11352_s1 + $0x888] sm:$0xf]  ;;  %v7430_v14 = vld [vmem:[%s11352_s1 + $0x894] sm:$0xf0]  ;;  %v6341_v17 = vor.u32 %v7530_v8, %v6340_v7 }
 0x141   :  { %3703 = vmatpush.bf16.msrb.mxu3 %v5765_v15  ;;  %v6068_v15 = vld [vmem:[%s11352_s1 + $0x988] sm:$0xf]  ;;  %v7462_v21 = vld [vmem:[%s11352_s1 + $0x994] sm:$0xf0]  ;;  %v5941_v34 = vor.u32 %v7430_v14, %v5940_v12 }
 0x142   :  { %3665 = vmatpush.bf16.msrb.mxu0 %v5365_v36  ;;  %v6196_v24 = vld [vmem:[%s11352_s1 + $0xa88] sm:$0xf]  ;;  %v7494_v26 = vld [vmem:[%s11352_s1 + $0xa94] sm:$0xf0]  ;;  %v3459_v36 = vpop.f32.mrf.mxu0  ;;  %v6069_v37 = vor.u32 %v7462_v21, %v6068_v15 }
 0x143   :  { %3678 = vmatpush.bf16.msrb.mxu1 %v5493_v16  ;;  %v6324_v27 = vld [vmem:[%s11352_s1 + $0xb88] sm:$0xf]  ;;  %v7526_v32 = vld [vmem:[%s11352_s1 + $0xb94] sm:$0xf0]  ;;  %v6197_v39 = vor.u32 %v7494_v26, %v6196_v24  ;;  %v3460_v46 = vadd.f32 %v3459_v36, %v9825_v55  ;;  %v3472_v47 = vpop.f32.mrf.mxu1 }
 0x144   :  { %3691 = vmatpush.bf16.msrb.mxu2 %v5621_v45  ;;  %v5924_v43 = vld [vmem:[%s11352_s1 + $0x868] sm:$0xf]  ;;  %v7426_v16 = vld [vmem:[%s11352_s1 + $0x874] sm:$0xf0] }
 0x145   :  { %3704 = vmatpush.bf16.msrb.mxu3 %v5749_v48  ;;  %3666 = vmatmul.bf16.vlgmr.msrb.gmra.mxu0 %v8302_v41  ;;  %v6052_v45 = vld [vmem:[%s11352_s1 + $0x968] sm:$0xf]  ;;  %v6325_v48 = vor.u32 %v7526_v32, %v6324_v27  ;;  %v7522_v55 = vld [vmem:[%s11352_s1 + $0xb74] sm:$0xf0]  ;;  %v3473_v52 = vadd.f32 %v3472_v47, %v3460_v46  ;;  %v5925_v53 = vor.u32 %v7426_v16, %v5924_v43 }
 0x146   :  { %3710 = vmatpush.bf16.msra.mxu0 %v5989_v49  ;;  %3679 = vmatmul.bf16.vlgmr.msrb.gmra.mxu1 %v8306_v44  ;;  %v7458_v49 = vld [vmem:[%s11352_s1 + $0x974] sm:$0xf0]  ;;  %v6308_v62 = vld [vmem:[%s11352_s1 + $0xb68] sm:$0xf] }
 0x147   :  { %3723 = vmatpush.bf16.msra.mxu1 %v6117_v50  ;;  %3692 = vmatmul.bf16.vlgmr.msrb.gmra.mxu2 %v8294_v38  ;;  %v6180_v50 = vld [vmem:[%s11352_s1 + $0xa68] sm:$0xf]  ;;  %v7422_v58 = vld [vmem:[%s11352_s1 + $0x854] sm:$0xf0] }
 0x148   :  { %3736 = vmatpush.bf16.msra.mxu2 %v6245_v51  ;;  %3705 = vmatmul.bf16.vlgmr.msrb.gmra.mxu3 %v8304_v42  ;;  %v7490_v51 = vld [vmem:[%s11352_s1 + $0xa74] sm:$0xf0]  ;;  %v5908_v57 = vld [vmem:[%s11352_s1 + $0x848] sm:$0xf] }
 0x149   :  { %3749 = vmatpush.bf16.msra.mxu3 %v6373_v54  ;;  %v6053_v54 = vor.u32 %v7458_v49, %v6052_v45  ;;  %v6181_v56 = vor.u32 %v7490_v51, %v6180_v50  ;;  %v6036_v59 = vld [vmem:[%s11352_s1 + $0x948] sm:$0xf]  ;;  %v7486_v13 = vld [vmem:[%s11352_s1 + $0xa54] sm:$0xf0]  ;;  %v5909_v5 = vor.u32 %v7422_v58, %v5908_v57 }
 0x14a   :  { %3711 = vmatpush.bf16.msra.mxu0 %v5973_v61  ;;  %v3485_v60 = vpop.f32.mrf.mxu2  ;;  %v6309_v61 = vor.u32 %v7522_v55, %v6308_v62  ;;  %v7518_v4 = vld [vmem:[%s11352_s1 + $0xb54] sm:$0xf0]  ;;  %v3461_v7 = vpop.f32.mrf.mxu0  ;;  %v6020_v12 = vld [vmem:[%s11352_s1 + $0x928] sm:$0xf] }
 0x14b   :  { %3724 = vmatpush.bf16.msra.mxu1 %v6101_v63  ;;  %v7454_v63 = vld [vmem:[%s11352_s1 + $0x954] sm:$0xf0]  ;;  %v3486_v1 = vadd.f32 %v3485_v60, %v3473_v52  ;;  %v3498_v2 = vpop.f32.mrf.mxu3  ;;  %v3474_v14 = vpop.f32.mrf.mxu1  ;;  %v6148_v21 = vld [vmem:[%s11352_s1 + $0xa28] sm:$0xf] }
 0x14c   :  { %3737 = vmatpush.bf16.msra.mxu2 %v6229_v0  ;;  %v6164_v0 = vld [vmem:[%s11352_s1 + $0xa48] sm:$0xf]  ;;  %v6037_v8 = vor.u32 %v7454_v63, %v6036_v59  ;;  %v7482_v24 = vld [vmem:[%s11352_s1 + $0xa34] sm:$0xf0] }
 0x14d   :  { %3750 = vmatpush.bf16.msra.mxu3 %v6357_v3  ;;  %v6292_v3 = vld [vmem:[%s11352_s1 + $0xb48] sm:$0xf]  ;;  %v10024_v6 = vadd.f32 %v3498_v2, %v3486_v1  ;;  %v7514_v27 = vld [vmem:[%s11352_s1 + $0xb34] sm:$0xf0] }
 0x14e   :  { %3712 = vmatpush.bf16.msra.mxu0 %v5957_v9  ;;  %v6165_v9 = vor.u32 %v7486_v13, %v6164_v0  ;;  %v6293_v15 = vor.u32 %v7518_v4, %v6292_v3  ;;  %v6276_v26 = vld [vmem:[%s11352_s1 + $0xb28] sm:$0xf]  ;;  %v7414_v36 = vld [vmem:[%s11352_s1 + $0x814] sm:$0xf0] }
 0x14f   :  { %3725 = vmatpush.bf16.msra.mxu1 %v6085_v10  ;;  %v5892_v10 = vld [vmem:[%s11352_s1 + $0x828] sm:$0xf]  ;;  %v7446_v16 = vld [vmem:[%s11352_s1 + $0x914] sm:$0xf0]  ;;  %v6277_v47 = vor.u32 %v7514_v27, %v6276_v26 }
 0x150   :  { %3738 = vmatpush.bf16.msra.mxu2 %v6213_v11  ;;  %v7418_v11 = vld [vmem:[%s11352_s1 + $0x834] sm:$0xf0]  ;;  %v6004_v43 = vld [vmem:[%s11352_s1 + $0x908] sm:$0xf] }
 0x151   :  { %3751 = vmatpush.bf16.msra.mxu3 %v6341_v17  ;;  %v7450_v17 = vld [vmem:[%s11352_s1 + $0x934] sm:$0xf0]  ;;  %v5893_v32 = vor.u32 %v7418_v11, %v5892_v10  ;;  %v6132_v45 = vld [vmem:[%s11352_s1 + $0xa08] sm:$0xf]  ;;  %v6005_v58 = vor.u32 %v7446_v16, %v6004_v43 }
 0x152   :  { %3713 = vmatpush.bf16.msra.mxu0 %v5941_v34  ;;  %v5876_v34 = vld [vmem:[%s11352_s1 + $0x808] sm:$0xf]  ;;  %v3487_v46 = vpop.f32.mrf.mxu2  ;;  %v7510_v50 = vld [vmem:[%s11352_s1 + $0xb14] sm:$0xf0] }
 0x153   :  { %3726 = vmatpush.bf16.msra.mxu1 %v6069_v37  ;;  %v6021_v37 = vor.u32 %v7450_v17, %v6020_v12  ;;  %v6260_v49 = vld [vmem:[%s11352_s1 + $0xb08] sm:$0xf]  ;;  %v3500_v51 = vpop.f32.mrf.mxu3  ;;  %v7570_v55 = vld [vmem:[%s11352_s1 + $0xcf4] sm:$0xf0] }
 0x154   :  { %3739 = vmatpush.bf16.msra.mxu2 %v6197_v39  ;;  %v6149_v39 = vor.u32 %v7482_v24, %v6148_v21  ;;  %v6500_v62 = vld [vmem:[%s11352_s1 + $0xce8] sm:$0xf]  ;;  %v7634_v57 = vld [vmem:[%s11352_s1 + $0xef4] sm:$0xf0]  ;;  %v6261_v63 = vor.u32 %v7510_v50, %v6260_v49 }
 0x155   :  { %3752 = vmatpush.bf16.msra.mxu3 %v6325_v48  ;;  %v7478_v48 = vld [vmem:[%s11352_s1 + $0xa14] sm:$0xf0]  ;;  %v6628_v52 = vld [vmem:[%s11352_s1 + $0xde8] sm:$0xf]  ;;  %v6501_v0 = vor.u32 %v7570_v55, %v6500_v62 }
 0x156   :  { %3714 = vmatpush.bf16.msra.mxu0 %v5925_v53  ;;  %v5877_v53 = vor.u32 %v7414_v36, %v5876_v34  ;;  %v6133_v59 = vor.u32 %v7478_v48, %v6132_v45  ;;  %v6884_v60 = vld [vmem:[%s11352_s1 + $0xfe8] sm:$0xf]  ;;  %v7566_v3 = vld [vmem:[%s11352_s1 + $0xcd4] sm:$0xf0] }
 0x157   :  { %3727 = vmatpush.bf16.msra.mxu1 %v6053_v54  ;;  %v7602_v54 = vld [vmem:[%s11352_s1 + $0xdf4] sm:$0xf0]  ;;  %v6484_v2 = vld [vmem:[%s11352_s1 + $0xcc8] sm:$0xf] }
 0x158   :  { %3740 = vmatpush.bf16.msra.mxu2 %v6181_v56  ;;  %v6756_v56 = vld [vmem:[%s11352_s1 + $0xee8] sm:$0xf]  ;;  %v6629_v13 = vor.u32 %v7602_v54, %v6628_v52  ;;  %v7598_v7 = vld [vmem:[%s11352_s1 + $0xdd4] sm:$0xf0]  ;;  %v6485_v12 = vor.u32 %v7566_v3, %v6484_v2 }
 0x159   :  { %3753 = vmatpush.bf16.msra.mxu3 %v6309_v61  ;;  %v7666_v61 = vld [vmem:[%s11352_s1 + $0xff4] sm:$0xf0]  ;;  %v6757_v1 = vor.u32 %v7634_v57, %v6756_v56  ;;  %v6612_v4 = vld [vmem:[%s11352_s1 + $0xdc8] sm:$0xf] }
 0x15a   :  { %3715 = vmatpush.bf16.msra.mxu0 %v5909_v5  ;;  %v6885_v5 = vor.u32 %v7666_v61, %v6884_v60  ;;  %v6868_v10 = vld [vmem:[%s11352_s1 + $0xfc8] sm:$0xf]  ;;  %v7662_v11 = vld [vmem:[%s11352_s1 + $0xfd4] sm:$0xf0]  ;;  %v6613_v14 = vor.u32 %v7598_v7, %v6612_v4 }
 0x15b   :  { %3728 = vmatpush.bf16.msra.mxu1 %v6037_v8  ;;  %v6740_v8 = vld [vmem:[%s11352_s1 + $0xec8] sm:$0xf]  ;;  %v7562_v21 = vld [vmem:[%s11352_s1 + $0xcb4] sm:$0xf0]  ;;  %v6869_v26 = vor.u32 %v7662_v11, %v6868_v10 }
 0x15c   :  { %3741 = vmatpush.bf16.msra.mxu2 %v6165_v9  ;;  %v7630_v9 = vld [vmem:[%s11352_s1 + $0xed4] sm:$0xf0]  ;;  %v6468_v17 = vld [vmem:[%s11352_s1 + $0xca8] sm:$0xf] }
 0x15d   :  { %3754 = vmatpush.bf16.msra.mxu3 %v6293_v15  ;;  %v6741_v15 = vor.u32 %v7630_v9, %v6740_v8  ;;  %v6596_v24 = vld [vmem:[%s11352_s1 + $0xda8] sm:$0xf]  ;;  %v7594_v27 = vld [vmem:[%s11352_s1 + $0xdb4] sm:$0xf0] }
 0x15e   :  { %3716 = vmatpush.bf16.msra.mxu0 %v5893_v32  ;;  %v6724_v32 = vld [vmem:[%s11352_s1 + $0xea8] sm:$0xf]  ;;  %v7626_v34 = vld [vmem:[%s11352_s1 + $0xeb4] sm:$0xf0]  ;;  %v6597_v43 = vor.u32 %v7594_v27, %v6596_v24 }
 0x15f   :  { %3729 = vmatpush.bf16.msra.mxu1 %v6021_v37  ;;  %v6852_v36 = vld [vmem:[%s11352_s1 + $0xfa8] sm:$0xf]  ;;  %v7658_v37 = vld [vmem:[%s11352_s1 + $0xfb4] sm:$0xf0]  ;;  %v6725_v16 = vor.u32 %v7626_v34, %v6724_v32 }
 0x160   :  { %3742 = vmatpush.bf16.msra.mxu2 %v6149_v39  ;;  %v6469_v39 = vor.u32 %v7562_v21, %v6468_v17  ;;  %v6452_v45 = vld [vmem:[%s11352_s1 + $0xc88] sm:$0xf]  ;;  %v7558_v46 = vld [vmem:[%s11352_s1 + $0xc94] sm:$0xf0]  ;;  %v6853_v48 = vor.u32 %v7658_v37, %v6852_v36 }
 0x161   :  { %3755 = vmatpush.bf16.msra.mxu3 %v6277_v47  ;;  %v6580_v47 = vld [vmem:[%s11352_s1 + $0xd88] sm:$0xf]  ;;  %v7590_v49 = vld [vmem:[%s11352_s1 + $0xd94] sm:$0xf0]  ;;  %v6453_v54 = vor.u32 %v7558_v46, %v6452_v45 }
 0x162   :  { %3717 = vmatpush.bf16.msra.mxu0 %v5877_v53  ;;  %v6708_v50 = vld [vmem:[%s11352_s1 + $0xe88] sm:$0xf]  ;;  %v7622_v51 = vld [vmem:[%s11352_s1 + $0xe94] sm:$0xf0]  ;;  %v3511_v62 = vpop.f32.mrf.mxu0  ;;  %v6581_v57 = vor.u32 %v7590_v49, %v6580_v47 }
 0x163   :  { %3730 = vmatpush.bf16.msra.mxu1 %v6005_v58  ;;  %v6836_v55 = vld [vmem:[%s11352_s1 + $0xf88] sm:$0xf]  ;;  %v7654_v52 = vld [vmem:[%s11352_s1 + $0xf94] sm:$0xf0]  ;;  %v3512_v53 = vadd.f32 %v3511_v62, %v10024_v6  ;;  %v3524_v56 = vpop.f32.mrf.mxu1  ;;  %v6709_v58 = vor.u32 %v7622_v51, %v6708_v50 }
 0x164   :  { %3743 = vmatpush.bf16.msra.mxu2 %v6133_v59  ;;  %v6436_v59 = vld [vmem:[%s11352_s1 + $0xc68] sm:$0xf]  ;;  %v7554_v60 = vld [vmem:[%s11352_s1 + $0xc74] sm:$0xf0]  ;;  %v6837_v6 = vor.u32 %v7654_v52, %v6836_v55 }
 0x165   :  { %3756 = vmatpush.bf16.msra.mxu3 %v6261_v63  ;;  %3718 = vmatmul.bf16.vlgmr.msra.gmra.mxu0 %v8495_v25  ;;  %v6564_v61 = vld [vmem:[%s11352_s1 + $0xd68] sm:$0xf]  ;;  %v3525_v63 = vadd.f32 %v3524_v56, %v3512_v53  ;;  %v7650_v3 = vld [vmem:[%s11352_s1 + $0xf74] sm:$0xf0]  ;;  %v6437_v4 = vor.u32 %v7554_v60, %v6436_v59 }
 0x166   :  { %3762 = vmatpush.bf16.msrb.mxu0 %v6501_v0  ;;  %3731 = vmatmul.bf16.vlgmr.msra.gmra.mxu1 %v8508_v30  ;;  %v7586_v0 = vld [vmem:[%s11352_s1 + $0xd74] sm:$0xf0]  ;;  %v6820_v2 = vld [vmem:[%s11352_s1 + $0xf68] sm:$0xf] }
 0x167   :  { %3775 = vmatpush.bf16.msrb.mxu1 %v6629_v13  ;;  %3744 = vmatmul.bf16.vlgmr.msra.gmra.mxu2 %v8506_v29  ;;  %v6692_v13 = vld [vmem:[%s11352_s1 + $0xe68] sm:$0xf]  ;;  %v7550_v9 = vld [vmem:[%s11352_s1 + $0xc54] sm:$0xf0]  ;;  %v6821_v11 = vor.u32 %v7650_v3, %v6820_v2  ;;  %v7216_v2 = vld [vmem:[%s11352_s1 + $0x1ec] sm:$0xf] }
 0x168   :  { %3788 = vmatpush.bf16.msrb.mxu2 %v6757_v1  ;;  %3757 = vmatmul.bf16.vlgmr.msra.gmra.mxu3 %v8516_v33  ;;  %v7618_v1 = vld [vmem:[%s11352_s1 + $0xe74] sm:$0xf0]  ;;  %v6420_v8 = vld [vmem:[%s11352_s1 + $0xc48] sm:$0xf] }
 0x169   :  { %3801 = vmatpush.bf16.msrb.mxu3 %v6885_v5  ;;  %v6565_v5 = vor.u32 %v7586_v0, %v6564_v61  ;;  %v6693_v7 = vor.u32 %v7618_v1, %v6692_v13  ;;  %v6548_v10 = vld [vmem:[%s11352_s1 + $0xd48] sm:$0xf]  ;;  %v7614_v17 = vld [vmem:[%s11352_s1 + $0xe54] sm:$0xf0]  ;;  %v6421_v34 = vor.u32 %v7550_v9, %v6420_v8  ;;  %v7184_v13 = vld [vmem:[%s11352_s1 + $0xec] sm:$0xf] }
 0x16a   :  { %3763 = vmatpush.bf16.msrb.mxu0 %v6485_v12  ;;  %v3537_v12 = vpop.f32.mrf.mxu2  ;;  %v7646_v27 = vld [vmem:[%s11352_s1 + $0xf54] sm:$0xf0]  ;;  %v3513_v32 = vpop.f32.mrf.mxu0  ;;  %v6532_v46 = vld [vmem:[%s11352_s1 + $0xd28] sm:$0xf]  ;;  %v4966_v1 = vld [vmem:[%s11352_s1 + $0xf8] sm:$0xf0] }
 0x16b   :  { %3776 = vmatpush.bf16.msrb.mxu1 %v6613_v14  ;;  %v7582_v14 = vld [vmem:[%s11352_s1 + $0xd54] sm:$0xf0]  ;;  %v3538_v21 = vadd.f32 %v3537_v12, %v3525_v63  ;;  %v3550_v24 = vpop.f32.mrf.mxu3  ;;  %v3526_v36 = vpop.f32.mrf.mxu1  ;;  %v6660_v49 = vld [vmem:[%s11352_s1 + $0xe28] sm:$0xf]  ;;  %v5222_v8 = vld [vmem:[%s11352_s1 + $0x2f8] sm:$0xf0] }
 0x16c   :  { %3789 = vmatpush.bf16.msrb.mxu2 %v6741_v15  ;;  %v6676_v15 = vld [vmem:[%s11352_s1 + $0xe48] sm:$0xf]  ;;  %v7546_v45 = vld [vmem:[%s11352_s1 + $0xc34] sm:$0xf0]  ;;  %v5350_v12 = vld [vmem:[%s11352_s1 + $0x3f8] sm:$0xf0] }
 0x16d   :  { %3802 = vmatpush.bf16.msrb.mxu3 %v6869_v26  ;;  %v6804_v26 = vld [vmem:[%s11352_s1 + $0xf48] sm:$0xf]  ;;  %v10223_v37 = vadd.f32 %v3550_v24, %v3538_v21  ;;  %v7610_v50 = vld [vmem:[%s11352_s1 + $0xe34] sm:$0xf0]  ;;  %v7180_v24 = vld [vmem:[%s11352_s1 + $0xcc] sm:$0xf] }
 0x16e   :  { %3764 = vmatpush.bf16.msrb.mxu0 %v6469_v39  ;;  %v6549_v39 = vor.u32 %v7582_v14, %v6548_v10  ;;  %v6805_v47 = vor.u32 %v7646_v27, %v6804_v26  ;;  %v6788_v51 = vld [vmem:[%s11352_s1 + $0xf28] sm:$0xf]  ;;  %v7642_v62 = vld [vmem:[%s11352_s1 + $0xf34] sm:$0xf0]  ;;  %v6661_v56 = vor.u32 %v7610_v50, %v6660_v49  ;;  %v4950_v26 = vld [vmem:[%s11352_s1 + $0xd8] sm:$0xf0] }
 0x16f   :  { %3777 = vmatpush.bf16.msrb.mxu1 %v6597_v43  ;;  %v6677_v43 = vor.u32 %v7614_v17, %v6676_v15  ;;  %v6388_v52 = vld [vmem:[%s11352_s1 + $0xc08] sm:$0xf]  ;;  %v7542_v53 = vld [vmem:[%s11352_s1 + $0xc14] sm:$0xf0]  ;;  %v6789_v60 = vor.u32 %v7642_v62, %v6788_v51  ;;  %v4969_v15 = vor.u32 %v7184_v13, %v4966_v1  ;;  %v7212_v27 = vld [vmem:[%s11352_s1 + $0x1cc] sm:$0xf] }
 0x170   :  { %3790 = vmatpush.bf16.msrb.mxu2 %v6725_v16  ;;  %v6404_v16 = vld [vmem:[%s11352_s1 + $0xc28] sm:$0xf]  ;;  %v7606_v61 = vld [vmem:[%s11352_s1 + $0xe14] sm:$0xf0]  ;;  %v7244_v36 = vld [vmem:[%s11352_s1 + $0x2cc] sm:$0xf] }
 0x171   :  { %3803 = vmatpush.bf16.msrb.mxu3 %v6853_v48  ;;  %v7578_v48 = vld [vmem:[%s11352_s1 + $0xd34] sm:$0xf0]  ;;  %v6405_v55 = vor.u32 %v7546_v45, %v6404_v16  ;;  %v6644_v59 = vld [vmem:[%s11352_s1 + $0xe08] sm:$0xf]  ;;  %v5334_v16 = vld [vmem:[%s11352_s1 + $0x3d8] sm:$0xf0]  ;;  %v4953_v45 = vor.u32 %v7180_v24, %v4950_v26 }
 0x172   :  { %3765 = vmatpush.bf16.msrb.mxu0 %v6453_v54  ;;  %v6533_v54 = vor.u32 %v7578_v48, %v6532_v46  ;;  %v7638_v63 = vld [vmem:[%s11352_s1 + $0xf14] sm:$0xf0]  ;;  %v3539_v0 = vpop.f32.mrf.mxu2  ;;  %v6645_v10 = vor.u32 %v7606_v61, %v6644_v59  ;;  %v7176_v48 = vld [vmem:[%s11352_s1 + $0xac] sm:$0xf]  ;;  %v4934_v49 = vld [vmem:[%s11352_s1 + $0xb8] sm:$0xf0] }
 0x173   :  { %3778 = vmatpush.bf16.msrb.mxu1 %v6581_v57  ;;  %v6516_v57 = vld [vmem:[%s11352_s1 + $0xd08] sm:$0xf]  ;;  %v3552_v3 = vpop.f32.mrf.mxu3  ;;  %v7208_v50 = vld [vmem:[%s11352_s1 + $0x1ac] sm:$0xf]  ;;  %v5062_v62 = vld [vmem:[%s11352_s1 + $0x1b8] sm:$0xf0] }
 0x174   :  { %3791 = vmatpush.bf16.msrb.mxu2 %v6709_v58  ;;  %v7574_v58 = vld [vmem:[%s11352_s1 + $0xd14] sm:$0xf0]  ;;  %v7172_v59 = vld [vmem:[%s11352_s1 + $0x8c] sm:$0xf]  ;;  %v5174_v13 = vld [vmem:[%s11352_s1 + $0x298] sm:$0xf0] }
 0x175   :  { %3804 = vmatpush.bf16.msrb.mxu3 %v6837_v6  ;;  %v6772_v6 = vld [vmem:[%s11352_s1 + $0xf08] sm:$0xf]  ;;  %v6517_v9 = vor.u32 %v7574_v58, %v6516_v57  ;;  %v5065_v57 = vor.u32 %v7208_v50, %v5062_v62  ;;  %v7204_v61 = vld [vmem:[%s11352_s1 + $0x18c] sm:$0xf]  ;;  %v5302_v3 = vld [vmem:[%s11352_s1 + $0x398] sm:$0xf0] }
 0x176   :  { %3766 = vmatpush.bf16.msrb.mxu0 %v6437_v4  ;;  %v6389_v4 = vor.u32 %v7542_v53, %v6388_v52  ;;  %v6773_v14 = vor.u32 %v7638_v63, %v6772_v6  ;;  %v5190_v52 = vld [vmem:[%s11352_s1 + $0x2b8] sm:$0xf0]  ;;  %v7272_v53 = vld [vmem:[%s11352_s1 + $0x3ac] sm:$0xf] }
 0x177   :  { %3779 = vmatpush.bf16.msrb.mxu1 %v6565_v5  ;;  %v5094_v5 = vld [vmem:[%s11352_s1 + $0x1f8] sm:$0xf0]  ;;  %v7236_v0 = vld [vmem:[%s11352_s1 + $0x28c] sm:$0xf] }
 0x178   :  { %3792 = vmatpush.bf16.msrb.mxu2 %v6693_v7  ;;  %v7248_v7 = vld [vmem:[%s11352_s1 + $0x2ec] sm:$0xf]  ;;  %v5097_v17 = vor.u32 %v7216_v2, %v5094_v5  ;;  %v5046_v63 = vld [vmem:[%s11352_s1 + $0x198] sm:$0xf0] }
 0x179   :  { %3805 = vmatpush.bf16.msrb.mxu3 %v6821_v11  ;;  %v7280_v11 = vld [vmem:[%s11352_s1 + $0x3ec] sm:$0xf]  ;;  %v5225_v21 = vor.u32 %v7248_v7, %v5222_v8  ;;  %v5049_v8 = vor.u32 %v7204_v61, %v5046_v63  ;;  %v5286_v26 = vld [vmem:[%s11352_s1 + $0x378] sm:$0xf0] }
 0x17a   :  { %3767 = vmatpush.bf16.msrb.mxu0 %v6421_v34  ;;  %v5353_v32 = vor.u32 %v7280_v11, %v5350_v12  ;;  %v5078_v34 = vld [vmem:[%s11352_s1 + $0x1d8] sm:$0xf0]  ;;  %v7268_v2 = vld [vmem:[%s11352_s1 + $0x38c] sm:$0xf] }
 0x17b   :  { %3780 = vmatpush.bf16.msrb.mxu1 %v6549_v39  ;;  %v5206_v39 = vld [vmem:[%s11352_s1 + $0x2d8] sm:$0xf0]  ;;  %v5081_v46 = vor.u32 %v7212_v27, %v5078_v34  ;;  %v7200_v12 = vld [vmem:[%s11352_s1 + $0x16c] sm:$0xf] }
 0x17c   :  { %3793 = vmatpush.bf16.msrb.mxu2 %v6677_v43  ;;  %v7276_v43 = vld [vmem:[%s11352_s1 + $0x3cc] sm:$0xf]  ;;  %v4902_v11 = vld [vmem:[%s11352_s1 + $0x78] sm:$0xf0] }
 0x17d   :  { %3806 = vmatpush.bf16.msrb.mxu3 %v6805_v47  ;;  %v5209_v47 = vor.u32 %v7244_v36, %v5206_v39  ;;  %v5337_v51 = vor.u32 %v7276_v43, %v5334_v16  ;;  %v7264_v24 = vld [vmem:[%s11352_s1 + $0x36c] sm:$0xf]  ;;  %v4886_v39 = vld [vmem:[%s11352_s1 + $0x58] sm:$0xf0] }
 0x17e   :  { %3768 = vmatpush.bf16.msrb.mxu0 %v6405_v55  ;;  %v7240_v55 = vld [vmem:[%s11352_s1 + $0x2ac] sm:$0xf]  ;;  %v5289_v16 = vor.u32 %v7264_v24, %v5286_v26  ;;  %v5270_v62 = vld [vmem:[%s11352_s1 + $0x358] sm:$0xf0] }
 0x17f   :  { %3781 = vmatpush.bf16.msrb.mxu1 %v6533_v54  ;;  %v5318_v54 = vld [vmem:[%s11352_s1 + $0x3b8] sm:$0xf0]  ;;  %v5193_v58 = vor.u32 %v7240_v55, %v5190_v52  ;;  %v7164_v36 = vld [vmem:[%s11352_s1 + $0x4c] sm:$0xf] }
 0x180   :  { %3794 = vmatpush.bf16.msrb.mxu2 %v6661_v56  ;;  %v4937_v56 = vor.u32 %v7176_v48, %v4934_v49  ;;  %v5321_v6 = vor.u32 %v7272_v53, %v5318_v54  ;;  %v7196_v43 = vld [vmem:[%s11352_s1 + $0x14c] sm:$0xf]  ;;  %v5142_v48 = vld [vmem:[%s11352_s1 + $0x258] sm:$0xf0]  ;;  %v4889_v52 = vor.u32 %v7164_v36, %v4886_v39 }
 0x181   :  { %3807 = vmatpush.bf16.msrb.mxu3 %v6789_v60  ;;  %v4918_v60 = vld [vmem:[%s11352_s1 + $0x98] sm:$0xf0]  ;;  %v7224_v63 = vld [vmem:[%s11352_s1 + $0x22c] sm:$0xf] }
 0x182   :  { %3769 = vmatpush.bf16.msrb.mxu0 %v6389_v4  ;;  %v3563_v1 = vpop.f32.mrf.mxu0  ;;  %v4921_v5 = vor.u32 %v7172_v59, %v4918_v60  ;;  %v4870_v59 = vld [vmem:[%s11352_s1 + $0x38] sm:$0xf0]  ;;  %v7192_v60 = vld [vmem:[%s11352_s1 + $0x12c] sm:$0xf] }
 0x183   :  { %3782 = vmatpush.bf16.msrb.mxu1 %v6517_v9  ;;  %v3564_v4 = vadd.f32 %v3563_v1, %v10223_v37  ;;  %v3576_v7 = vpop.f32.mrf.mxu1  ;;  %v5177_v9 = vor.u32 %v7236_v0, %v5174_v13  ;;  %v5305_v37 = vor.u32 %v7268_v2, %v5302_v3  ;;  %v5126_v0 = vld [vmem:[%s11352_s1 + $0x238] sm:$0xf0]  ;;  %v7256_v13 = vld [vmem:[%s11352_s1 + $0x32c] sm:$0xf] }
 0x184   :  { %3795 = vmatpush.bf16.msrb.mxu2 %v6645_v10  ;;  %v7168_v10 = vld [vmem:[%s11352_s1 + $0x6c] sm:$0xf]  ;;  %v5254_v1 = vld [vmem:[%s11352_s1 + $0x338] sm:$0xf0] }
 0x185   :  { %3808 = vmatpush.bf16.msrb.mxu3 %v6773_v14  ;;  %3770 = vmatmul.bf16.vlgmr.msrb.gmra.mxu0 %v8705_v23  ;;  %v3577_v14 = vadd.f32 %v3576_v7, %v3564_v4  ;;  %v4905_v27 = vor.u32 %v7168_v10, %v4902_v11  ;;  %v7156_v3 = vld [vmem:[%s11352_s1 + $0xc] sm:$0xf]  ;;  %v4854_v4 = vld [vmem:[%s11352_s1 + $0x18] sm:$0xf0]  ;;  %v5129_v7 = vor.u32 %v7224_v63, %v5126_v0 }
 0x186   :  { %3814 = vmatpush.bf16.msra.mxu0 %v4969_v15  ;;  %3783 = vmatmul.bf16.vlgmr.msrb.gmra.mxu1 %v8718_v31  ;;  %v5030_v15 = vld [vmem:[%s11352_s1 + $0x178] sm:$0xf0]  ;;  %v7220_v10 = vld [vmem:[%s11352_s1 + $0x20c] sm:$0xf]  ;;  %v5257_v11 = vor.u32 %v7256_v13, %v5254_v1 }
 0x187   :  { %3827 = vmatpush.bf16.msra.mxu1 %v5097_v17  ;;  %3796 = vmatmul.bf16.vlgmr.msrb.gmra.mxu2 %v8716_v28  ;;  %v7232_v17 = vld [vmem:[%s11352_s1 + $0x26c] sm:$0xf]  ;;  %v5734_v36 = vld [vmem:[%s11352_s1 + $0x6f8] sm:$0xf0] }
 0x188   :  { %3840 = vmatpush.bf16.msra.mxu2 %v5225_v21  ;;  %3809 = vmatmul.bf16.vlgmr.msrb.gmra.mxu3 %v8726_v35  ;;  %v5158_v21 = vld [vmem:[%s11352_s1 + $0x278] sm:$0xf0]  ;;  %v7344_v24 = vld [vmem:[%s11352_s1 + $0x5ec] sm:$0xf] }
 0x189   :  { %3853 = vmatpush.bf16.msra.mxu3 %v5353_v32  ;;  %v5033_v32 = vor.u32 %v7200_v12, %v5030_v15  ;;  %v5161_v34 = vor.u32 %v7232_v17, %v5158_v21  ;;  %v5110_v12 = vld [vmem:[%s11352_s1 + $0x218] sm:$0xf0]  ;;  %v7312_v17 = vld [vmem:[%s11352_s1 + $0x4ec] sm:$0xf] }
 0x18a   :  { %3815 = vmatpush.bf16.msra.mxu0 %v4953_v45  ;;  %v3589_v45 = vpop.f32.mrf.mxu2  ;;  %v3565_v55 = vpop.f32.mrf.mxu0  ;;  %v5478_v21 = vld [vmem:[%s11352_s1 + $0x4f8] sm:$0xf0]  ;;  %v7336_v0 = vld [vmem:[%s11352_s1 + $0x5ac] sm:$0xf] }
 0x18b   :  { %3828 = vmatpush.bf16.msra.mxu1 %v5081_v46  ;;  %v5014_v46 = vld [vmem:[%s11352_s1 + $0x158] sm:$0xf0]  ;;  %v3590_v49 = vadd.f32 %v3589_v45, %v3577_v14  ;;  %v3602_v50 = vpop.f32.mrf.mxu3  ;;  %v3578_v53 = vpop.f32.mrf.mxu1 }
 0x18c   :  { %3841 = vmatpush.bf16.msra.mxu2 %v5209_v47  ;;  %v7228_v47 = vld [vmem:[%s11352_s1 + $0x24c] sm:$0xf]  ;;  %v5238_v14 = vld [vmem:[%s11352_s1 + $0x318] sm:$0xf0] }
 0x18d   :  { %3854 = vmatpush.bf16.msra.mxu3 %v5337_v51  ;;  %v7260_v51 = vld [vmem:[%s11352_s1 + $0x34c] sm:$0xf]  ;;  %v10422_v54 = vadd.f32 %v3602_v50, %v3590_v49  ;;  %v5862_v45 = vld [vmem:[%s11352_s1 + $0x7f8] sm:$0xf0] }
 0x18e   :  { %3816 = vmatpush.bf16.msra.mxu0 %v4937_v56  ;;  %v5017_v56 = vor.u32 %v7196_v43, %v5014_v46  ;;  %v5273_v61 = vor.u32 %v7260_v51, %v5270_v62  ;;  %v5113_v43 = vor.u32 %v7220_v10, %v5110_v12  ;;  %v7308_v50 = vld [vmem:[%s11352_s1 + $0x4cc] sm:$0xf]  ;;  %v5462_v51 = vld [vmem:[%s11352_s1 + $0x4d8] sm:$0xf0] }
 0x18f   :  { %3829 = vmatpush.bf16.msra.mxu1 %v5065_v57  ;;  %v5145_v57 = vor.u32 %v7228_v47, %v5142_v48  ;;  %v5481_v47 = vor.u32 %v7312_v17, %v5478_v21  ;;  %v7340_v62 = vld [vmem:[%s11352_s1 + $0x5cc] sm:$0xf]  ;;  %v5446_v63 = vld [vmem:[%s11352_s1 + $0x4b8] sm:$0xf0] }
 0x190   :  { %3842 = vmatpush.bf16.msra.mxu2 %v5193_v58  ;;  %v7160_v58 = vld [vmem:[%s11352_s1 + $0x2c] sm:$0xf]  ;;  %v5574_v1 = vld [vmem:[%s11352_s1 + $0x5b8] sm:$0xf0] }
 0x191   :  { %3855 = vmatpush.bf16.msra.mxu3 %v5321_v6  ;;  %v4998_v6 = vld [vmem:[%s11352_s1 + $0x138] sm:$0xf0]  ;;  %v4873_v2 = vor.u32 %v7160_v58, %v4870_v59  ;;  %v7372_v53 = vld [vmem:[%s11352_s1 + $0x6cc] sm:$0xf]  ;;  %v5465_v59 = vor.u32 %v7308_v50, %v5462_v51 }
 0x192   :  { %3817 = vmatpush.bf16.msra.mxu0 %v4921_v5  ;;  %v5001_v5 = vor.u32 %v7192_v60, %v4998_v6  ;;  %v3591_v15 = vpop.f32.mrf.mxu2  ;;  %v5846_v58 = vld [vmem:[%s11352_s1 + $0x7d8] sm:$0xf0]  ;;  %v7304_v6 = vld [vmem:[%s11352_s1 + $0x4ac] sm:$0xf] }
 0x193   :  { %3830 = vmatpush.bf16.msra.mxu1 %v5049_v8  ;;  %v7188_v8 = vld [vmem:[%s11352_s1 + $0x10c] sm:$0xf]  ;;  %v3604_v26 = vpop.f32.mrf.mxu3  ;;  %v5430_v10 = vld [vmem:[%s11352_s1 + $0x498] sm:$0xf0] }
 0x194   :  { %3843 = vmatpush.bf16.msra.mxu2 %v5177_v9  ;;  %v4982_v9 = vld [vmem:[%s11352_s1 + $0x118] sm:$0xf0]  ;;  %v7396_v15 = vld [vmem:[%s11352_s1 + $0x78c] sm:$0xf] }
 0x195   :  { %3856 = vmatpush.bf16.msra.mxu3 %v5305_v37  ;;  %v7252_v37 = vld [vmem:[%s11352_s1 + $0x30c] sm:$0xf]  ;;  %v4985_v39 = vor.u32 %v7188_v8, %v4982_v9  ;;  %v5558_v12 = vld [vmem:[%s11352_s1 + $0x598] sm:$0xf0] }
 0x196   :  { %3818 = vmatpush.bf16.msra.mxu0 %v4905_v27  ;;  %v4857_v27 = vor.u32 %v7156_v3, %v4854_v4  ;;  %v5241_v46 = vor.u32 %v7252_v37, %v5238_v14  ;;  %v5702_v3 = vld [vmem:[%s11352_s1 + $0x6b8] sm:$0xf0]  ;;  %v7400_v4 = vld [vmem:[%s11352_s1 + $0x7ac] sm:$0xf] }
 0x197   :  { %3831 = vmatpush.bf16.msra.mxu1 %v5033_v32  ;;  %v5606_v32 = vld [vmem:[%s11352_s1 + $0x5f8] sm:$0xf0]  ;;  %v7300_v8 = vld [vmem:[%s11352_s1 + $0x48c] sm:$0xf] }
 0x198   :  { %3844 = vmatpush.bf16.msra.mxu2 %v5161_v34  ;;  %v7376_v34 = vld [vmem:[%s11352_s1 + $0x6ec] sm:$0xf]  ;;  %v5609_v48 = vor.u32 %v7344_v24, %v5606_v32  ;;  %v5686_v14 = vld [vmem:[%s11352_s1 + $0x698] sm:$0xf0]  ;;  %v5433_v21 = vor.u32 %v7300_v8, %v5430_v10 }
 0x199   :  { %3857 = vmatpush.bf16.msra.mxu3 %v5289_v16  ;;  %v7408_v16 = vld [vmem:[%s11352_s1 + $0x7ec] sm:$0xf]  ;;  %v5737_v49 = vor.u32 %v7376_v34, %v5734_v36  ;;  %v5814_v17 = vld [vmem:[%s11352_s1 + $0x798] sm:$0xf0] }
 0x19a   :  { %3819 = vmatpush.bf16.msra.mxu0 %v4889_v52  ;;  %v5865_v55 = vor.u32 %v7408_v16, %v5862_v45  ;;  %v5590_v52 = vld [vmem:[%s11352_s1 + $0x5d8] sm:$0xf0]  ;;  %v7364_v37 = vld [vmem:[%s11352_s1 + $0x68c] sm:$0xf]  ;;  %v5817_v16 = vor.u32 %v7396_v15, %v5814_v17 }
 0x19b   :  { %3832 = vmatpush.bf16.msra.mxu1 %v5017_v56  ;;  %v5718_v56 = vld [vmem:[%s11352_s1 + $0x6d8] sm:$0xf0]  ;;  %v5593_v60 = vor.u32 %v7340_v62, %v5590_v52  ;;  %v7296_v32 = vld [vmem:[%s11352_s1 + $0x46c] sm:$0xf] }
 0x19c   :  { %3845 = vmatpush.bf16.msra.mxu2 %v5145_v57  ;;  %v7404_v57 = vld [vmem:[%s11352_s1 + $0x7cc] sm:$0xf]  ;;  %v5414_v34 = vld [vmem:[%s11352_s1 + $0x478] sm:$0xf0] }
 0x19d   :  { %3858 = vmatpush.bf16.msra.mxu3 %v5273_v61  ;;  %v5721_v61 = vor.u32 %v7372_v53, %v5718_v56  ;;  %v5849_v13 = vor.u32 %v7404_v57, %v5846_v58  ;;  %v7328_v36 = vld [vmem:[%s11352_s1 + $0x56c] sm:$0xf]  ;;  %v5542_v45 = vld [vmem:[%s11352_s1 + $0x578] sm:$0xf0]  ;;  %v5417_v51 = vor.u32 %v7296_v32, %v5414_v34 }
 0x19e   :  { %3820 = vmatpush.bf16.msra.mxu0 %v4873_v2  ;;  %v7368_v2 = vld [vmem:[%s11352_s1 + $0x6ac] sm:$0xf]  ;;  %v5545_v62 = vor.u32 %v7328_v36, %v5542_v45  ;;  %v5398_v53 = vld [vmem:[%s11352_s1 + $0x458] sm:$0xf0] }
 0x19f   :  { %3833 = vmatpush.bf16.msra.mxu1 %v5001_v5  ;;  %v5830_v5 = vld [vmem:[%s11352_s1 + $0x7b8] sm:$0xf0]  ;;  %v5705_v9 = vor.u32 %v7368_v2, %v5702_v3  ;;  %v7292_v52 = vld [vmem:[%s11352_s1 + $0x44c] sm:$0xf] }
 0x1a0   :  { %3846 = vmatpush.bf16.msra.mxu2 %v5129_v7  ;;  %v5449_v7 = vor.u32 %v7304_v6, %v5446_v63  ;;  %v7324_v56 = vld [vmem:[%s11352_s1 + $0x54c] sm:$0xf]  ;;  %v5382_v8 = vld [vmem:[%s11352_s1 + $0x438] sm:$0xf0] }
 0x1a1   :  { %3859 = vmatpush.bf16.msra.mxu3 %v5257_v11  ;;  %v7284_v15 = vld [vmem:[%s11352_s1 + $0x40c] sm:$0xf]  ;;  %v5366_v17 = vld [vmem:[%s11352_s1 + $0x418] sm:$0xf0] }
 0x1a2   :  { %3821 = vmatpush.bf16.msra.mxu0 %v4857_v27  ;;  %v3615_v24 = vpop.f32.mrf.mxu0  ;;  %v5689_v27 = vor.u32 %v7364_v37, %v5686_v14  ;;  %v5766_v37 = vld [vmem:[%s11352_s1 + $0x738] sm:$0xf0]  ;;  %v7348_v32 = vld [vmem:[%s11352_s1 + $0x60c] sm:$0xf] }
 0x1a3   :  { %3834 = vmatpush.bf16.msra.mxu1 %v4985_v39 }
 0x1a4   :  { %3847 = vmatpush.bf16.msra.mxu2 %v5113_v43  ;;  %v3628_v43 = vpop.f32.mrf.mxu1 }
 0x1a5   :  { %3860 = vmatpush.bf16.msra.mxu3 %v5241_v46  ;;  %3822 = vmatmul.bf16.vlgmr.msra.gmra.mxu0 %v8140_v19  ;;  %v7332_v19 = vld [vmem:[%s11352_s1 + $0x58c] sm:$0xf] }
 0x1a6   :  { %3866 = vmatpush.bf16.msrb.mxu0 %v5481_v47  ;;  %3835 = vmatmul.bf16.vlgmr.msra.gmra.mxu1 %v8144_v22  ;;  %v5833_v22 = vor.u32 %v7400_v4, %v5830_v5  ;;  %v5561_v26 = vor.u32 %v7332_v19, %v5558_v12  ;;  %v7360_v46 = vld [vmem:[%s11352_s1 + $0x66c] sm:$0xf]  ;;  %v5670_v47 = vld [vmem:[%s11352_s1 + $0x678] sm:$0xf0] }
 0x1a7   :  { %3879 = vmatpush.bf16.msrb.mxu1 %v5609_v48  ;;  %3848 = vmatmul.bf16.vlgmr.msra.gmra.mxu2 %v8138_v18  ;;  %v5577_v18 = vor.u32 %v7336_v0, %v5574_v1  ;;  %v7392_v48 = vld [vmem:[%s11352_s1 + $0x76c] sm:$0xf]  ;;  %v5401_v1 = vor.u32 %v7292_v52, %v5398_v53  ;;  %v5510_v19 = vld [vmem:[%s11352_s1 + $0x538] sm:$0xf0] }
 0x1a8   :  { %3892 = vmatpush.bf16.msrb.mxu2 %v5737_v49  ;;  %3861 = vmatmul.bf16.vlgmr.msra.gmra.mxu3 %v8142_v20  ;;  %v10560_v20 = vld [vmem:[%s11354_s2] sm:$0xf]  ;;  %v5798_v49 = vld [vmem:[%s11352_s1 + $0x778] sm:$0xf0]  ;;  %v7388_v0 = vld [vmem:[%s11352_s1 + $0x74c] sm:$0xf] }
 0x1a9   :  { %3905 = vmatpush.bf16.msrb.mxu3 %v5865_v55  ;;  %v568_v11 = vperm.slane %v10560_v20, 2  ;;  %v5673_v55 = vor.u32 %v7360_v46, %v5670_v47  ;;  %v5801_v58 = vor.u32 %v7392_v48, %v5798_v49  ;;  %v7384_v12 = vld [vmem:[%s11352_s1 + $0x72c] sm:$0xf]  ;;  %v5990_v47 = vld [vmem:[%s11352_s1 + $0x8f8] sm:$0xf0]  ;;  %v5369_v49 = vor.u32 %v7284_v15, %v5366_v17 }
 0x1aa   :  { %3867 = vmatpush.bf16.msrb.mxu0 %v5465_v59  ;;  %v3641_v57 = vpop.f32.mrf.mxu2  ;;  %v5526_v59 = vld [vmem:[%s11352_s1 + $0x558] sm:$0xf0]  ;;  %v3617_v3 = vpop.f32.mrf.mxu0  ;;  %v5769_v36 = vor.u32 %v7384_v12, %v5766_v37  ;;  %v7440_v46 = vld [vmem:[%s11352_s1 + $0x8ec] sm:$0xf] }
 0x1ab   :  { %3880 = vmatpush.bf16.msrb.mxu1 %v5593_v60  ;;  %v3616_v39 = vadd.f32 %v3615_v24, %v568_v11  ;;  %v7356_v60 = vld [vmem:[%s11352_s1 + $0x64c] sm:$0xf]  ;;  %v3654_v63 = vpop.f32.mrf.mxu3  ;;  %v5529_v4 = vor.u32 %v7324_v56, %v5526_v59  ;;  %v6374_v56 = vld [vmem:[%s11352_s1 + $0xbf8] sm:$0xf0] }
 0x1ac   :  { %3893 = vmatpush.bf16.msrb.mxu2 %v5721_v61  ;;  %v5654_v61 = vld [vmem:[%s11352_s1 + $0x658] sm:$0xf0]  ;;  %v7352_v11 = vld [vmem:[%s11352_s1 + $0x62c] sm:$0xf] }
 0x1ad   :  { %3906 = vmatpush.bf16.msrb.mxu3 %v5849_v13  ;;  %v3629_v50 = vadd.f32 %v3628_v43, %v3616_v39  ;;  %v5782_v13 = vld [vmem:[%s11352_s1 + $0x758] sm:$0xf0]  ;;  %v5657_v5 = vor.u32 %v7356_v60, %v5654_v61  ;;  %v7380_v43 = vld [vmem:[%s11352_s1 + $0x70c] sm:$0xf] }
 0x1ae   :  { %3868 = vmatpush.bf16.msrb.mxu0 %v5449_v7  ;;  %v7288_v7 = vld [vmem:[%s11352_s1 + $0x42c] sm:$0xf]  ;;  %v5785_v10 = vor.u32 %v7388_v0, %v5782_v13  ;;  %v5622_v39 = vld [vmem:[%s11352_s1 + $0x618] sm:$0xf0] }
 0x1af   :  { %3881 = vmatpush.bf16.msrb.mxu1 %v5577_v18  ;;  %v3642_v6 = vadd.f32 %v3641_v57, %v3629_v50  ;;  %v7320_v18 = vld [vmem:[%s11352_s1 + $0x52c] sm:$0xf]  ;;  %v5385_v14 = vor.u32 %v7288_v7, %v5382_v8  ;;  %v6118_v50 = vld [vmem:[%s11352_s1 + $0x9f8] sm:$0xf0]  ;;  %v5625_v52 = vor.u32 %v7348_v32, %v5622_v39 }
 0x1b0   :  { %3894 = vmatpush.bf16.msrb.mxu2 %v5705_v9  ;;  %v3630_v9 = vpop.f32.mrf.mxu1  ;;  %v7472_v48 = vld [vmem:[%s11352_s1 + $0x9ec] sm:$0xf]  ;;  %v6102_v13 = vld [vmem:[%s11352_s1 + $0x9d8] sm:$0xf0] }
 0x1b1   :  { %3907 = vmatpush.bf16.msrb.mxu3 %v5833_v22  ;;  %v10626_v2 = vadd.f32 %v3654_v63, %v3642_v6  ;;  %v5638_v22 = vld [vmem:[%s11352_s1 + $0x638] sm:$0xf0]  ;;  %v7536_v53 = vld [vmem:[%s11352_s1 + $0xbec] sm:$0xf]  ;;  %v6121_v59 = vor.u32 %v7472_v48, %v6118_v50 }
 0x1b2   :  { %3869 = vmatpush.bf16.msrb.mxu0 %v5433_v21  ;;  %v5513_v21 = vor.u32 %v7320_v18, %v5510_v19  ;;  %v5641_v24 = vor.u32 %v7352_v11, %v5638_v22  ;;  %v3643_v34 = vpop.f32.mrf.mxu2  ;;  %v7436_v61 = vld [vmem:[%s11352_s1 + $0x8cc] sm:$0xf]  ;;  %v5974_v6 = vld [vmem:[%s11352_s1 + $0x8d8] sm:$0xf0]  ;;  %v6377_v0 = vor.u32 %v7536_v53, %v6374_v56 }
 0x1b3   :  { %3882 = vmatpush.bf16.msrb.mxu1 %v5561_v26  ;;  %v7316_v26 = vld [vmem:[%s11352_s1 + $0x50c] sm:$0xf]  ;;  %v3656_v45 = vpop.f32.mrf.mxu3  ;;  %v6230_v3 = vld [vmem:[%s11352_s1 + $0xad8] sm:$0xf0]  ;;  %v5977_v7 = vor.u32 %v7436_v61, %v5974_v6 }
 0x1b4   :  { %3895 = vmatpush.bf16.msrb.mxu2 %v5689_v27  ;;  %v5494_v27 = vld [vmem:[%s11352_s1 + $0x518] sm:$0xf0]  ;;  %v7468_v63 = vld [vmem:[%s11352_s1 + $0x9cc] sm:$0xf] }
 0x1b5   :  { %3908 = vmatpush.bf16.msrb.mxu3 %v5817_v16  ;;  %v5750_v16 = vld [vmem:[%s11352_s1 + $0x718] sm:$0xf0]  ;;  %v6105_v8 = vor.u32 %v7468_v63, %v6102_v13  ;;  %v7432_v9 = vld [vmem:[%s11352_s1 + $0x8ac] sm:$0xf] }
 0x1b6   :  { %3870 = vmatpush.bf16.msrb.mxu0 %v5417_v51  ;;  %v7504_v51 = vld [vmem:[%s11352_s1 + $0xaec] sm:$0xf]  ;;  %v5753_v57 = vor.u32 %v7380_v43, %v5750_v16  ;;  %v6086_v22 = vld [vmem:[%s11352_s1 + $0x9b8] sm:$0xf0] }
 0x1b7   :  { %3883 = vmatpush.bf16.msrb.mxu1 %v5545_v62  ;;  %v6246_v62 = vld [vmem:[%s11352_s1 + $0xaf8] sm:$0xf0]  ;;  %v7464_v19 = vld [vmem:[%s11352_s1 + $0x9ac] sm:$0xf] }
 0x1b8   :  { %3896 = vmatpush.bf16.msrb.mxu2 %v5673_v55  ;;  %v5497_v55 = vor.u32 %v7316_v26, %v5494_v27  ;;  %v6249_v60 = vor.u32 %v7504_v51, %v6246_v62  ;;  %v7496_v12 = vld [vmem:[%s11352_s1 + $0xaac] sm:$0xf]  ;;  %v6214_v37 = vld [vmem:[%s11352_s1 + $0xab8] sm:$0xf0]  ;;  %v6089_v17 = vor.u32 %v7464_v19, %v6086_v22 }
 0x1b9   :  { %3909 = vmatpush.bf16.msrb.mxu3 %v5801_v58  ;;  %v5993_v58 = vor.u32 %v7440_v46, %v5990_v47  ;;  %v5942_v26 = vld [vmem:[%s11352_s1 + $0x898] sm:$0xf0]  ;;  %v7492_v27 = vld [vmem:[%s11352_s1 + $0xa8c] sm:$0xf] }
 0x1ba   :  { %3871 = vmatpush.bf16.msrb.mxu0 %v5401_v1  ;;  %v7500_v1 = vld [vmem:[%s11352_s1 + $0xacc] sm:$0xf]  ;;  %v6198_v32 = vld [vmem:[%s11352_s1 + $0xa98] sm:$0xf0] }
 0x1bb   :  { %3884 = vmatpush.bf16.msrb.mxu1 %v5529_v4  ;;  %v7532_v4 = vld [vmem:[%s11352_s1 + $0xbcc] sm:$0xf]  ;;  %v6233_v18 = vor.u32 %v7500_v1, %v6230_v3  ;;  %v6201_v45 = vor.u32 %v7492_v27, %v6198_v32  ;;  %v5926_v47 = vld [vmem:[%s11352_s1 + $0x878] sm:$0xf0] }
 0x1bc   :  { %3897 = vmatpush.bf16.msrb.mxu2 %v5657_v5  ;;  %v6358_v5 = vld [vmem:[%s11352_s1 + $0xbd8] sm:$0xf0]  ;;  %v7524_v34 = vld [vmem:[%s11352_s1 + $0xb8c] sm:$0xf] }
 0x1bd   :  { %3910 = vmatpush.bf16.msrb.mxu3 %v5785_v10  ;;  %v5958_v10 = vld [vmem:[%s11352_s1 + $0x8b8] sm:$0xf0]  ;;  %v6361_v11 = vor.u32 %v7532_v4, %v6358_v5  ;;  %v7424_v46 = vld [vmem:[%s11352_s1 + $0x86c] sm:$0xf] }
 0x1be   :  { %3872 = vmatpush.bf16.msrb.mxu0 %v5385_v14  ;;  %v7528_v14 = vld [vmem:[%s11352_s1 + $0xbac] sm:$0xf]  ;;  %v5961_v15 = vor.u32 %v7432_v9, %v5958_v10  ;;  %v6054_v51 = vld [vmem:[%s11352_s1 + $0x978] sm:$0xf0]  ;;  %v5929_v56 = vor.u32 %v7424_v46, %v5926_v47 }
 0x1bf   :  { %3885 = vmatpush.bf16.msrb.mxu1 %v5513_v21  ;;  %v6217_v21 = vor.u32 %v7496_v12, %v6214_v37  ;;  %v7456_v48 = vld [vmem:[%s11352_s1 + $0x96c] sm:$0xf]  ;;  %v6310_v53 = vld [vmem:[%s11352_s1 + $0xb78] sm:$0xf0] }
 0x1c0   :  { %3898 = vmatpush.bf16.msrb.mxu2 %v5641_v24  ;;  %v7428_v24 = vld [vmem:[%s11352_s1 + $0x88c] sm:$0xf]  ;;  %v6166_v1 = vld [vmem:[%s11352_s1 + $0xa58] sm:$0xf0] }
 0x1c1   :  { %3911 = vmatpush.bf16.msrb.mxu3 %v5769_v36  ;;  %v6326_v36 = vld [vmem:[%s11352_s1 + $0xb98] sm:$0xf0]  ;;  %v5945_v39 = vor.u32 %v7428_v24, %v5942_v26  ;;  %v7488_v62 = vld [vmem:[%s11352_s1 + $0xa6c] sm:$0xf] }
 0x1c2   :  { %3873 = vmatpush.bf16.msrb.mxu0 %v5369_v49  ;;  %v10776_v43 = vpop.f32.mrf.mxu0  ;;  %v6329_v50 = vor.u32 %v7524_v34, %v6326_v36  ;;  %v7452_v61 = vld [vmem:[%s11352_s1 + $0x94c] sm:$0xf]  ;;  %v6294_v5 = vld [vmem:[%s11352_s1 + $0xb58] sm:$0xf0] }
 0x1c3   :  { %3886 = vmatpush.bf16.msrb.mxu1 %v5497_v55  ;;  %v10787_v49 = vpop.f32.mrf.mxu1  ;;  %v6182_v55 = vld [vmem:[%s11352_s1 + $0xa78] sm:$0xf0]  ;;  %v7484_v13 = vld [vmem:[%s11352_s1 + $0xa4c] sm:$0xf] }
 0x1c4   :  { %3899 = vmatpush.bf16.msrb.mxu2 %v5625_v52  ;;  %v7520_v52 = vld [vmem:[%s11352_s1 + $0xb6c] sm:$0xf]  ;;  %v6169_v9 = vor.u32 %v7484_v13, %v6166_v1  ;;  %v5894_v19 = vld [vmem:[%s11352_s1 + $0x838] sm:$0xf0] }
 0x1c5   :  { %3912 = vmatpush.bf16.msrb.mxu3 %v5753_v57  ;;  %3874 = vmatmul.bf16.vlgmr.msrb.gmra.mxu0 %v8302_v41  ;;  %v7460_v41 = vld [vmem:[%s11352_s1 + $0x98c] sm:$0xf]  ;;  %v6057_v57 = vor.u32 %v7456_v48, %v6054_v51  ;;  %v6313_v63 = vor.u32 %v7520_v52, %v6310_v53  ;;  %v6022_v37 = vld [vmem:[%s11352_s1 + $0x938] sm:$0xf0] }
 0x1c6   :  { %3918 = vmatpush.bf16.msra.mxu0 %v5993_v58  ;;  %3887 = vmatmul.bf16.vlgmr.msrb.gmra.mxu1 %v8306_v44  ;;  %v6070_v44 = vld [vmem:[%s11352_s1 + $0x998] sm:$0xf0]  ;;  %v6185_v58 = vor.u32 %v7488_v62, %v6182_v55  ;;  %v7516_v4 = vld [vmem:[%s11352_s1 + $0xb4c] sm:$0xf] }
 0x1c7   :  { %3931 = vmatpush.bf16.msra.mxu1 %v6121_v59  ;;  %3900 = vmatmul.bf16.vlgmr.msrb.gmra.mxu2 %v8294_v38  ;;  %v6342_v38 = vld [vmem:[%s11352_s1 + $0xbb8] sm:$0xf0]  ;;  %v6073_v16 = vor.u32 %v7460_v41, %v6070_v44  ;;  %v7420_v59 = vld [vmem:[%s11352_s1 + $0x84c] sm:$0xf]  ;;  %v6297_v12 = vor.u32 %v7516_v4, %v6294_v5 }
 0x1c8   :  { %3944 = vmatpush.bf16.msra.mxu2 %v6249_v60  ;;  %3913 = vmatmul.bf16.vlgmr.msrb.gmra.mxu3 %v8304_v42  ;;  %v6345_v42 = vor.u32 %v7528_v14, %v6342_v38  ;;  %v5910_v60 = vld [vmem:[%s11352_s1 + $0x858] sm:$0xf0]  ;;  %v7416_v10 = vld [vmem:[%s11352_s1 + $0x82c] sm:$0xf] }
 0x1c9   :  { %3957 = vmatpush.bf16.msra.mxu3 %v6377_v0  ;;  %v6038_v0 = vld [vmem:[%s11352_s1 + $0x958] sm:$0xf0]  ;;  %v7480_v14 = vld [vmem:[%s11352_s1 + $0xa2c] sm:$0xf] }
 0x1ca   :  { %3919 = vmatpush.bf16.msra.mxu0 %v5977_v7  ;;  %v10813_v6 = vpop.f32.mrf.mxu2  ;;  %v5913_v7 = vor.u32 %v7420_v59, %v5910_v60  ;;  %v6150_v38 = vld [vmem:[%s11352_s1 + $0xa38] sm:$0xf0]  ;;  %v7412_v24 = vld [vmem:[%s11352_s1 + $0x80c] sm:$0xf] }
 0x1cb   :  { %3932 = vmatpush.bf16.msra.mxu1 %v6105_v8  ;;  %v10824_v3 = vpop.f32.mrf.mxu3  ;;  %v3669_v8 = vpop.f32.mrf.mxu0  ;;  %v5878_v26 = vld [vmem:[%s11352_s1 + $0x818] sm:$0xf0]  ;;  %v7444_v44 = vld [vmem:[%s11352_s1 + $0x90c] sm:$0xf] }
 0x1cc   :  { %3945 = vmatpush.bf16.msra.mxu2 %v6233_v18  ;;  %v6041_v18 = vor.u32 %v7452_v61, %v6038_v0  ;;  %v3682_v22 = vpop.f32.mrf.mxu1  ;;  %v6006_v27 = vld [vmem:[%s11352_s1 + $0x918] sm:$0xf0]  ;;  %v7476_v32 = vld [vmem:[%s11352_s1 + $0xa0c] sm:$0xf]  ;;  %v5881_v51 = vor.u32 %v7412_v24, %v5878_v26 }
 0x1cd   :  { %3958 = vmatpush.bf16.msra.mxu3 %v6361_v11  ;;  %v7448_v11 = vld [vmem:[%s11352_s1 + $0x92c] sm:$0xf]  ;;  %v6502_v48 = vld [vmem:[%s11352_s1 + $0xcf8] sm:$0xf0]  ;;  %v6009_v53 = vor.u32 %v7444_v44, %v6006_v27 }
 0x1ce   :  { %3920 = vmatpush.bf16.msra.mxu0 %v5961_v15  ;;  %v7512_v15 = vld [vmem:[%s11352_s1 + $0xb2c] sm:$0xf]  ;;  %v6025_v41 = vor.u32 %v7448_v11, %v6022_v37  ;;  %v6630_v62 = vld [vmem:[%s11352_s1 + $0xdf8] sm:$0xf0] }
 0x1cf   :  { %3933 = vmatpush.bf16.msra.mxu1 %v6089_v17  ;;  %v6278_v17 = vld [vmem:[%s11352_s1 + $0xb38] sm:$0xf0]  ;;  %v7568_v47 = vld [vmem:[%s11352_s1 + $0xcec] sm:$0xf] }
 0x1d0   :  { %3946 = vmatpush.bf16.msra.mxu2 %v6217_v21  ;;  %v5897_v21 = vor.u32 %v7416_v10, %v5894_v19  ;;  %v6281_v36 = vor.u32 %v7512_v15, %v6278_v17  ;;  %v7632_v55 = vld [vmem:[%s11352_s1 + $0xeec] sm:$0xf]  ;;  %v6758_v52 = vld [vmem:[%s11352_s1 + $0xef8] sm:$0xf0]  ;;  %v6505_v60 = vor.u32 %v7568_v47, %v6502_v48 }
 0x1d1   :  { %3959 = vmatpush.bf16.msra.mxu3 %v6345_v42  ;;  %v6153_v42 = vor.u32 %v7480_v14, %v6150_v38  ;;  %v7564_v0 = vld [vmem:[%s11352_s1 + $0xccc] sm:$0xf]  ;;  %v6486_v13 = vld [vmem:[%s11352_s1 + $0xcd8] sm:$0xf0] }
 0x1d2   :  { %3921 = vmatpush.bf16.msra.mxu0 %v5945_v39  ;;  %v3695_v34 = vpop.f32.mrf.mxu2  ;;  %v6134_v39 = vld [vmem:[%s11352_s1 + $0xa18] sm:$0xf0]  ;;  %v7596_v1 = vld [vmem:[%s11352_s1 + $0xdcc] sm:$0xf]  ;;  %v6489_v10 = vor.u32 %v7564_v0, %v6486_v13 }
 0x1d3   :  { %3934 = vmatpush.bf16.msra.mxu1 %v6073_v16  ;;  %v7508_v16 = vld [vmem:[%s11352_s1 + $0xb0c] sm:$0xf]  ;;  %v3708_v46 = vpop.f32.mrf.mxu3  ;;  %v6614_v5 = vld [vmem:[%s11352_s1 + $0xdd8] sm:$0xf0] }
 0x1d4   :  { %3947 = vmatpush.bf16.msra.mxu2 %v6201_v45  ;;  %v6262_v45 = vld [vmem:[%s11352_s1 + $0xb18] sm:$0xf0]  ;;  %v6617_v19 = vor.u32 %v7596_v1, %v6614_v5  ;;  %v7560_v22 = vld [vmem:[%s11352_s1 + $0xcac] sm:$0xf] }
 0x1d5   :  { %3960 = vmatpush.bf16.msra.mxu3 %v6329_v50  ;;  %v7600_v50 = vld [vmem:[%s11352_s1 + $0xdec] sm:$0xf]  ;;  %v6265_v59 = vor.u32 %v7508_v16, %v6262_v45  ;;  %v6742_v8 = vld [vmem:[%s11352_s1 + $0xed8] sm:$0xf0] }
 0x1d6   :  { %3922 = vmatpush.bf16.msra.mxu0 %v5929_v56  ;;  %v6137_v56 = vor.u32 %v7476_v32, %v6134_v39  ;;  %v6633_v61 = vor.u32 %v7600_v50, %v6630_v62  ;;  %v7592_v37 = vld [vmem:[%s11352_s1 + $0xdac] sm:$0xf]  ;;  %v6598_v38 = vld [vmem:[%s11352_s1 + $0xdb8] sm:$0xf0] }
 0x1d7   :  { %3935 = vmatpush.bf16.msra.mxu1 %v6057_v57  ;;  %v7664_v57 = vld [vmem:[%s11352_s1 + $0xfec] sm:$0xf]  ;;  %v6726_v17 = vld [vmem:[%s11352_s1 + $0xeb8] sm:$0xf0]  ;;  %v6601_v26 = vor.u32 %v7592_v37, %v6598_v38 }
 0x1d8   :  { %3948 = vmatpush.bf16.msra.mxu2 %v6185_v58  ;;  %v6886_v58 = vld [vmem:[%s11352_s1 + $0xff8] sm:$0xf0]  ;;  %v7624_v15 = vld [vmem:[%s11352_s1 + $0xeac] sm:$0xf] }
 0x1d9   :  { %3961 = vmatpush.bf16.msra.mxu3 %v6313_v63  ;;  %v6761_v63 = vor.u32 %v7632_v55, %v6758_v52  ;;  %v6889_v4 = vor.u32 %v7664_v57, %v6886_v58  ;;  %v6582_v44 = vld [vmem:[%s11352_s1 + $0xd98] sm:$0xf0]  ;;  %v7620_v27 = vld [vmem:[%s11352_s1 + $0xe8c] sm:$0xf] }
 0x1da   :  { %3923 = vmatpush.bf16.msra.mxu0 %v5913_v7  ;;  %v7628_v7 = vld [vmem:[%s11352_s1 + $0xecc] sm:$0xf]  ;;  %v6710_v32 = vld [vmem:[%s11352_s1 + $0xe98] sm:$0xf0] }
 0x1db   :  { %3936 = vmatpush.bf16.msra.mxu1 %v6041_v18  ;;  %v7660_v18 = vld [vmem:[%s11352_s1 + $0xfcc] sm:$0xf]  ;;  %v6745_v11 = vor.u32 %v7628_v7, %v6742_v8  ;;  %v6838_v39 = vld [vmem:[%s11352_s1 + $0xf98] sm:$0xf0]  ;;  %v6713_v47 = vor.u32 %v7620_v27, %v6710_v32 }
 0x1dc   :  { %3949 = vmatpush.bf16.msra.mxu2 %v6169_v9  ;;  %v6870_v9 = vld [vmem:[%s11352_s1 + $0xfd8] sm:$0xf0]  ;;  %v7552_v48 = vld [vmem:[%s11352_s1 + $0xc6c] sm:$0xf] }
 0x1dd   :  { %3962 = vmatpush.bf16.msra.mxu3 %v6297_v12  ;;  %v6470_v12 = vld [vmem:[%s11352_s1 + $0xcb8] sm:$0xf0]  ;;  %v6873_v14 = vor.u32 %v7660_v18, %v6870_v9  ;;  %v7616_v52 = vld [vmem:[%s11352_s1 + $0xe6c] sm:$0xf] }
 0x1de   :  { %3924 = vmatpush.bf16.msra.mxu0 %v5897_v21  ;;  %v6854_v21 = vld [vmem:[%s11352_s1 + $0xfb8] sm:$0xf0]  ;;  %v6473_v24 = vor.u32 %v7560_v22, %v6470_v12  ;;  %v7648_v57 = vld [vmem:[%s11352_s1 + $0xf6c] sm:$0xf] }
 0x1df   :  { %3937 = vmatpush.bf16.msra.mxu1 %v6025_v41  ;;  %v6729_v41 = vor.u32 %v7624_v15, %v6726_v17  ;;  %v6438_v50 = vld [vmem:[%s11352_s1 + $0xc78] sm:$0xf0]  ;;  %v7644_v8 = vld [vmem:[%s11352_s1 + $0xf4c] sm:$0xf] }
 0x1e0   :  { %3950 = vmatpush.bf16.msra.mxu2 %v6153_v42  ;;  %v7588_v42 = vld [vmem:[%s11352_s1 + $0xd8c] sm:$0xf]  ;;  %v6566_v55 = vld [vmem:[%s11352_s1 + $0xd78] sm:$0xf0] }
 0x1e1   :  { %3963 = vmatpush.bf16.msra.mxu3 %v6281_v36  ;;  %v7652_v36 = vld [vmem:[%s11352_s1 + $0xf8c] sm:$0xf]  ;;  %v6585_v46 = vor.u32 %v7588_v42, %v6582_v44  ;;  %v6822_v58 = vld [vmem:[%s11352_s1 + $0xf78] sm:$0xf0] }
 0x1e2   :  { %3925 = vmatpush.bf16.msra.mxu0 %v5881_v51  ;;  %v10974_v34 = vpop.f32.mrf.mxu0  ;;  %v7584_v51 = vld [vmem:[%s11352_s1 + $0xd6c] sm:$0xf]  ;;  %v6841_v62 = vor.u32 %v7652_v36, %v6838_v39  ;;  %v6422_v13 = vld [vmem:[%s11352_s1 + $0xc58] sm:$0xf0]  ;;  %v6825_v1 = vor.u32 %v7648_v57, %v6822_v58 }
 0x1e3   :  { %3938 = vmatpush.bf16.msra.mxu1 %v6009_v53  ;;  %v10982_v45 = vpop.f32.mrf.mxu1  ;;  %v6694_v53 = vld [vmem:[%s11352_s1 + $0xe78] sm:$0xf0]  ;;  %v7544_v37 = vld [vmem:[%s11352_s1 + $0xc2c] sm:$0xf] }
 0x1e4   :  { %3951 = vmatpush.bf16.msra.mxu2 %v6137_v56  ;;  %v6890_v56 = vmul.f32 -1.442695, %v9624_v40  ;;  %v6697_v0 = vor.u32 %v7616_v52, %v6694_v53  ;;  %v7548_v40 = vld [vmem:[%s11352_s1 + $0xc4c] sm:$0xf]  ;;  %v6678_v5 = vld [vmem:[%s11352_s1 + $0xe58] sm:$0xf0] }
 0x1e5   :  { %3964 = vmatpush.bf16.msra.mxu3 %v6265_v59  ;;  %3926 = vmatmul.bf16.vlgmr.msra.gmra.mxu0 %v8495_v25  ;;  %v7656_v25 = vld [vmem:[%s11352_s1 + $0xfac] sm:$0xf]  ;;  %v6891_v59 = vmul.f32 -1.442695, %v10422_v54  ;;  %v6806_v18 = vld [vmem:[%s11352_s1 + $0xf58] sm:$0xf0] }
 0x1e6   :  { %3970 = vmatpush.bf16.msrb.mxu0 %v6505_v60  ;;  %3939 = vmatmul.bf16.vlgmr.msra.gmra.mxu1 %v8508_v30  ;;  %v6454_v30 = vld [vmem:[%s11352_s1 + $0xc98] sm:$0xf0]  ;;  %v6441_v60 = vor.u32 %v7552_v48, %v6438_v50  ;;  %v7580_v54 = vld [vmem:[%s11352_s1 + $0xd4c] sm:$0xf]  ;;  %7736 = vpow2.f32 %v6890_v56  ;;  %v6809_v15 = vor.u32 %v7644_v8, %v6806_v18  ;;  %v7687_v18 = vld [vmem:[%s11355_s3 + $0xa0] sm:$0xff] }
 0x1e7   :  { %3983 = vmatpush.bf16.msrb.mxu1 %v6633_v61  ;;  %3952 = vmatmul.bf16.vlgmr.msra.gmra.mxu2 %v8506_v29  ;;  %v7556_v29 = vld [vmem:[%s11352_s1 + $0xc8c] sm:$0xf]  ;;  %v3668_v61 = vadd.f32 %v10776_v43, %v10626_v2  ;;  %v6550_v2 = vld [vmem:[%s11352_s1 + $0xd58] sm:$0xf0]  ;;  %7738 = vpow2.f32 %v6891_v59 }
 0x1e8   :  { %3996 = vmatpush.bf16.msrb.mxu2 %v6761_v63  ;;  %3965 = vmatmul.bf16.vlgmr.msra.gmra.mxu3 %v8516_v33  ;;  %v6857_v33 = vor.u32 %v7656_v25, %v6854_v21  ;;  %v6457_v16 = vor.u32 %v7556_v29, %v6454_v30  ;;  %v6569_v63 = vor.u32 %v7584_v51, %v6566_v55  ;;  %v7612_v43 = vld [vmem:[%s11352_s1 + $0xe4c] sm:$0xf]  ;;  %v6662_v25 = vld [vmem:[%s11352_s1 + $0xe38] sm:$0xf0] }
 0x1e9   :  { %4009 = vmatpush.bf16.msrb.mxu3 %v6889_v4  ;;  %v6553_v22 = vor.u32 %v7580_v54, %v6550_v2  ;;  %v6681_v12 = vor.u32 %v7612_v43, %v6678_v5  ;;  %v7576_v38 = vld [vmem:[%s11352_s1 + $0xd2c] sm:$0xf]  ;;  %v6390_v44 = vld [vmem:[%s11352_s1 + $0xc18] sm:$0xf0]  ;;  %v7671_v2 = vld [vmem:[%s11355_s3 + $0x20] sm:$0xff] }
 0x1ea   :  { %3971 = vmatpush.bf16.msrb.mxu0 %v6489_v10  ;;  %v11021_v4 = vpop.f32.mrf.mxu2  ;;  %v3721_v9 = vpop.f32.mrf.mxu0  ;;  %v6425_v10 = vor.u32 %v7548_v40, %v6422_v13  ;;  %v7608_v17 = vld [vmem:[%s11352_s1 + $0xe2c] sm:$0xf]  ;;  %v6774_v48 = vld [vmem:[%s11352_s1 + $0xf18] sm:$0xf0] }
 0x1eb   :  { %3984 = vmatpush.bf16.msrb.mxu1 %v6617_v19  ;;  %v11032_v7 = vpop.f32.mrf.mxu3  ;;  %v3734_v19 = vpop.f32.mrf.mxu1  ;;  %v7640_v21 = vld [vmem:[%s11352_s1 + $0xf2c] sm:$0xf]  ;;  %v6665_v42 = vor.u32 %v7608_v17, %v6662_v25  ;;  %v7674_v58 = vld [vmem:[%s11355_s3 + $0x38] sm:$0xff]  ;;  %v7669_v17 = vld [vmem:[%s11355_s3 + $0x10] sm:$0xff] }
 0x1ec   :  { %3997 = vmatpush.bf16.msrb.mxu2 %v6745_v11  ;;  %v3681_v11 = vadd.f32 %v10787_v49, %v3668_v61  ;;  %v6534_v49 = vld [vmem:[%s11352_s1 + $0xd38] sm:$0xf0]  ;;  %v7572_v27 = vld [vmem:[%s11352_s1 + $0xd0c] sm:$0xf] }
 0x1ed   :  { %4010 = vmatpush.bf16.msrb.mxu3 %v6873_v14  ;;  %v6406_v14 = vld [vmem:[%s11352_s1 + $0xc38] sm:$0xf0]  ;;  %v6537_v30 = vor.u32 %v7576_v38, %v6534_v49  ;;  %v7604_v39 = vld [vmem:[%s11352_s1 + $0xe0c] sm:$0xf] }
 0x1ee   :  { %3972 = vmatpush.bf16.msrb.mxu0 %v6473_v24  ;;  %v6790_v24 = vld [vmem:[%s11352_s1 + $0xf38] sm:$0xf0]  ;;  %v3694_v29 = vadd.f32 %v10813_v6, %v3681_v11 }
 0x1ef   :  { %3985 = vmatpush.bf16.msrb.mxu1 %v6601_v26  ;;  %v6409_v26 = vor.u32 %v7544_v37, %v6406_v14  ;;  %v6793_v36 = vor.u32 %v7640_v21, %v6790_v24  ;;  %v6518_v6 = vld [vmem:[%s11352_s1 + $0xd18] sm:$0xf0]  ;;  %v7677_v24 = vld [vmem:[%s11355_s3 + $0x50] sm:$0xff] }
 0x1f0   :  { %3998 = vmatpush.bf16.msrb.mxu2 %v6729_v41  ;;  %v7737_v41 = vpop.eup %7736  ;;  %v3707_v52 = vadd.f32 %v10824_v3, %v3694_v29  ;;  %v6521_v53 = vor.u32 %v7572_v27, %v6518_v6  ;;  %v7690_v3 = vld [vmem:[%s11355_s3 + $0xb8] sm:$0xff]  ;;  %v7685_v29 = vld [vmem:[%s11355_s3 + $0x90] sm:$0xff]  ;;  %v7676_v27 = vld [vmem:[%s11355_s3 + $0x48] sm:$0xff] }
 0x1f1   :  { %4011 = vmatpush.bf16.msrb.mxu3 %v6857_v33  ;;  %v7540_v33 = vld [vmem:[%s11352_s1 + $0xc0c] sm:$0xf]  ;;  %v7739_v32 = vpop.eup %7738  ;;  %v11090_v51 = vadd.f32 1.0, %v7737_v41  ;;  %v7678_v11 = vld [vmem:[%s11355_s3 + $0x58] sm:$0xff] }
 0x1f2   :  { %3973 = vmatpush.bf16.msrb.mxu0 %v6457_v16  ;;  %v6646_v16 = vld [vmem:[%s11352_s1 + $0xe18] sm:$0xf0]  ;;  %v11092_v55 = vadd.f32 1.0, %v7739_v32  ;;  %v3720_v59 = vadd.f32 %v10974_v34, %v3707_v52  ;;  %v7673_v34 = vld [vmem:[%s11355_s3 + $0x30] sm:$0xff]  ;;  %v7675_v52 = vld [vmem:[%s11355_s3 + $0x40] sm:$0xff] }
 0x1f3   :  { %3986 = vmatpush.bf16.msrb.mxu1 %v6585_v46  ;;  %v3747_v46 = vpop.f32.mrf.mxu2  ;;  %v3760_v50 = vpop.f32.mrf.mxu3  ;;  %v6649_v56 = vor.u32 %v7604_v39, %v6646_v16  ;;  %7740 = vrcp.f32 %v11090_v51  ;;  %v7686_v38 = vld [vmem:[%s11355_s3 + $0x98] sm:$0xff]  ;;  %vm4043_vm2 = vweird.f32 %v11090_v51  ;;  %v4047_v32 = vand.u32 2147483647, %v11090_v51 }
 0x1f4   :  { %3999 = vmatpush.bf16.msrb.mxu2 %v6713_v47  ;;  %v7636_v47 = vld [vmem:[%s11352_s1 + $0xf0c] sm:$0xf]  ;;  %7742 = vrcp.f32 %v11092_v55  ;;  %v3733_v61 = vadd.f32 %v10982_v45, %v3720_v59  ;;  %v7689_v45 = vld [vmem:[%s11355_s3 + $0xb0] sm:$0xff]  ;;  %vm4058_vm3 = vweird.f32 %v11092_v55  ;;  %v4062_v6 = vand.u32 2147483647, %v11092_v55 }
 0x1f5   :  { %4012 = vmatpush.bf16.msrb.mxu3 %v6841_v62  ;;  %v6393_v62 = vor.u32 %v7540_v33, %v6390_v44  ;;  %v6777_v57 = vor.u32 %v7636_v47, %v6774_v48  ;;  %v4064_v44 = vand.u32 2147483648, %v11092_v55  ;;  %v7684_v47 = vld [vmem:[%s11355_s3 + $0x88] sm:$0xff]  ;;  %vm4048_vm6 = vcmp.eq.f32.partialorder %v4047_v32, 8.507059e+37 }
 0x1f6   :  { %3974 = vmatpush.bf16.msrb.mxu0 %v6441_v60  ;;  %v7682_v60 = vld [vmem:[%s11355_s3 + $0x78] sm:$0xff]  ;;  %vm4063_vm7 = vcmp.eq.f32.partialorder %v4062_v6, 8.507059e+37  ;;  %v7696_v32 = vld [vmem:[%s11355_s3 + $0xe8] sm:$0xff] }
 0x1f7   :  { %3987 = vmatpush.bf16.msrb.mxu1 %v6569_v63  ;;  %v7681_v63 = vld [vmem:[%s11355_s3 + $0x70] sm:$0xff] }
 0x1f8   :  { %4000 = vmatpush.bf16.msrb.mxu2 %v6697_v0  ;;  %v3746_v0 = vadd.f32 %v11021_v4, %v3733_v61 }
 0x1f9   :  { %4013 = vmatpush.bf16.msrb.mxu3 %v6825_v1  ;;  %v11122_v40 = vpop.eup %7740  ;;  %v7688_v1 = vld [vmem:[%s11355_s3 + $0xa8] sm:$0xff] }
 0x1fa   :  { %3975 = vmatpush.bf16.msrb.mxu0 %v6425_v10  ;;  %v11127_v13 = vpop.eup %7742  ;;  %v7670_v10 = vld [vmem:[%s11355_s3 + $0x18] sm:$0xff]  ;;  %vm4044_vm0 = vweird.f32 %v11122_v40 }
 0x1fb   :  { %3988 = vmatpush.bf16.msrb.mxu1 %v6553_v22  ;;  %v4054_v4 = vmul.f32 %v11127_v13, %v11092_v55  ;;  %vm4059_vm1 = vweird.f32 %v11127_v13  ;;  %vm11186_vm4 = vmor %vm4043_vm2, %vm4044_vm0  ;;  %v4065_v55 = vor.u32 1.1754944e-38, %v4064_v44 }
 0x1fc   :  { %4001 = vmatpush.bf16.msrb.mxu2 %v6681_v12  ;;  %vm11194_vm5 = vmor %vm4058_vm3, %vm4059_vm1 }
 0x1fd   :  { %4014 = vmatpush.bf16.msrb.mxu3 %v6809_v15  ;;  %v4055_v9 = vsub.f32 1.0, %v4054_v4 }
 0x1fe   :  { %3976 = vmatpush.bf16.msrb.mxu0 %v6409_v26 }
 0x1ff   :  { %3989 = vmatpush.bf16.msrb.mxu1 %v6537_v30  ;;  %v4056_v49 = vmul.f32 %v11127_v13, %v4055_v9  ;;  %v4049_v30 = vand.u32 2147483648, %v11090_v51 }
 0x200   :  { %4002 = vmatpush.bf16.msrb.mxu2 %v6665_v42  ;;  %v7668_v42 = vld [vmem:[%s11355_s3 + $0x8] sm:$0xff] }
 0x201   :  { %4015 = vmatpush.bf16.msrb.mxu3 %v6793_v36  ;;  %v4057_v33 = vadd.f32 %v11127_v13, %v4056_v49  ;;  %v4050_v50 = vor.u32 1.1754944e-38, %v4049_v30 }
 0x202   :  { %3977 = vmatpush.bf16.msrb.mxu0 %v6393_v62  ;;  %v3771_v54 = vpop.f32.mrf.mxu0 }
 0x203   :  { %3990 = vmatpush.bf16.msrb.mxu1 %v6521_v53  ;;  %v3784_v43 = vpop.f32.mrf.mxu1  ;;  %v4061_v62 = vsel %vm11194_vm5, %v11127_v13, %v4057_v33  ;;  %v7697_v33 = vld [vmem:[%s11355_s3 + $0xf0] sm:$0xff] }
 0x204   :  { %4003 = vmatpush.bf16.msrb.mxu2 %v6649_v56 }
 0x205   :  { %4016 = vmatpush.bf16.msrb.mxu3 %v6777_v57  ;;  %3978 = vmatmul.bf16.vlgmr.msrb.gmra.mxu0 %v8705_v23  ;;  %v7672_v23 = vld [vmem:[%s11355_s3 + $0x28] sm:$0xff]  ;;  %v4066_v57 = vsel %vm4063_vm7, %v4065_v55, %v4061_v62 }
 0x206   :  { %4362 = vmatpush.bf16.msra.mxu0 %v7674_v58  ;;  %3991 = vmatmul.bf16.vlgmr.msrb.gmra.mxu1 %v8718_v31  ;;  %v4039_v31 = vmul.f32 %v11122_v40, %v11090_v51  ;;  %v7667_v51 = vld [vmem:[%s11355_s3] sm:$0xff] }
 0x207   :  { %4375 = vmatpush.bf16.msra.mxu1 %v7682_v60  ;;  %4004 = vmatmul.bf16.vlgmr.msrb.gmra.mxu2 %v8716_v28  ;;  %v7680_v28 = vld [vmem:[%s11355_s3 + $0x68] sm:$0xff]  ;;  %v7683_v58 = vld [vmem:[%s11355_s3 + $0x80] sm:$0xff] }
 0x208   :  { %4017 = vmatmul.bf16.vlgmr.msrb.gmra.mxu3 %v8726_v35  ;;  %4388 = vmatpush.bf16.msra.mxu2 %v7690_v3  ;;  %v3759_v35 = vadd.f32 %v11032_v7, %v3746_v0  ;;  %v7679_v7 = vld [vmem:[%s11355_s3 + $0x60] sm:$0xff]  ;;  %v4040_v8 = vsub.f32 1.0, %v4039_v31  ;;  %v4099_v3 = vpack.c.bf16 %v4066_v57, %v4066_v57 }
 0x209   :  { %v7691_v57 = vld [vmem:[%s11355_s3 + $0xc0] sm:$0xff] }
 0x20a   :  { %4363 = vmatpush.bf16.msra.mxu0 %v7673_v34  ;;  %v3772_v5 = vadd.f32 %v3771_v54, %v3759_v35  ;;  %v3797_v22 = vpop.f32.mrf.mxu2  ;;  %v4041_v12 = vmul.f32 %v11122_v40, %v4040_v8  ;;  %v3773_v15 = vpop.f32.mrf.mxu0  ;;  %v569_v34 = vperm.slane %v10560_v20, 3 }
 0x20b   :  { %4376 = vmatpush.bf16.msra.mxu1 %v7681_v63  ;;  %v3810_v14 = vpop.f32.mrf.mxu3  ;;  %v3786_v25 = vpop.f32.mrf.mxu1 }
 0x20c   :  { %4389 = vmatpush.bf16.msra.mxu2 %v7689_v45  ;;  %v3785_v19 = vadd.f32 %v3784_v43, %v3772_v5  ;;  %v4042_v41 = vadd.f32 %v11122_v40, %v4041_v12 }
 0x20e   :  { %4364 = vmatpush.bf16.msra.mxu0 %v7672_v23  ;;  %v3798_v37 = vadd.f32 %v3797_v22, %v3785_v19  ;;  %v4046_v16 = vsel %vm11186_vm4, %v11122_v40, %v4042_v41 }
 0x20f   :  { %4377 = vmatpush.bf16.msra.mxu1 %v7680_v28  ;;  %v4051_v53 = vsel %vm4048_vm6, %v4050_v50, %v4046_v16  ;;  %v7695_v16 = vld [vmem:[%s11355_s3 + $0xe0] sm:$0xff]  ;;  %v7693_v50 = vld [vmem:[%s11355_s3 + $0xd0] sm:$0xff] }
 0x210   :  { %4390 = vmatpush.bf16.msra.mxu2 %v7688_v1  ;;  %v3811_v21 = vadd.f32 %v3810_v14, %v3798_v37  ;;  %v4098_v60 = vpack.c.bf16 %v4051_v53, %v4051_v53  ;;  %v7692_v53 = vld [vmem:[%s11355_s3 + $0xc8] sm:$0xff] }
 0x212   :  { %4365 = vmatpush.bf16.msra.mxu0 %v7671_v2  ;;  %v6892_v26 = vmul.f32 -1.442695, %v3811_v21  ;;  %v3799_v39 = vpop.f32.mrf.mxu2 }
 0x213   :  { %4378 = vmatpush.bf16.msra.mxu1 %v7679_v7  ;;  %v3812_v48 = vpop.f32.mrf.mxu3 }
 0x214   :  { %4391 = vmatpush.bf16.msra.mxu2 %v7687_v18  ;;  %7744 = vpow2.f32 %v6892_v26  ;;  %v7698_v26 = vld [vmem:[%s11355_s3 + $0xf8] sm:$0xff] }
 0x215   :  { %4401 = vmatpush.bf16.msra.mxu3 %v7698_v26 }
 0x216   :  { %4366 = vmatpush.bf16.msra.mxu0 %v7670_v10 }
 0x217   :  { %4379 = vmatpush.bf16.msra.mxu1 %v7678_v11 }
 0x218   :  { %4392 = vmatpush.bf16.msra.mxu2 %v7686_v38 }
 0x219   :  { %4402 = vmatpush.bf16.msra.mxu3 %v7697_v33 }
 0x21a   :  { %4367 = vmatpush.bf16.msra.mxu0 %v7669_v17  ;;  %v7745_v56 = vpop.eup %7744 }
 0x21b   :  { %4380 = vmatpush.bf16.msra.mxu1 %v7677_v24  ;;  %v4036_v59 = vadd.f32 1.0, %v7745_v56 }
 0x21c   :  { %4393 = vmatpush.bf16.msra.mxu2 %v7685_v29 }
 0x21d   :  { %7746 = vrcp.f32 %v4036_v59  ;;  %v4079_v13 = vand.u32 2147483648, %v4036_v59  ;;  %v4077_v31 = vand.u32 2147483647, %v4036_v59  ;;  %vm4073_vm9 = vweird.f32 %v4036_v59  ;;  %4403 = vmatpush.bf16.msra.mxu3 %v7696_v32 }
 0x21e   :  { %4368 = vmatpush.bf16.msra.mxu0 %v7668_v42 }
 0x21f   :  { %4381 = vmatpush.bf16.msra.mxu1 %v7676_v27  ;;  %v4080_v4 = vor.u32 1.1754944e-38, %v4079_v13  ;;  %vm4078_vm11 = vcmp.eq.f32.partialorder %v4077_v31, 8.507059e+37  ;;  %v7731_v13 = vld [vmem:[%s11356_s4] ss:$0 sm:$0xff] }
 0x220   :  { %4394 = vmatpush.bf16.msra.mxu2 %v7684_v47  ;;  %v7694_v47 = vld [vmem:[%s11355_s3 + $0xd8] sm:$0xff] }
 0x221   :  { %4404 = vmatpush.bf16.msra.mxu3 %v7695_v16 }
 0x222   :  { %4369 = vmatpush.bf16.msra.mxu0 %v7667_v51  ;;  %v3823_v0 = vpop.f32.mrf.mxu0 }
 0x223   :  { %4382 = vmatpush.bf16.msra.mxu1 %v7675_v52  ;;  %v7747_v61 = vpop.eup %7746  ;;  %v3824_v40 = vadd.f32 %v3823_v0, %v569_v34  ;;  %v3836_v23 = vpop.f32.mrf.mxu1 }
 0x224   :  { %4395 = vmatpush.bf16.msra.mxu2 %v7683_v58  ;;  %v4069_v63 = vmul.f32 %v7747_v61, %v4036_v59  ;;  %vm4074_vm8 = vweird.f32 %v7747_v61 }
 0x225   :  { %4370 = vmatmul.bf16.vlgmr.msra.gmra.mxu0 %v4098_v60  ;;  %v3837_v35 = vadd.f32 %v3836_v23, %v3824_v40  ;;  %vm4075_vm10 = vmor %vm4073_vm9, %vm4074_vm8  ;;  %4405 = vmatpush.bf16.msra.mxu3 %v7694_v47 }
 0x226   :  { %4383 = vmatmul.bf16.vlgmr.msra.gmra.mxu1 %v4099_v3  ;;  %v4070_v45 = vsub.f32 1.0, %v4069_v63 }
 0x228   :  { %v4071_v28 = vmul.f32 %v7747_v61, %v4070_v45 }
 0x229   :  { %4406 = vmatpush.bf16.msra.mxu3 %v7693_v50 }
 0x22a   :  { %v4072_v54 = vadd.f32 %v7747_v61, %v4071_v28  ;;  %v3849_v1 = vpop.f32.mrf.mxu2  ;;  %v3825_v8 = vpop.f32.mrf.mxu0 }
 0x22b   :  { %v3850_v2 = vadd.f32 %v3849_v1, %v3837_v35  ;;  %v3862_v43 = vpop.f32.mrf.mxu3  ;;  %v3838_v9 = vpop.f32.mrf.mxu1 }
 0x22c   :  { %v4076_v5 = vsel %vm4075_vm10, %v7747_v61, %v4072_v54 }
 0x22d   :  { %v4081_v20 = vsel %vm4078_vm11, %v4080_v4, %v4076_v5  ;;  %v3863_v7 = vadd.f32 %v3862_v43, %v3850_v2  ;;  %4407 = vmatpush.bf16.msra.mxu3 %v7692_v53  ;;  %v7710_v53 = vld [vmem:[%s11360_s7 + $0x18] sm:$0xff] }
 0x22e   :  { %v4100_v18 = vpack.c.bf16 %v4081_v20, %v4081_v20 }
 0x230   :  { %4396 = vmatmul.bf16.vlgmr.msra.gmra.mxu2 %v4100_v18 }
 0x231   :  { %4408 = vmatpush.bf16.msra.mxu3 %v7691_v57  ;;  %v7708_v57 = vld [vmem:[%s11360_s7 + $0x8] sm:$0xff] }
 0x232   :  { %v3851_v10 = vpop.f32.mrf.mxu2 }
 0x233   :  { %v3864_v19 = vpop.f32.mrf.mxu3 }
 0x242   :  { %v3875_v11 = vpop.f32.mrf.mxu0 }
 0x243   :  { %v3888_v22 = vpop.f32.mrf.mxu1  ;;  %v3876_v21 = vadd.f32 %v3875_v11, %v3863_v7 }
 0x245   :  { %v3889_v30 = vadd.f32 %v3888_v22, %v3876_v21  ;;  %v7700_v21 = vld [vmem:[%s11358_s5 + $0x8] sm:$0xff] }
 0x24a   :  { %v3901_v12 = vpop.f32.mrf.mxu2  ;;  %v3877_v14 = vpop.f32.mrf.mxu0 }
 0x24b   :  { %v3914_v37 = vpop.f32.mrf.mxu3  ;;  %v3890_v38 = vpop.f32.mrf.mxu1  ;;  %v3902_v44 = vadd.f32 %v3901_v12, %v3889_v30  ;;  %v7706_v14 = vld [vmem:[%s11358_s5 + $0x38] sm:$0xff] }
 0x24c   :  { %4502 = vmatpush.bf16.msrb.mxu0 %v7706_v14  ;;  %v7705_v38 = vld [vmem:[%s11358_s5 + $0x30] sm:$0xff] }
 0x24d   :  { %v3915_v6 = vadd.f32 %v3914_v37, %v3902_v44 }
 0x250   :  { %4503 = vmatpush.bf16.msrb.mxu0 %v7705_v38 }
 0x252   :  { %v3903_v15 = vpop.f32.mrf.mxu2 }
 0x253   :  { %v3916_v49 = vpop.f32.mrf.mxu3  ;;  %v7704_v15 = vld [vmem:[%s11358_s5 + $0x28] sm:$0xff] }
 0x254   :  { %4504 = vmatpush.bf16.msrb.mxu0 %v7704_v15  ;;  %v7703_v49 = vld [vmem:[%s11358_s5 + $0x20] sm:$0xff] }
 0x258   :  { %4505 = vmatpush.bf16.msrb.mxu0 %v7703_v49 }
 0x262   :  { %v3927_v17 = vpop.f32.mrf.mxu0 }
 0x263   :  { %v3940_v25 = vpop.f32.mrf.mxu1  ;;  %v3928_v39 = vadd.f32 %v3927_v17, %v3915_v6  ;;  %v7702_v17 = vld [vmem:[%s11358_s5 + $0x18] sm:$0xff] }
 0x264   :  { %4506 = vmatpush.bf16.msrb.mxu0 %v7702_v17 }
 0x265   :  { %v3941_v46 = vadd.f32 %v3940_v25, %v3928_v39  ;;  %v7701_v25 = vld [vmem:[%s11358_s5 + $0x10] sm:$0xff] }
 0x268   :  { %4507 = vmatpush.bf16.msrb.mxu0 %v7701_v25 }
 0x26a   :  { %v3953_v24 = vpop.f32.mrf.mxu2  ;;  %v3929_v29 = vpop.f32.mrf.mxu0 }
 0x26b   :  { %v3966_v41 = vpop.f32.mrf.mxu3  ;;  %v3942_v42 = vpop.f32.mrf.mxu1  ;;  %v3954_v48 = vadd.f32 %v3953_v24, %v3941_v46  ;;  %v7699_v24 = vld [vmem:[%s11358_s5] sm:$0xff] }
 0x26c   :  { %4508 = vmatpush.bf16.msrb.mxu0 %v7700_v21 }
 0x26d   :  { %v3967_v51 = vadd.f32 %v3966_v41, %v3954_v48 }
 0x270   :  { %4509 = vmatpush.bf16.msrb.mxu0 %v7699_v24 }
 0x272   :  { %v3955_v27 = vpop.f32.mrf.mxu2 }
 0x273   :  { %v3968_v36 = vpop.f32.mrf.mxu3 }
 0x282   :  { %v3979_v62 = vpop.f32.mrf.mxu0 }
 0x283   :  { %v3992_v55 = vpop.f32.mrf.mxu1  ;;  %v3980_v52 = vadd.f32 %v3979_v62, %v3967_v51  ;;  %v7714_v51 = vld [vmem:[%s11360_s7 + $0x38] sm:$0xff]  ;;  %v7713_v62 = vld [vmem:[%s11360_s7 + $0x30] sm:$0xff] }
 0x284   :  { %4603 = vmatpush.bf16.msrb.mxu1 %v7714_v51 }
 0x285   :  { %v3993_v56 = vadd.f32 %v3992_v55, %v3980_v52  ;;  %v7712_v55 = vld [vmem:[%s11360_s7 + $0x28] sm:$0xff]  ;;  %v7711_v52 = vld [vmem:[%s11360_s7 + $0x20] sm:$0xff] }
 0x288   :  { %4604 = vmatpush.bf16.msrb.mxu1 %v7713_v62 }
 0x28a   :  { %v4005_v58 = vpop.f32.mrf.mxu2  ;;  %v3981_v3 = vpop.f32.mrf.mxu0 }
 0x28b   :  { %v4006_v59 = vadd.f32 %v4005_v58, %v3993_v56  ;;  %v4018_v60 = vpop.f32.mrf.mxu3  ;;  %v3994_v34 = vpop.f32.mrf.mxu1  ;;  %v7709_v56 = vld [vmem:[%s11360_s7 + $0x10] sm:$0xff]  ;;  %v7707_v58 = vld [vmem:[%s11360_s7] sm:$0xff] }
 0x28c   :  { %4605 = vmatpush.bf16.msrb.mxu1 %v7712_v55 }
 0x28d   :  { %v4019_v61 = vadd.f32 %v4018_v60, %v4006_v59  ;;  %v7732_v59 = vld [vmem:[%s11357_s6] ss:$0 sm:$0xff] }
 0x28f   :  { %v6893_v63 = vmul.f32 -1.442695, %v4019_v61 }
 0x290   :  { %4606 = vmatpush.bf16.msrb.mxu1 %v7711_v52 }
 0x291   :  { %7748 = vpow2.f32 %v6893_v63 }
 0x292   :  { %v4007_v0 = vpop.f32.mrf.mxu2 }
 0x293   :  { %v4020_v45 = vpop.f32.mrf.mxu3 }
 0x294   :  { %4607 = vmatpush.bf16.msrb.mxu1 %v7710_v53 }
 0x297   :  { %v7749_v40 = vpop.eup %7748 }
 0x298   :  { %v4037_v23 = vadd.f32 1.0, %v7749_v40  ;;  %4608 = vmatpush.bf16.msrb.mxu1 %v7709_v56 }
 0x29a   :  { %7750 = vrcp.f32 %v4037_v23  ;;  %v4094_v2 = vand.u32 2147483648, %v4037_v23  ;;  %v4092_v20 = vand.u32 2147483647, %v4037_v23  ;;  %vm4088_vm13 = vweird.f32 %v4037_v23 }
 0x29c   :  { %v4095_v8 = vor.u32 1.1754944e-38, %v4094_v2  ;;  %vm4093_vm15 = vcmp.eq.f32.partialorder %v4092_v20, 8.507059e+37  ;;  %4609 = vmatpush.bf16.msrb.mxu1 %v7708_v57  ;;  %v7720_v20 = vld [vmem:[%s11362_s9 + $0x28] sm:$0xff] }
 0x2a0   :  { %v7751_v28 = vpop.eup %7750  ;;  %4610 = vmatpush.bf16.msrb.mxu1 %v7707_v58 }
 0x2a1   :  { %v4084_v31 = vmul.f32 %v7751_v28, %v4037_v23  ;;  %vm4089_vm12 = vweird.f32 %v7751_v28 }
 0x2a2   :  { %v4371_v35 = vpop.f32.mrf.mxu0  ;;  %vm4090_vm14 = vmor %vm4088_vm13, %vm4089_vm12 }
 0x2a3   :  { %v4372_v54 = vadd.f32 %v7731_v13, %v4371_v35  ;;  %v4384_v1 = vpop.f32.mrf.mxu1  ;;  %v4085_v4 = vsub.f32 1.0, %v4084_v31 }
 0x2a5   :  { %v4385_v43 = vadd.f32 %v4384_v1, %v4372_v54  ;;  %v4086_v5 = vmul.f32 %v7751_v28, %v4085_v4 }
 0x2a7   :  { %v4087_v7 = vadd.f32 %v7751_v28, %v4086_v5  ;;  %v7721_v5 = vld [vmem:[%s11362_s9 + $0x30] sm:$0xff] }
 0x2a9   :  { %v4091_v9 = vsel %vm4090_vm14, %v7751_v28, %v4087_v7  ;;  %v7719_v7 = vld [vmem:[%s11362_s9 + $0x20] sm:$0xff] }
 0x2aa   :  { %v4373_v18 = vpop.f32.mrf.mxu0  ;;  %v4096_v19 = vsel %vm4093_vm15, %v4095_v8, %v4091_v9  ;;  %v7718_v8 = vld [vmem:[%s11362_s9 + $0x18] sm:$0xff]  ;;  %v7716_v9 = vld [vmem:[%s11362_s9 + $0x8] sm:$0xff] }
 0x2ab   :  { %v4386_v10 = vpop.f32.mrf.mxu1  ;;  %v4101_v11 = vpack.c.bf16 %v4096_v19, %v4096_v19  ;;  %v7717_v18 = vld [vmem:[%s11362_s9 + $0x10] sm:$0xff]  ;;  %v7733_v19 = vld [vmem:[%s11359_s8] ss:$0 sm:$0xff] }
 0x2ac   :  { %v7715_v10 = vld [vmem:[%s11362_s9] sm:$0xff] }
 0x2ad   :  { %4409 = vmatmul.bf16.vlgmr.msra.gmra.mxu3 %v4101_v11 }
 0x2b3   :  { %v4397_v22 = vpop.f32.mrf.mxu2 }
 0x2b4   :  { %v4398_v12 = vadd.f32 %v4397_v22, %v4385_v43  ;;  %v7722_v43 = vld [vmem:[%s11362_s9 + $0x38] sm:$0xff] }
 0x2b5   :  { %4704 = vmatpush.bf16.msrb.mxu2 %v7722_v43 }
 0x2b9   :  { %4705 = vmatpush.bf16.msrb.mxu2 %v7721_v5 }
 0x2bb   :  { %v4399_v37 = vpop.f32.mrf.mxu2 }
 0x2bd   :  { %4706 = vmatpush.bf16.msrb.mxu2 %v7720_v20 }
 0x2c1   :  { %4707 = vmatpush.bf16.msrb.mxu2 %v7719_v7 }
 0x2c5   :  { %4708 = vmatpush.bf16.msrb.mxu2 %v7718_v8 }
 0x2c9   :  { %4709 = vmatpush.bf16.msrb.mxu2 %v7717_v18 }
 0x2cd   :  { %4710 = vmatpush.bf16.msrb.mxu2 %v7716_v9 }
 0x2d1   :  { %4711 = vmatpush.bf16.msrb.mxu2 %v7715_v10 }
 0x330   :  { %v4410_v26 = vpop.f32.mrf.mxu3 }
 0x331   :  { %v4411_v41 = vadd.f32 %v4410_v26, %v4398_v12 }
 0x333   :  { %v7022_v29 = vmul.f32 -1.442695, %v4411_v41 }
 0x335   :  { %7752 = vpow2.f32 %v7022_v29 }
 0x338   :  { %v4412_v30 = vpop.f32.mrf.mxu3 }
 0x33b   :  { %v7753_v42 = vpop.eup %7752 }
 0x33c   :  { %v4417_v33 = vadd.f32 1.0, %v7753_v42 }
 0x33e   :  { %7754 = vrcp.f32 %v4417_v33  ;;  %v4429_v36 = vand.u32 2147483648, %v4417_v33  ;;  %v4427_v39 = vand.u32 2147483647, %v4417_v33  ;;  %vm4423_vm1 = vweird.f32 %v4417_v33 }
 0x340   :  { %v4430_v46 = vor.u32 1.1754944e-38, %v4429_v36  ;;  %vm4428_vm3 = vcmp.eq.f32.partialorder %v4427_v39, 8.507059e+37  ;;  %v7726_v36 = vld [vmem:[%s11364_s11 + $0x18] sm:$0xff]  ;;  %v7724_v39 = vld [vmem:[%s11364_s11 + $0x8] sm:$0xff] }
 0x344   :  { %v7755_v44 = vpop.eup %7754 }
 0x345   :  { %v4419_v27 = vmul.f32 %v7755_v44, %v4417_v33  ;;  %vm4424_vm0 = vweird.f32 %v7755_v44  ;;  %v7730_v33 = vld [vmem:[%s11364_s11 + $0x38] sm:$0xff] }
 0x346   :  { %vm4425_vm2 = vmor %vm4423_vm1, %vm4424_vm0  ;;  %4805 = vmatpush.bf16.msrb.mxu3 %v7730_v33 }
 0x347   :  { %v4420_v32 = vsub.f32 1.0, %v4419_v27  ;;  %v7728_v27 = vld [vmem:[%s11364_s11 + $0x28] sm:$0xff] }
 0x349   :  { %v4421_v6 = vmul.f32 %v7755_v44, %v4420_v32  ;;  %v7727_v32 = vld [vmem:[%s11364_s11 + $0x20] sm:$0xff] }
 0x34b   :  { %v4422_v16 = vadd.f32 %v7755_v44, %v4421_v6  ;;  %v7725_v6 = vld [vmem:[%s11364_s11 + $0x10] sm:$0xff] }
 0x34d   :  { %v4426_v47 = vsel %vm4425_vm2, %v7755_v44, %v4422_v16  ;;  %v7729_v44 = vld [vmem:[%s11364_s11 + $0x30] sm:$0xff]  ;;  %v7723_v16 = vld [vmem:[%s11364_s11] sm:$0xff] }
 0x34e   :  { %v4431_v48 = vsel %vm4428_vm3, %v4430_v46, %v4426_v47  ;;  %4806 = vmatpush.bf16.msrb.mxu3 %v7729_v44  ;;  %v7734_v46 = vld [vmem:[%s11361_s10] ss:$0 sm:$0xff] }
 0x34f   :  { %v4433_v50 = vpack.c.bf16 %v4431_v48, %v4431_v48 }
 0x351   :  { %4510 = vmatmul.bf16.vlgmr.msrb.gmra.mxu0 %v4433_v50 }
 0x352   :  { %4807 = vmatpush.bf16.msrb.mxu3 %v7728_v27 }
 0x356   :  { %4808 = vmatpush.bf16.msrb.mxu3 %v7727_v32 }
 0x35a   :  { %4809 = vmatpush.bf16.msrb.mxu3 %v7726_v36 }
 0x35e   :  { %4810 = vmatpush.bf16.msrb.mxu3 %v7725_v6 }
 0x362   :  { %4811 = vmatpush.bf16.msrb.mxu3 %v7724_v39 }
 0x366   :  { %4812 = vmatpush.bf16.msrb.mxu3 %v7723_v16 }
 0x3ce   :  { %v4511_v60 = vpop.f32.mrf.mxu0 }
 0x3cf   :  { %v4512_v3 = vadd.f32 %v7732_v59, %v4511_v60 }
 0x3d1   :  { %v7055_v34 = vmul.f32 -1.442695, %v4512_v3 }
 0x3d3   :  { %7756 = vpow2.f32 %v7055_v34 }
 0x3d6   :  { %v4513_v61 = vpop.f32.mrf.mxu0 }
 0x3d9   :  { %v7757_v63 = vpop.eup %7756 }
 0x3da   :  { %v4518_v0 = vadd.f32 1.0, %v7757_v63 }
 0x3dc   :  { %7758 = vrcp.f32 %v4518_v0  ;;  %v4530_v13 = vand.u32 2147483648, %v4518_v0  ;;  %v4528_v31 = vand.u32 2147483647, %v4518_v0  ;;  %vm4524_vm5 = vweird.f32 %v4518_v0 }
 0x3de   :  { %v4531_v54 = vor.u32 1.1754944e-38, %v4530_v13  ;;  %vm4529_vm7 = vcmp.eq.f32.partialorder %v4528_v31, 8.507059e+37 }
 0x3e2   :  { %v7759_v45 = vpop.eup %7758 }
 0x3e3   :  { %v4520_v40 = vmul.f32 %v7759_v45, %v4518_v0  ;;  %vm4525_vm4 = vweird.f32 %v7759_v45  ;;  %v7735_v0 = vld [vmem:[%s11363_s12] ss:$0 sm:$0xff] }
 0x3e4   :  { %vm4526_vm6 = vmor %vm4524_vm5, %vm4525_vm4 }
 0x3e5   :  { %v4521_v23 = vsub.f32 1.0, %v4520_v40 }
 0x3e7   :  { %v4522_v28 = vmul.f32 %v7759_v45, %v4521_v23 }
 0x3e9   :  { %v4523_v35 = vadd.f32 %v7759_v45, %v4522_v28 }
 0x3eb   :  { %v4527_v1 = vsel %vm4526_vm6, %v7759_v45, %v4523_v35 }
 0x3ec   :  { %v4532_v4 = vsel %vm4529_vm7, %v4531_v54, %v4527_v1 }
 0x3ed   :  { %v4534_v2 = vpack.c.bf16 %v4532_v4, %v4532_v4 }
 0x3ef   :  { %4611 = vmatmul.bf16.vlgmr.msrb.gmra.mxu1 %v4534_v2 }
 0x46c   :  { %v4612_v11 = vpop.f32.mrf.mxu1 }
 0x46d   :  { %v4613_v22 = vadd.f32 %v7733_v19, %v4612_v11 }
 0x46f   :  { %v7088_v12 = vmul.f32 -1.442695, %v4613_v22 }
 0x471   :  { %7760 = vpow2.f32 %v7088_v12 }
 0x474   :  { %v4614_v37 = vpop.f32.mrf.mxu1 }
 0x477   :  { %v7761_v14 = vpop.eup %7760 }
 0x478   :  { %v4619_v38 = vadd.f32 1.0, %v7761_v14 }
 0x47a   :  { %7762 = vrcp.f32 %v4619_v38  ;;  %v4631_v25 = vand.u32 2147483648, %v4619_v38  ;;  %v4629_v24 = vand.u32 2147483647, %v4619_v38  ;;  %vm4625_vm9 = vweird.f32 %v4619_v38 }
 0x47c   :  { %v4632_v41 = vor.u32 1.1754944e-38, %v4631_v25  ;;  %vm4630_vm11 = vcmp.eq.f32.partialorder %v4629_v24, 8.507059e+37 }
 0x480   :  { %v7763_v15 = vpop.eup %7762 }
 0x481   :  { %v4621_v49 = vmul.f32 %v7763_v15, %v4619_v38  ;;  %vm4626_vm8 = vweird.f32 %v7763_v15 }
 0x482   :  { %vm4627_vm10 = vmor %vm4625_vm9, %vm4626_vm8 }
 0x483   :  { %v4622_v17 = vsub.f32 1.0, %v4621_v49 }
 0x485   :  { %v4623_v21 = vmul.f32 %v7763_v15, %v4622_v17 }
 0x487   :  { %v4624_v26 = vadd.f32 %v7763_v15, %v4623_v21 }
 0x489   :  { %v4628_v29 = vsel %vm4627_vm10, %v7763_v15, %v4624_v26 }
 0x48a   :  { %v4633_v30 = vsel %vm4630_vm11, %v4632_v41, %v4628_v29 }
 0x48b   :  { %v4635_v42 = vpack.c.bf16 %v4633_v30, %v4633_v30 }
 0x48d   :  { %4712 = vmatmul.bf16.vlgmr.msrb.gmra.mxu2 %v4635_v42 }
 0x510   :  { %v4713_v47 = vpop.f32.mrf.mxu2 }
 0x511   :  { %v4714_v48 = vadd.f32 %v7734_v46, %v4713_v47 }
 0x513   :  { %v7121_v50 = vmul.f32 -1.442695, %v4714_v48 }
 0x515   :  { %7764 = vpow2.f32 %v7121_v50 }
 0x518   :  { %v4715_v51 = vpop.f32.mrf.mxu2 }
 0x51b   :  { %v7765_v62 = vpop.eup %7764 }
 0x51c   :  { %v4720_v55 = vadd.f32 1.0, %v7765_v62 }
 0x51e   :  { %7766 = vrcp.f32 %v4720_v55  ;;  %v4732_v57 = vand.u32 2147483648, %v4720_v55  ;;  %v4730_v59 = vand.u32 2147483647, %v4720_v55  ;;  %vm4726_vm13 = vweird.f32 %v4720_v55 }
 0x520   :  { %v4733_v3 = vor.u32 1.1754944e-38, %v4732_v57  ;;  %vm4731_vm15 = vcmp.eq.f32.partialorder %v4730_v59, 8.507059e+37 }
 0x524   :  { %v7767_v52 = vpop.eup %7766 }
 0x525   :  { %v4722_v53 = vmul.f32 %v7767_v52, %v4720_v55  ;;  %vm4727_vm12 = vweird.f32 %v7767_v52 }
 0x526   :  { %vm4728_vm14 = vmor %vm4726_vm13, %vm4727_vm12 }
 0x527   :  { %v4723_v56 = vsub.f32 1.0, %v4722_v53 }
 0x529   :  { %v4724_v58 = vmul.f32 %v7767_v52, %v4723_v56 }
 0x52b   :  { %v4725_v60 = vadd.f32 %v7767_v52, %v4724_v58 }
 0x52d   :  { %v4729_v34 = vsel %vm4728_vm14, %v7767_v52, %v4725_v60 }
 0x52e   :  { %v4734_v61 = vsel %vm4731_vm15, %v4733_v3, %v4729_v34 }
 0x52f   :  { %v4736_v63 = vpack.c.bf16 %v4734_v61, %v4734_v61 }
 0x531   :  { %4813 = vmatmul.bf16.vlgmr.msrb.gmra.mxu3 %v4736_v63 }
 0x5b4   :  { %v4814_v45 = vpop.f32.mrf.mxu3 }
 0x5b5   :  { %v4815_v40 = vadd.f32 %v7735_v0, %v4814_v45 }
 0x5b7   :  { %v7154_v23 = vmul.f32 -1.442695, %v4815_v40 }
 0x5b9   :  { %7768 = vpow2.f32 %v7154_v23 }
 0x5bc   :  { %v4816_v13 = vpop.f32.mrf.mxu3 }
 0x5bf   :  { %v7769_v28 = vpop.eup %7768 }
 0x5c0   :  { %v4821_v31 = vadd.f32 1.0, %v7769_v28 }
 0x5c2   :  { %7770 = vrcp.f32 %v4821_v31  ;;  %v4833_v4 = vand.u32 2147483648, %v4821_v31  ;;  %v4831_v43 = vand.u32 2147483647, %v4821_v31  ;;  %vm4827_vm1 = vweird.f32 %v4821_v31 }
 0x5c4   :  { %v4834_v20 = vor.u32 1.1754944e-38, %v4833_v4  ;;  %vm4832_vm3 = vcmp.eq.f32.partialorder %v4831_v43, 8.507059e+37 }
 0x5c8   :  { %v7771_v35 = vpop.eup %7770 }
 0x5c9   :  { %v4823_v54 = vmul.f32 %v7771_v35, %v4821_v31  ;;  %vm4828_vm0 = vweird.f32 %v7771_v35 }
 0x5ca   :  { %vm4829_vm2 = vmor %vm4827_vm1, %vm4828_vm0 }
 0x5cb   :  { %v4824_v1 = vsub.f32 1.0, %v4823_v54 }
 0x5cd   :  { %v4825_v2 = vmul.f32 %v7771_v35, %v4824_v1 }
 0x5cf   :  { %v4826_v5 = vadd.f32 %v7771_v35, %v4825_v2 }
 0x5d1   :  { %v4830_v7 = vsel %vm4829_vm2, %v7771_v35, %v4826_v5 }
 0x5d2   :  { %v4835_v8 = vsel %vm4832_vm3, %v4834_v20, %v4830_v7 }
 0x5d3   :  { %4837 = vst [vmem:[%s11365_s13] sm:$0xff] %v4835_v8 }

</bundles_post_ra>
